<compile_context>
chip_gen: v7x
topology: tpu7x:2x2x1
jax: 0.10.0
libtpu: 0.0.40
codegen_flags: <defaults>
</compile_context>

<pallas_src>
import functools

import jax
import jax.numpy as jnp
import numpy as np
from jax import lax
from jax.experimental import pallas as pl
from jax.experimental.pallas import tpu as pltpu

_VMEM_LIMIT = 32 * 1024 * 1024  # far above the ~0.5 MiB this kernel uses; safe on v5e/v6e/v7x


# ----------------------------- fused Pallas kernel ---------------------------------- #

def _global_block_kernel(x_ref, w13_ref, b13_ref, ssel_ref, w2_ref, b2_ref,
                         kup_ref, w4_ref, b4_ref, o_ref,
                         slabx_ref, slab2_ref, slab3_ref, *,
                         H, W, Hs, Ws, Cin, C):
    """One image per grid step: the full GlobalBlock forward with VMEM-resident
    intermediates.  Each conv is a single (M, 9*Cin) @ (9*Cin, Cout) matmul."""

    def build_slab(slab_ref, src, Hh, Ww, Cs):
        # Fill slab_ref (Hh, Ww, 9*Cs) with the 9 zero-padded 3x3 tap shifts of src
        # (Hh, Ww, Cs); return it flattened to (Hh*Ww, 9*Cs) (leading-dim merge only).
        slab_ref[...] = jnp.zeros_like(slab_ref)
        for di in range(3):                                    # statically unrolled taps
            for dj in range(3):
                u, v = di - 1, dj - 1
                i0, i1 = max(0, -u), Hh - max(0, u)
                j0, j1 = max(0, -v), Ww - max(0, v)
                t = di * 3 + dj
                slab_ref[i0:i1, j0:j1, t * Cs:(t + 1) * Cs] = (
                    src[i0 + u:i1 + u, j0 + v:j1 + v, :])
        return slab_ref[...].reshape(Hh * Ww, 9 * Cs)

    x = x_ref[0]                                               # (H, W, Cin)

    # --- conv3 (x_1 branch) and conv1 @ stride 1 (x_2 branch): one fused matmul ---- #
    slab = build_slab(slabx_ref, x, H, W, Cin)                 # (H*W, 9*Cin)
    y13 = jnp.maximum(
        jnp.dot(slab, w13_ref[...], preferred_element_type=jnp.float32) + b13_ref[...],
        0.0)                                                   # (H*W, 2C)
    x1 = y13[:, :C]                                            # relu(bn3(conv3(x)))
    x2f = y13[:, C:]                                           # relu(bn1(conv1_s1(x)))

    # stride-2 subsample of the conv1 branch (BN/ReLU commute with row selection)
    x2 = jnp.dot(ssel_ref[...], x2f, preferred_element_type=jnp.float32)  # (Hs*Ws, C)

    # --- conv2 + bn2 + relu ------------------------------------------------------- #
    slab2 = build_slab(slab2_ref, x2.reshape(Hs, Ws, C), Hs, Ws, C)        # (Hs*Ws, 9C)
    x2c = jnp.maximum(
        jnp.dot(slab2, w2_ref[...], preferred_element_type=jnp.float32) + b2_ref[...],
        0.0)                                                   # (Hs*Ws, C)

    # --- bilinear align_corners upsample (precomputed kron(Ah, Aw)) + x_1 residual - #
    x3 = x1 + jnp.dot(kup_ref[...], x2c, preferred_element_type=jnp.float32)  # (H*W, C)

    # --- conv4 + bn4 + relu + input residual --------------------------------------- #
    slab3 = build_slab(slab3_ref, x3.reshape(H, W, C), H, W, C)            # (H*W, 9C)
    y4 = jnp.maximum(
        jnp.dot(slab3, w4_ref[...], preferred_element_type=jnp.float32) + b4_ref[...],
        0.0)                                                   # (H*W, Cin)
    o_ref[...] = (y4 + x.reshape(H * W, Cin)).reshape(1, H, W, Cin)


# ----------------------------- interpolation / selection constants ------------------ #

def _align_corners_matrix(out_size, in_size):
    """Bilinear interpolation matrix, PyTorch align_corners=True."""
    if in_size == 1:
        return np.ones((out_size, 1), np.float32)
    A = np.zeros((out_size, in_size), np.float32)
    if out_size == 1:
        A[0, 0] = 1.0
        return A
    src = np.arange(out_size, dtype=np.float64) * (in_size - 1) / (out_size - 1)
    i0 = np.clip(np.floor(src).astype(np.int64), 0, in_size - 2)
    frac = (src - i0).astype(np.float32)
    rows = np.arange(out_size)
    A[rows, i0] += 1.0 - frac
    A[rows, i0 + 1] += frac
    return A


def _subsample_matrix(H, W, Hs, Ws, stride=2):
    """(Hs*Ws, H*W) 0/1 matrix selecting the stride-2 conv output positions."""
    S = np.zeros((Hs * Ws, H * W), np.float32)
    for i in range(Hs):
        for j in range(Ws):
            S[i * Ws + j, (stride * i) * W + stride * j] = 1.0
    return jnp.asarray(S)


def _upsample_matrix(H, W, Hs, Ws):
    """(H*W, Hs*Ws) align_corners=True bilinear upsample matrix kron(Ah, Aw)."""
    Ah = _align_corners_matrix(H, Hs)
    Aw = _align_corners_matrix(W, Ws)
    return jnp.asarray(np.kron(Ah, Aw))


# ----------------------------- GlobalBlock forward (Pallas) ------------------------- #

def global_block_forward(x_nchw, params):
    B, Cin, H, W = x_nchw.shape
    C = params["w2"].shape[1]
    Hs = (H - 1) // 2 + 1          # stride-2, pad-1, k=3 output sizes
    Ws = (W - 1) // 2 + 1

    x_nhwc = jnp.transpose(x_nchw, (0, 2, 3, 1))               # channels-minor for the kernel
    ssel = _subsample_matrix(H, W, Hs, Ws)                     # (Hs*Ws, H*W) constant
    kup = _upsample_matrix(H, W, Hs, Ws)                       # (H*W, Hs*Ws) constant

    kernel = functools.partial(_global_block_kernel,
                               H=H, W=W, Hs=Hs, Ws=Ws, Cin=Cin, C=C)
    const = lambda b: (0, 0)                                   # VMEM-resident constants

    out = pl.pallas_call(
        kernel,
        out_shape=jax.ShapeDtypeStruct((B, H, W, Cin), jnp.float32),
        grid=(B,),
        in_specs=[
            pl.BlockSpec((1, H, W, Cin), lambda b: (b, 0, 0, 0)),   # image
            pl.BlockSpec((9 * Cin, 2 * C), const),                  # conv3|conv1 weights
            pl.BlockSpec((1, 2 * C), const),                        # conv3|conv1 bias
            pl.BlockSpec((Hs * Ws, H * W), const),                  # stride-2 selection
            pl.BlockSpec((9 * C, C), const),                        # conv2 weights
            pl.BlockSpec((1, C), const),                            # conv2 bias
            pl.BlockSpec((H * W, Hs * Ws), const),                  # bilinear upsample
            pl.BlockSpec((9 * C, Cin), const),                      # conv4 weights
            pl.BlockSpec((1, Cin), const),                          # conv4 bias
        ],
        out_specs=pl.BlockSpec((1, H, W, Cin), lambda b: (b, 0, 0, 0)),
        scratch_shapes=[
            pltpu.VMEM((H, W, 9 * Cin), jnp.float32),               # conv3/conv1 tap slab
            pltpu.VMEM((Hs, Ws, 9 * C), jnp.float32),               # conv2 tap slab
            pltpu.VMEM((H, W, 9 * C), jnp.float32),                 # conv4 tap slab
        ],
        compiler_params=pltpu.CompilerParams(
            dimension_semantics=("parallel",),
            vmem_limit_bytes=_VMEM_LIMIT),
    )(x_nhwc, params["w13"], params["b13"], ssel,
      params["w2"], params["b2"], kup, params["w4"], params["b4"])

    return jnp.transpose(out, (0, 3, 1, 2))                    # back to PyTorch NCHW


# ----------------------------- params ----------------------------------------------- #

def init_raw_params(key, in_channel, C):
    """Deterministic synthetic parameters (conv weights + biases, BN affine + running stats)."""
    specs = [("conv1", in_channel, C), ("conv2", C, C),
             ("conv3", in_channel, C), ("conv4", C, in_channel)]
    raw = {}
    for i, (name, cin, cout) in enumerate(specs):
        kw, kb, kg, kbe, km = jax.random.split(jax.random.fold_in(key, i), 5)
        bound = 1.0 / float(np.sqrt(cin * 9))
        raw[name] = dict(
            w=jax.random.uniform(kw, (cout, cin, 3, 3), jnp.float32, -bound, bound),
            b=jax.random.uniform(kb, (cout,), jnp.float32, -bound, bound),
            gamma=1.0 + 0.1 * jax.random.normal(kg, (cout,), jnp.float32),
            beta=0.1 * jax.random.normal(kbe, (cout,), jnp.float32),
            mean=0.1 * jax.random.normal(km, (cout,), jnp.float32),
            var=jnp.ones((cout,), jnp.float32),
        )
    return raw


def fold_params(raw, eps=1e-5):
    """Fold conv bias + BN into tap-major weights (BN scale pre-multiplied) and a bias row."""
    def fold(p):
        cout, cin = p["w"].shape[0], p["w"].shape[1]
        w_mat = jnp.transpose(p["w"], (2, 3, 1, 0)).reshape(9 * cin, cout)  # (tap*Cin, Cout)
        s = p["gamma"] / jnp.sqrt(p["var"] + eps)
        bias = (p["b"] - p["mean"]) * s + p["beta"]
        return w_mat * s[None, :], bias[None, :]

    w3, b3 = fold(raw["conv3"])
    w1, b1 = fold(raw["conv1"])
    w2, b2 = fold(raw["conv2"])
    w4, b4 = fold(raw["conv4"])
    return dict(w13=jnp.concatenate([w3, w1], axis=1),   # columns 0:C -> conv3, C:2C -> conv1
                b13=jnp.concatenate([b3, b1], axis=1),
                w2=w2, b2=b2, w4=w4, b4=b4)


# ----------------------------- Pure-JAX reference (for self-check) ------------------ #

def ref_forward(x, raw, eps=1e-5):
    def cbr(xx, name, stride):
        p = raw[name]
        y = lax.conv_general_dilated(
            xx, p["w"], (stride, stride), ((1, 1), (1, 1)),
            dimension_numbers=("NCHW", "OIHW", "NCHW"))
        y = y + p["b"][None, :, None, None]
        s = p["gamma"] / jnp.sqrt(p["var"] + eps)
        y = (y - p["mean"][None, :, None, None]) * s[None, :, None, None] \
            + p["beta"][None, :, None, None]
        return jnp.maximum(y, 0.0)

    B, Cin, H, W = x.shape
    x1 = cbr(x, "conv3", 1)
    x2 = cbr(x, "conv1", 2)
    x2 = cbr(x2, "conv2", 1)
    Hs, Ws = x2.shape[2], x2.shape[3]
    Ah = jnp.asarray(_align_corners_matrix(H, Hs))
    Aw = jnp.asarray(_align_corners_matrix(W, Ws))
    x2u = jnp.einsum("ip,jq,bcpq->bcij", Ah, Aw, x2)
    x3 = x1 + x2u
    return cbr(x3, "conv4", 1) + x


# ----------------------------------- main -------------------------------------------- #

if __name__ == "__main__":
    key = jax.random.PRNGKey(0)
    kx, kp = jax.random.split(key)

    B, in_channel, H, W = 2, 4, 16, 16
    C = 8

    x_nchw = jax.random.normal(kx, (B, in_channel, H, W), jnp.float32)   # PyTorch layout

    raw = init_raw_params(kp, in_channel, C)
    folded = fold_params(raw)

    fwd = jax.jit(global_block_forward)
    out_nchw = jax.block_until_ready(fwd(x_nchw, folded))

    ref_nchw = jax.block_until_ready(ref_forward(x_nchw, raw))
    assert out_nchw.shape == (B, in_channel, H, W)
    assert np.allclose(np.asarray(out_nchw), np.asarray(ref_nchw), atol=2e-4, rtol=2e-4), (
        "Pallas GlobalBlock output mismatch vs pure-JAX reference"
    )

    print("KERNEL_OK")
</pallas_src>

<mosaic_0001>
module attributes {stable_mosaic.version = 11 : i64} {
  func.func @_global_block_kernel(%arg0: i32, %arg1: memref<1x16x16x4xf32, #tpu.memory_space<vmem>>, %arg2: memref<36x16xf32, #tpu.memory_space<vmem>>, %arg3: memref<1x16xf32, #tpu.memory_space<vmem>>, %arg4: memref<64x256xf32, #tpu.memory_space<vmem>>, %arg5: memref<72x8xf32, #tpu.memory_space<vmem>>, %arg6: memref<1x8xf32, #tpu.memory_space<vmem>>, %arg7: memref<256x64xf32, #tpu.memory_space<vmem>>, %arg8: memref<72x4xf32, #tpu.memory_space<vmem>>, %arg9: memref<1x4xf32, #tpu.memory_space<vmem>>, %arg10: memref<1x16x16x4xf32, #tpu.memory_space<vmem>>, %arg11: memref<16x16x36xf32, #tpu.memory_space<vmem>>, %arg12: memref<8x8x72xf32, #tpu.memory_space<vmem>>, %arg13: memref<16x16x72xf32, #tpu.memory_space<vmem>>) attributes {dimension_semantics = [#tpu.dimension_semantics<parallel>], iteration_bounds = array<i64: 2>, scalar_prefetch = 0 : i64, scratch_operands = 3 : i64, tpu.core_type = #tpu.core_type<tc>, window_params = [{transform_indices = @transform_0, window_bounds = array<i64: 1, 16, 16, 4>}, {pipeline_mode = #tpu.pipeline_mode<synchronous>, transform_indices = @transform_1, window_bounds = array<i64: 36, 16>}, {pipeline_mode = #tpu.pipeline_mode<synchronous>, transform_indices = @transform_2, window_bounds = array<i64: 1, 16>}, {pipeline_mode = #tpu.pipeline_mode<synchronous>, transform_indices = @transform_3, window_bounds = array<i64: 64, 256>}, {pipeline_mode = #tpu.pipeline_mode<synchronous>, transform_indices = @transform_4, window_bounds = array<i64: 72, 8>}, {pipeline_mode = #tpu.pipeline_mode<synchronous>, transform_indices = @transform_5, window_bounds = array<i64: 1, 8>}, {pipeline_mode = #tpu.pipeline_mode<synchronous>, transform_indices = @transform_6, window_bounds = array<i64: 256, 64>}, {pipeline_mode = #tpu.pipeline_mode<synchronous>, transform_indices = @transform_7, window_bounds = array<i64: 72, 4>}, {pipeline_mode = #tpu.pipeline_mode<synchronous>, transform_indices = @transform_8, window_bounds = array<i64: 1, 4>}, {transform_indices = @transform_9, window_bounds = array<i64: 1, 16, 16, 4>}]} {
    %c0 = arith.constant 0 : index
    %c0_0 = arith.constant 0 : index
    %c0_1 = arith.constant 0 : index
    %c0_2 = arith.constant 0 : index
    %0 = vector.load %arg1[%c0, %c0_0, %c0_1, %c0_2] : memref<1x16x16x4xf32, #tpu.memory_space<vmem>>, vector<1x16x16x4xf32>
    %1 = vector.shape_cast %0 : vector<1x16x16x4xf32> to vector<16x16x4xf32>
    %cst = arith.constant 0.000000e+00 : f32
    %2 = vector.broadcast %cst : f32 to vector<16x16x36xf32>
    %c0_3 = arith.constant 0 : index
    %c0_4 = arith.constant 0 : index
    %c0_5 = arith.constant 0 : index
    %3 = vector.load %arg11[%c0_3, %c0_4, %c0_5] : memref<16x16x36xf32, #tpu.memory_space<vmem>>, vector<16x16x36xf32>
    tpu.vector_store %arg11[%c0_3, %c0_4, %c0_5], %2 {strides = array<i32>} : memref<16x16x36xf32, #tpu.memory_space<vmem>>, vector<16x16x36xf32>,
    %4 = vector.extract_strided_slice %1 {offsets = [0, 0, 0], sizes = [15, 15, 4], strides = [1, 1, 1]} : vector<16x16x4xf32> to vector<15x15x4xf32>
    %c1 = arith.constant 1 : index
    %c1_6 = arith.constant 1 : index
    %c0_7 = arith.constant 0 : index
    %5 = vector.load %arg11[%c1, %c1_6, %c0_7] : memref<16x16x36xf32, #tpu.memory_space<vmem>>, vector<15x15x4xf32>
    tpu.vector_store %arg11[%c1, %c1_6, %c0_7], %4 {strides = array<i32>} : memref<16x16x36xf32, #tpu.memory_space<vmem>>, vector<15x15x4xf32>,
    %6 = vector.extract_strided_slice %1 {offsets = [0, 0, 0], sizes = [15, 16, 4], strides = [1, 1, 1]} : vector<16x16x4xf32> to vector<15x16x4xf32>
    %c1_8 = arith.constant 1 : index
    %c0_9 = arith.constant 0 : index
    %c4 = arith.constant 4 : index
    %7 = vector.load %arg11[%c1_8, %c0_9, %c4] : memref<16x16x36xf32, #tpu.memory_space<vmem>>, vector<15x16x4xf32>
    tpu.vector_store %arg11[%c1_8, %c0_9, %c4], %6 {strides = array<i32>} : memref<16x16x36xf32, #tpu.memory_space<vmem>>, vector<15x16x4xf32>,
    %8 = vector.extract_strided_slice %1 {offsets = [0, 1, 0], sizes = [15, 15, 4], strides = [1, 1, 1]} : vector<16x16x4xf32> to vector<15x15x4xf32>
    %c1_10 = arith.constant 1 : index
    %c0_11 = arith.constant 0 : index
    %c8 = arith.constant 8 : index
    %9 = vector.load %arg11[%c1_10, %c0_11, %c8] : memref<16x16x36xf32, #tpu.memory_space<vmem>>, vector<15x15x4xf32>
    tpu.vector_store %arg11[%c1_10, %c0_11, %c8], %8 {strides = array<i32>} : memref<16x16x36xf32, #tpu.memory_space<vmem>>, vector<15x15x4xf32>,
    %10 = vector.extract_strided_slice %1 {offsets = [0, 0, 0], sizes = [16, 15, 4], strides = [1, 1, 1]} : vector<16x16x4xf32> to vector<16x15x4xf32>
    %c0_12 = arith.constant 0 : index
    %c1_13 = arith.constant 1 : index
    %c12 = arith.constant 12 : index
    %11 = vector.load %arg11[%c0_12, %c1_13, %c12] : memref<16x16x36xf32, #tpu.memory_space<vmem>>, vector<16x15x4xf32>
    tpu.vector_store %arg11[%c0_12, %c1_13, %c12], %10 {strides = array<i32>} : memref<16x16x36xf32, #tpu.memory_space<vmem>>, vector<16x15x4xf32>,
    %c0_14 = arith.constant 0 : index
    %c0_15 = arith.constant 0 : index
    %c16 = arith.constant 16 : index
    %12 = vector.load %arg11[%c0_14, %c0_15, %c16] : memref<16x16x36xf32, #tpu.memory_space<vmem>>, vector<16x16x4xf32>
    tpu.vector_store %arg11[%c0_14, %c0_15, %c16], %1 {strides = array<i32>} : memref<16x16x36xf32, #tpu.memory_space<vmem>>, vector<16x16x4xf32>,
    %13 = vector.extract_strided_slice %1 {offsets = [0, 1, 0], sizes = [16, 15, 4], strides = [1, 1, 1]} : vector<16x16x4xf32> to vector<16x15x4xf32>
    %c0_16 = arith.constant 0 : index
    %c0_17 = arith.constant 0 : index
    %c20 = arith.constant 20 : index
    %14 = vector.load %arg11[%c0_16, %c0_17, %c20] : memref<16x16x36xf32, #tpu.memory_space<vmem>>, vector<16x15x4xf32>
    tpu.vector_store %arg11[%c0_16, %c0_17, %c20], %13 {strides = array<i32>} : memref<16x16x36xf32, #tpu.memory_space<vmem>>, vector<16x15x4xf32>,
    %15 = vector.extract_strided_slice %1 {offsets = [1, 0, 0], sizes = [15, 15, 4], strides = [1, 1, 1]} : vector<16x16x4xf32> to vector<15x15x4xf32>
    %c0_18 = arith.constant 0 : index
    %c1_19 = arith.constant 1 : index
    %c24 = arith.constant 24 : index
    %16 = vector.load %arg11[%c0_18, %c1_19, %c24] : memref<16x16x36xf32, #tpu.memory_space<vmem>>, vector<15x15x4xf32>
    tpu.vector_store %arg11[%c0_18, %c1_19, %c24], %15 {strides = array<i32>} : memref<16x16x36xf32, #tpu.memory_space<vmem>>, vector<15x15x4xf32>,
    %17 = vector.extract_strided_slice %1 {offsets = [1, 0, 0], sizes = [15, 16, 4], strides = [1, 1, 1]} : vector<16x16x4xf32> to vector<15x16x4xf32>
    %c0_20 = arith.constant 0 : index
    %c0_21 = arith.constant 0 : index
    %c28 = arith.constant 28 : index
    %18 = vector.load %arg11[%c0_20, %c0_21, %c28] : memref<16x16x36xf32, #tpu.memory_space<vmem>>, vector<15x16x4xf32>
    tpu.vector_store %arg11[%c0_20, %c0_21, %c28], %17 {strides = array<i32>} : memref<16x16x36xf32, #tpu.memory_space<vmem>>, vector<15x16x4xf32>,
    %19 = vector.extract_strided_slice %1 {offsets = [1, 1, 0], sizes = [15, 15, 4], strides = [1, 1, 1]} : vector<16x16x4xf32> to vector<15x15x4xf32>
    %c0_22 = arith.constant 0 : index
    %c0_23 = arith.constant 0 : index
    %c32 = arith.constant 32 : index
    %20 = vector.load %arg11[%c0_22, %c0_23, %c32] : memref<16x16x36xf32, #tpu.memory_space<vmem>>, vector<15x15x4xf32>
    tpu.vector_store %arg11[%c0_22, %c0_23, %c32], %19 {strides = array<i32>} : memref<16x16x36xf32, #tpu.memory_space<vmem>>, vector<15x15x4xf32>,
    %c0_24 = arith.constant 0 : index
    %c0_25 = arith.constant 0 : index
    %c0_26 = arith.constant 0 : index
    %21 = vector.load %arg11[%c0_24, %c0_25, %c0_26] : memref<16x16x36xf32, #tpu.memory_space<vmem>>, vector<16x16x36xf32>
    %22 = vector.shape_cast %21 : vector<16x16x36xf32> to vector<256x36xf32>
    %c0_27 = arith.constant 0 : index
    %c0_28 = arith.constant 0 : index
    %23 = vector.load %arg2[%c0_27, %c0_28] : memref<36x16xf32, #tpu.memory_space<vmem>>, vector<36x16xf32>
    %cst_29 = arith.constant dense<0.000000e+00> : vector<256x16xf32>
    %24 = tpu.matmul %22, %23, %cst_29 {dimension_numbers = #tpu.dot_dimension_numbers<[1], [0], [0], [1], [0, 0, 1, 1], [], []>} : vector<256x36xf32>, vector<36x16xf32>, vector<256x16xf32> -> vector<256x16xf32>
    %c0_30 = arith.constant 0 : index
    %c0_31 = arith.constant 0 : index
    %25 = vector.load %arg3[%c0_30, %c0_31] : memref<1x16xf32, #tpu.memory_space<vmem>>, vector<1x16xf32>
    %26 = vector.broadcast %25 : vector<1x16xf32> to vector<256x16xf32>
    %27 = arith.addf %24, %26 : vector<256x16xf32>
    %cst_32 = arith.constant 0.000000e+00 : f32
    %28 = vector.broadcast %cst_32 : f32 to vector<256x16xf32>
    %29 = arith.maximumf %27, %28 : vector<256x16xf32>
    %30 = vector.extract_strided_slice %29 {offsets = [0, 0], sizes = [256, 8], strides = [1, 1]} : vector<256x16xf32> to vector<256x8xf32>
    %31 = vector.extract_strided_slice %29 {offsets = [0, 8], sizes = [256, 8], strides = [1, 1]} : vector<256x16xf32> to vector<256x8xf32>
    %c0_33 = arith.constant 0 : index
    %c0_34 = arith.constant 0 : index
    %32 = vector.load %arg4[%c0_33, %c0_34] : memref<64x256xf32, #tpu.memory_space<vmem>>, vector<64x256xf32>
    %cst_35 = arith.constant dense<0.000000e+00> : vector<64x8xf32>
    %33 = tpu.matmul %32, %31, %cst_35 {dimension_numbers = #tpu.dot_dimension_numbers<[1], [0], [0], [1], [0, 0, 1, 1], [], []>} : vector<64x256xf32>, vector<256x8xf32>, vector<64x8xf32> -> vector<64x8xf32>
    %34 = vector.shape_cast %33 : vector<64x8xf32> to vector<8x8x8xf32>
    %cst_36 = arith.constant 0.000000e+00 : f32
    %35 = vector.broadcast %cst_36 : f32 to vector<8x8x72xf32>
    %c0_37 = arith.constant 0 : index
    %c0_38 = arith.constant 0 : index
    %c0_39 = arith.constant 0 : index
    %36 = vector.load %arg12[%c0_37, %c0_38, %c0_39] : memref<8x8x72xf32, #tpu.memory_space<vmem>>, vector<8x8x72xf32>
    tpu.vector_store %arg12[%c0_37, %c0_38, %c0_39], %35 {strides = array<i32>} : memref<8x8x72xf32, #tpu.memory_space<vmem>>, vector<8x8x72xf32>,
    %37 = vector.extract_strided_slice %34 {offsets = [0, 0, 0], sizes = [7, 7, 8], strides = [1, 1, 1]} : vector<8x8x8xf32> to vector<7x7x8xf32>
    %c1_40 = arith.constant 1 : index
    %c1_41 = arith.constant 1 : index
    %c0_42 = arith.constant 0 : index
    %38 = vector.load %arg12[%c1_40, %c1_41, %c0_42] : memref<8x8x72xf32, #tpu.memory_space<vmem>>, vector<7x7x8xf32>
    tpu.vector_store %arg12[%c1_40, %c1_41, %c0_42], %37 {strides = array<i32>} : memref<8x8x72xf32, #tpu.memory_space<vmem>>, vector<7x7x8xf32>,
    %39 = vector.extract_strided_slice %34 {offsets = [0, 0, 0], sizes = [7, 8, 8], strides = [1, 1, 1]} : vector<8x8x8xf32> to vector<7x8x8xf32>
    %c1_43 = arith.constant 1 : index
    %c0_44 = arith.constant 0 : index
    %c8_45 = arith.constant 8 : index
    %40 = vector.load %arg12[%c1_43, %c0_44, %c8_45] : memref<8x8x72xf32, #tpu.memory_space<vmem>>, vector<7x8x8xf32>
    tpu.vector_store %arg12[%c1_43, %c0_44, %c8_45], %39 {strides = array<i32>} : memref<8x8x72xf32, #tpu.memory_space<vmem>>, vector<7x8x8xf32>,
    %41 = vector.extract_strided_slice %34 {offsets = [0, 1, 0], sizes = [7, 7, 8], strides = [1, 1, 1]} : vector<8x8x8xf32> to vector<7x7x8xf32>
    %c1_46 = arith.constant 1 : index
    %c0_47 = arith.constant 0 : index
    %c16_48 = arith.constant 16 : index
    %42 = vector.load %arg12[%c1_46, %c0_47, %c16_48] : memref<8x8x72xf32, #tpu.memory_space<vmem>>, vector<7x7x8xf32>
    tpu.vector_store %arg12[%c1_46, %c0_47, %c16_48], %41 {strides = array<i32>} : memref<8x8x72xf32, #tpu.memory_space<vmem>>, vector<7x7x8xf32>,
    %43 = vector.extract_strided_slice %34 {offsets = [0, 0, 0], sizes = [8, 7, 8], strides = [1, 1, 1]} : vector<8x8x8xf32> to vector<8x7x8xf32>
    %c0_49 = arith.constant 0 : index
    %c1_50 = arith.constant 1 : index
    %c24_51 = arith.constant 24 : index
    %44 = vector.load %arg12[%c0_49, %c1_50, %c24_51] : memref<8x8x72xf32, #tpu.memory_space<vmem>>, vector<8x7x8xf32>
    tpu.vector_store %arg12[%c0_49, %c1_50, %c24_51], %43 {strides = array<i32>} : memref<8x8x72xf32, #tpu.memory_space<vmem>>, vector<8x7x8xf32>,
    %c0_52 = arith.constant 0 : index
    %c0_53 = arith.constant 0 : index
    %c32_54 = arith.constant 32 : index
    %45 = vector.load %arg12[%c0_52, %c0_53, %c32_54] : memref<8x8x72xf32, #tpu.memory_space<vmem>>, vector<8x8x8xf32>
    tpu.vector_store %arg12[%c0_52, %c0_53, %c32_54], %34 {strides = array<i32>} : memref<8x8x72xf32, #tpu.memory_space<vmem>>, vector<8x8x8xf32>,
    %46 = vector.extract_strided_slice %34 {offsets = [0, 1, 0], sizes = [8, 7, 8], strides = [1, 1, 1]} : vector<8x8x8xf32> to vector<8x7x8xf32>
    %c0_55 = arith.constant 0 : index
    %c0_56 = arith.constant 0 : index
    %c40 = arith.constant 40 : index
    %47 = vector.load %arg12[%c0_55, %c0_56, %c40] : memref<8x8x72xf32, #tpu.memory_space<vmem>>, vector<8x7x8xf32>
    tpu.vector_store %arg12[%c0_55, %c0_56, %c40], %46 {strides = array<i32>} : memref<8x8x72xf32, #tpu.memory_space<vmem>>, vector<8x7x8xf32>,
    %48 = vector.extract_strided_slice %34 {offsets = [1, 0, 0], sizes = [7, 7, 8], strides = [1, 1, 1]} : vector<8x8x8xf32> to vector<7x7x8xf32>
    %c0_57 = arith.constant 0 : index
    %c1_58 = arith.constant 1 : index
    %c48 = arith.constant 48 : index
    %49 = vector.load %arg12[%c0_57, %c1_58, %c48] : memref<8x8x72xf32, #tpu.memory_space<vmem>>, vector<7x7x8xf32>
    tpu.vector_store %arg12[%c0_57, %c1_58, %c48], %48 {strides = array<i32>} : memref<8x8x72xf32, #tpu.memory_space<vmem>>, vector<7x7x8xf32>,
    %50 = vector.extract_strided_slice %34 {offsets = [1, 0, 0], sizes = [7, 8, 8], strides = [1, 1, 1]} : vector<8x8x8xf32> to vector<7x8x8xf32>
    %c0_59 = arith.constant 0 : index
    %c0_60 = arith.constant 0 : index
    %c56 = arith.constant 56 : index
    %51 = vector.load %arg12[%c0_59, %c0_60, %c56] : memref<8x8x72xf32, #tpu.memory_space<vmem>>, vector<7x8x8xf32>
    tpu.vector_store %arg12[%c0_59, %c0_60, %c56], %50 {strides = array<i32>} : memref<8x8x72xf32, #tpu.memory_space<vmem>>, vector<7x8x8xf32>,
    %52 = vector.extract_strided_slice %34 {offsets = [1, 1, 0], sizes = [7, 7, 8], strides = [1, 1, 1]} : vector<8x8x8xf32> to vector<7x7x8xf32>
    %c0_61 = arith.constant 0 : index
    %c0_62 = arith.constant 0 : index
    %c64 = arith.constant 64 : index
    %53 = vector.load %arg12[%c0_61, %c0_62, %c64] : memref<8x8x72xf32, #tpu.memory_space<vmem>>, vector<7x7x8xf32>
    tpu.vector_store %arg12[%c0_61, %c0_62, %c64], %52 {strides = array<i32>} : memref<8x8x72xf32, #tpu.memory_space<vmem>>, vector<7x7x8xf32>,
    %c0_63 = arith.constant 0 : index
    %c0_64 = arith.constant 0 : index
    %c0_65 = arith.constant 0 : index
    %54 = vector.load %arg12[%c0_63, %c0_64, %c0_65] : memref<8x8x72xf32, #tpu.memory_space<vmem>>, vector<8x8x72xf32>
    %55 = vector.shape_cast %54 : vector<8x8x72xf32> to vector<64x72xf32>
    %c0_66 = arith.constant 0 : index
    %c0_67 = arith.constant 0 : index
    %56 = vector.load %arg5[%c0_66, %c0_67] : memref<72x8xf32, #tpu.memory_space<vmem>>, vector<72x8xf32>
    %cst_68 = arith.constant dense<0.000000e+00> : vector<64x8xf32>
    %57 = tpu.matmul %55, %56, %cst_68 {dimension_numbers = #tpu.dot_dimension_numbers<[1], [0], [0], [1], [0, 0, 1, 1], [], []>} : vector<64x72xf32>, vector<72x8xf32>, vector<64x8xf32> -> vector<64x8xf32>
    %c0_69 = arith.constant 0 : index
    %c0_70 = arith.constant 0 : index
    %58 = vector.load %arg6[%c0_69, %c0_70] : memref<1x8xf32, #tpu.memory_space<vmem>>, vector<1x8xf32>
    %59 = vector.broadcast %58 : vector<1x8xf32> to vector<64x8xf32>
    %60 = arith.addf %57, %59 : vector<64x8xf32>
    %cst_71 = arith.constant 0.000000e+00 : f32
    %61 = vector.broadcast %cst_71 : f32 to vector<64x8xf32>
    %62 = arith.maximumf %60, %61 : vector<64x8xf32>
    %c0_72 = arith.constant 0 : index
    %c0_73 = arith.constant 0 : index
    %63 = vector.load %arg7[%c0_72, %c0_73] : memref<256x64xf32, #tpu.memory_space<vmem>>, vector<256x64xf32>
    %cst_74 = arith.constant dense<0.000000e+00> : vector<256x8xf32>
    %64 = tpu.matmul %63, %62, %cst_74 {dimension_numbers = #tpu.dot_dimension_numbers<[1], [0], [0], [1], [0, 0, 1, 1], [], []>} : vector<256x64xf32>, vector<64x8xf32>, vector<256x8xf32> -> vector<256x8xf32>
    %65 = arith.addf %30, %64 : vector<256x8xf32>
    %66 = vector.shape_cast %65 : vector<256x8xf32> to vector<16x16x8xf32>
    %cst_75 = arith.constant 0.000000e+00 : f32
    %67 = vector.broadcast %cst_75 : f32 to vector<16x16x72xf32>
    %c0_76 = arith.constant 0 : index
    %c0_77 = arith.constant 0 : index
    %c0_78 = arith.constant 0 : index
    %68 = vector.load %arg13[%c0_76, %c0_77, %c0_78] : memref<16x16x72xf32, #tpu.memory_space<vmem>>, vector<16x16x72xf32>
    tpu.vector_store %arg13[%c0_76, %c0_77, %c0_78], %67 {strides = array<i32>} : memref<16x16x72xf32, #tpu.memory_space<vmem>>, vector<16x16x72xf32>,
    %69 = vector.extract_strided_slice %66 {offsets = [0, 0, 0], sizes = [15, 15, 8], strides = [1, 1, 1]} : vector<16x16x8xf32> to vector<15x15x8xf32>
    %c1_79 = arith.constant 1 : index
    %c1_80 = arith.constant 1 : index
    %c0_81 = arith.constant 0 : index
    %70 = vector.load %arg13[%c1_79, %c1_80, %c0_81] : memref<16x16x72xf32, #tpu.memory_space<vmem>>, vector<15x15x8xf32>
    tpu.vector_store %arg13[%c1_79, %c1_80, %c0_81], %69 {strides = array<i32>} : memref<16x16x72xf32, #tpu.memory_space<vmem>>, vector<15x15x8xf32>,
    %71 = vector.extract_strided_slice %66 {offsets = [0, 0, 0], sizes = [15, 16, 8], strides = [1, 1, 1]} : vector<16x16x8xf32> to vector<15x16x8xf32>
    %c1_82 = arith.constant 1 : index
    %c0_83 = arith.constant 0 : index
    %c8_84 = arith.constant 8 : index
    %72 = vector.load %arg13[%c1_82, %c0_83, %c8_84] : memref<16x16x72xf32, #tpu.memory_space<vmem>>, vector<15x16x8xf32>
    tpu.vector_store %arg13[%c1_82, %c0_83, %c8_84], %71 {strides = array<i32>} : memref<16x16x72xf32, #tpu.memory_space<vmem>>, vector<15x16x8xf32>,
    %73 = vector.extract_strided_slice %66 {offsets = [0, 1, 0], sizes = [15, 15, 8], strides = [1, 1, 1]} : vector<16x16x8xf32> to vector<15x15x8xf32>
    %c1_85 = arith.constant 1 : index
    %c0_86 = arith.constant 0 : index
    %c16_87 = arith.constant 16 : index
    %74 = vector.load %arg13[%c1_85, %c0_86, %c16_87] : memref<16x16x72xf32, #tpu.memory_space<vmem>>, vector<15x15x8xf32>
    tpu.vector_store %arg13[%c1_85, %c0_86, %c16_87], %73 {strides = array<i32>} : memref<16x16x72xf32, #tpu.memory_space<vmem>>, vector<15x15x8xf32>,
    %75 = vector.extract_strided_slice %66 {offsets = [0, 0, 0], sizes = [16, 15, 8], strides = [1, 1, 1]} : vector<16x16x8xf32> to vector<16x15x8xf32>
    %c0_88 = arith.constant 0 : index
    %c1_89 = arith.constant 1 : index
    %c24_90 = arith.constant 24 : index
    %76 = vector.load %arg13[%c0_88, %c1_89, %c24_90] : memref<16x16x72xf32, #tpu.memory_space<vmem>>, vector<16x15x8xf32>
    tpu.vector_store %arg13[%c0_88, %c1_89, %c24_90], %75 {strides = array<i32>} : memref<16x16x72xf32, #tpu.memory_space<vmem>>, vector<16x15x8xf32>,
    %c0_91 = arith.constant 0 : index
    %c0_92 = arith.constant 0 : index
    %c32_93 = arith.constant 32 : index
    %77 = vector.load %arg13[%c0_91, %c0_92, %c32_93] : memref<16x16x72xf32, #tpu.memory_space<vmem>>, vector<16x16x8xf32>
    tpu.vector_store %arg13[%c0_91, %c0_92, %c32_93], %66 {strides = array<i32>} : memref<16x16x72xf32, #tpu.memory_space<vmem>>, vector<16x16x8xf32>,
    %78 = vector.extract_strided_slice %66 {offsets = [0, 1, 0], sizes = [16, 15, 8], strides = [1, 1, 1]} : vector<16x16x8xf32> to vector<16x15x8xf32>
    %c0_94 = arith.constant 0 : index
    %c0_95 = arith.constant 0 : index
    %c40_96 = arith.constant 40 : index
    %79 = vector.load %arg13[%c0_94, %c0_95, %c40_96] : memref<16x16x72xf32, #tpu.memory_space<vmem>>, vector<16x15x8xf32>
    tpu.vector_store %arg13[%c0_94, %c0_95, %c40_96], %78 {strides = array<i32>} : memref<16x16x72xf32, #tpu.memory_space<vmem>>, vector<16x15x8xf32>,
    %80 = vector.extract_strided_slice %66 {offsets = [1, 0, 0], sizes = [15, 15, 8], strides = [1, 1, 1]} : vector<16x16x8xf32> to vector<15x15x8xf32>
    %c0_97 = arith.constant 0 : index
    %c1_98 = arith.constant 1 : index
    %c48_99 = arith.constant 48 : index
    %81 = vector.load %arg13[%c0_97, %c1_98, %c48_99] : memref<16x16x72xf32, #tpu.memory_space<vmem>>, vector<15x15x8xf32>
    tpu.vector_store %arg13[%c0_97, %c1_98, %c48_99], %80 {strides = array<i32>} : memref<16x16x72xf32, #tpu.memory_space<vmem>>, vector<15x15x8xf32>,
    %82 = vector.extract_strided_slice %66 {offsets = [1, 0, 0], sizes = [15, 16, 8], strides = [1, 1, 1]} : vector<16x16x8xf32> to vector<15x16x8xf32>
    %c0_100 = arith.constant 0 : index
    %c0_101 = arith.constant 0 : index
    %c56_102 = arith.constant 56 : index
    %83 = vector.load %arg13[%c0_100, %c0_101, %c56_102] : memref<16x16x72xf32, #tpu.memory_space<vmem>>, vector<15x16x8xf32>
    tpu.vector_store %arg13[%c0_100, %c0_101, %c56_102], %82 {strides = array<i32>} : memref<16x16x72xf32, #tpu.memory_space<vmem>>, vector<15x16x8xf32>,
    %84 = vector.extract_strided_slice %66 {offsets = [1, 1, 0], sizes = [15, 15, 8], strides = [1, 1, 1]} : vector<16x16x8xf32> to vector<15x15x8xf32>
    %c0_103 = arith.constant 0 : index
    %c0_104 = arith.constant 0 : index
    %c64_105 = arith.constant 64 : index
    %85 = vector.load %arg13[%c0_103, %c0_104, %c64_105] : memref<16x16x72xf32, #tpu.memory_space<vmem>>, vector<15x15x8xf32>
    tpu.vector_store %arg13[%c0_103, %c0_104, %c64_105], %84 {strides = array<i32>} : memref<16x16x72xf32, #tpu.memory_space<vmem>>, vector<15x15x8xf32>,
    %c0_106 = arith.constant 0 : index
    %c0_107 = arith.constant 0 : index
    %c0_108 = arith.constant 0 : index
    %86 = vector.load %arg13[%c0_106, %c0_107, %c0_108] : memref<16x16x72xf32, #tpu.memory_space<vmem>>, vector<16x16x72xf32>
    %87 = vector.shape_cast %86 : vector<16x16x72xf32> to vector<256x72xf32>
    %c0_109 = arith.constant 0 : index
    %c0_110 = arith.constant 0 : index
    %88 = vector.load %arg8[%c0_109, %c0_110] : memref<72x4xf32, #tpu.memory_space<vmem>>, vector<72x4xf32>
    %cst_111 = arith.constant dense<0.000000e+00> : vector<256x4xf32>
    %89 = tpu.matmul %87, %88, %cst_111 {dimension_numbers = #tpu.dot_dimension_numbers<[1], [0], [0], [1], [0, 0, 1, 1], [], []>} : vector<256x72xf32>, vector<72x4xf32>, vector<256x4xf32> -> vector<256x4xf32>
    %c0_112 = arith.constant 0 : index
    %c0_113 = arith.constant 0 : index
    %90 = vector.load %arg9[%c0_112, %c0_113] : memref<1x4xf32, #tpu.memory_space<vmem>>, vector<1x4xf32>
    %91 = vector.broadcast %90 : vector<1x4xf32> to vector<256x4xf32>
    %92 = arith.addf %89, %91 : vector<256x4xf32>
    %cst_114 = arith.constant 0.000000e+00 : f32
    %93 = vector.broadcast %cst_114 : f32 to vector<256x4xf32>
    %94 = arith.maximumf %92, %93 : vector<256x4xf32>
    %95 = vector.shape_cast %1 : vector<16x16x4xf32> to vector<256x4xf32>
    %96 = arith.addf %94, %95 : vector<256x4xf32>
    %97 = vector.shape_cast %96 : vector<256x4xf32> to vector<1x16x16x4xf32>
    %c0_115 = arith.constant 0 : index
    %c0_116 = arith.constant 0 : index
    %c0_117 = arith.constant 0 : index
    %c0_118 = arith.constant 0 : index
    %98 = vector.load %arg10[%c0_115, %c0_116, %c0_117, %c0_118] : memref<1x16x16x4xf32, #tpu.memory_space<vmem>>, vector<1x16x16x4xf32>
    tpu.vector_store %arg10[%c0_115, %c0_116, %c0_117, %c0_118], %97 {strides = array<i32>} : memref<1x16x16x4xf32, #tpu.memory_space<vmem>>, vector<1x16x16x4xf32>,
    return
  }
  func.func @transform_0(%arg0: i32) -> (i32, i32, i32, i32) {
    %c0_i32 = arith.constant 0 : i32
    %c0_i32_0 = arith.constant 0 : i32
    %c0_i32_1 = arith.constant 0 : i32
    %c0_i32_2 = arith.constant 0 : i32
    return %arg0, %c0_i32, %c0_i32_0, %c0_i32_1 : i32, i32, i32, i32
  }
  func.func @transform_1(%arg0: i32) -> (i32, i32) {
    %c0_i32 = arith.constant 0 : i32
    %c0_i32_0 = arith.constant 0 : i32
    %c0_i32_1 = arith.constant 0 : i32
    return %c0_i32, %c0_i32_0 : i32, i32
  }
  func.func @transform_2(%arg0: i32) -> (i32, i32) {
    %c0_i32 = arith.constant 0 : i32
    %c0_i32_0 = arith.constant 0 : i32
    %c0_i32_1 = arith.constant 0 : i32
    return %c0_i32, %c0_i32_0 : i32, i32
  }
  func.func @transform_3(%arg0: i32) -> (i32, i32) {
    %c0_i32 = arith.constant 0 : i32
    %c0_i32_0 = arith.constant 0 : i32
    %c0_i32_1 = arith.constant 0 : i32
    return %c0_i32, %c0_i32_0 : i32, i32
  }
  func.func @transform_4(%arg0: i32) -> (i32, i32) {
    %c0_i32 = arith.constant 0 : i32
    %c0_i32_0 = arith.constant 0 : i32
    %c0_i32_1 = arith.constant 0 : i32
    return %c0_i32, %c0_i32_0 : i32, i32
  }
  func.func @transform_5(%arg0: i32) -> (i32, i32) {
    %c0_i32 = arith.constant 0 : i32
    %c0_i32_0 = arith.constant 0 : i32
    %c0_i32_1 = arith.constant 0 : i32
    return %c0_i32, %c0_i32_0 : i32, i32
  }
  func.func @transform_6(%arg0: i32) -> (i32, i32) {
    %c0_i32 = arith.constant 0 : i32
    %c0_i32_0 = arith.constant 0 : i32
    %c0_i32_1 = arith.constant 0 : i32
    return %c0_i32, %c0_i32_0 : i32, i32
  }
  func.func @transform_7(%arg0: i32) -> (i32, i32) {
    %c0_i32 = arith.constant 0 : i32
    %c0_i32_0 = arith.constant 0 : i32
    %c0_i32_1 = arith.constant 0 : i32
    return %c0_i32, %c0_i32_0 : i32, i32
  }
  func.func @transform_8(%arg0: i32) -> (i32, i32) {
    %c0_i32 = arith.constant 0 : i32
    %c0_i32_0 = arith.constant 0 : i32
    %c0_i32_1 = arith.constant 0 : i32
    return %c0_i32, %c0_i32_0 : i32, i32
  }
  func.func @transform_9(%arg0: i32) -> (i32, i32, i32, i32) {
    %c0_i32 = arith.constant 0 : i32
    %c0_i32_0 = arith.constant 0 : i32
    %c0_i32_1 = arith.constant 0 : i32
    %c0_i32_2 = arith.constant 0 : i32
    return %arg0, %c0_i32, %c0_i32_0, %c0_i32_1 : i32, i32, i32, i32
  }
}

</mosaic_0001>

<bundles_post_ra>
// kernel: global_block_forward.1
= control target key start
LH: loop header
LB: loop body
LE: loop exit
PB: predicated region body
PF: predicated region fallthrough
CT: control target
= control target key end

     0   :  { %s5336_s30 = smov 0   ;;  %s8138_s0 = inlined_call_operand.vmem [shape: f32[2,16,16,4], index: 0, kind: input, shape index: {}]   ;;  %s8139_s1 = inlined_call_operand.vmem [shape: f32[36,16], index: 1, kind: input, shape index: {}]   ;;  %s8140_s2 = inlined_call_operand.vmem [shape: f32[1,16], index: 2, kind: input, shape index: {}]   ;;  %s8141_s3 = inlined_call_operand.vmem [shape: f32[64,256], index: 3, kind: input, shape index: {}]   ;;  %s8142_s4 = inlined_call_operand.vmem [shape: f32[72,8], index: 4, kind: input, shape index: {}]   ;;  %s8143_s5 = inlined_call_operand.vmem [shape: f32[1,8], index: 5, kind: input, shape index: {}]   ;;  %s8144_s6 = inlined_call_operand.vmem [shape: f32[256,64], index: 6, kind: input, shape index: {}]   ;;  %s8145_s7 = inlined_call_operand.vmem [shape: f32[72,4], index: 7, kind: input, shape index: {}]   ;;  %s8146_s8 = inlined_call_operand.vmem [shape: f32[1,4], index: 8, kind: input, shape index: {}]   ;;  %s8147_s9 = inlined_call_operand.vmem [shape: f32[2,16,16,4], index: 9, kind: output, shape index: {}]  }
   0x1 LB: > { %s4532_s10 = sadd.s32 4294967295, %s5270_s30   ;;  %p4536_p0 = scmp.ge.s32.totalorder %s5270_s30, 1  ;;  %s5270_s30 = sphi %s5336_s30, %s19_s30  }
   0x2   : > { %p287_p1 = scmp.lt.s32.totalorder %s5270_s30, 3 }
   0x4   : > { %p288_p2 = pnand %p4536_p0, %p287_p1 }
   0x6   : > { %291 = sbr.rel (%p288_p2) target bundleno = 2698 (0xa8a), region = 56 }
   0xd   : > { %p5346_p3 = scmp.lt.s32.totalorder %s4532_s10, 1  ;;  %vm365_vm0 = vcmask 293888   ;;  %v8170_v0 = vmov 0.0   ;;  %vm399_vm1 = vcmask 31744   ;;  %vm401_vm2 = vcmask 30720   ;;  %s5273_s16 = smov 16  }
   0xe   : > { %366 = vst.msk [vmem:[#allocation2] sm:$0xff] %vm365_vm0, %v8170_v0  ;;  %367 = vst.msk [vmem:[#allocation2 + $0x8] sm:$0xff] %vm365_vm0, %v8170_v0  ;;  %s5274_s17 = smov 12   ;;  %s5275_s18 = smov 4   ;;  %v1492_v13 = vld [vmem:[%s8139_s1] sm:$0xff]  ;;  %v1493_v14 = vld [vmem:[%s8139_s1 + $0x8] sm:$0xff] }
   0xf   : > { %368 = vst.msk [vmem:[#allocation2 + $0x10] sm:$0xff] %vm365_vm0, %v8170_v0  ;;  %369 = vst.msk [vmem:[#allocation2 + $0x18] sm:$0xff] %vm365_vm0, %v8170_v0  ;;  %s8271_s10 = smov (!%p5346_p3, %s4532_s10), 1  ;;  %s5276_s19 = smov 20   ;;  %v5062_v15 = vpack.c.bf16 %v1493_v14, %v1492_v13  ;;  %v1494_v16 = vld [vmem:[%s8139_s1 + $0x10] sm:$0xff]  ;;  %v1495_v17 = vld [vmem:[%s8139_s1 + $0x18] sm:$0xff] }
  0x10   : > { %370 = vst.msk [vmem:[#allocation2 + $0x20] sm:$0xff] %vm365_vm0, %v8170_v0  ;;  %371 = vst.msk [vmem:[#allocation2 + $0x28] sm:$0xff] %vm365_vm0, %v8170_v0  ;;  %s4651_s12 = sshll.u32 %s8271_s10, 8  ;;  %s5277_s20 = smov 8   ;;  %v5066_v18 = vpack.c.bf16 %v1495_v17, %v1494_v16  ;;  %v1496_v19 = vld [vmem:[%s8139_s1 + $0x20] sm:$0xf] }
  0x11   : > { %372 = vst.msk [vmem:[#allocation2 + $0x30] sm:$0xff] %vm365_vm0, %v8170_v0  ;;  %373 = vst.msk [vmem:[#allocation2 + $0x38] sm:$0xff] %vm365_vm0, %v8170_v0  ;;  %s5426_s15 = scalar_lea.vmem %s8138_s0, %s4651_s12  ;;  %s5278_s23 = smov 24   ;;  %5063 = vmatprep.subr.bf16.mxu0 %v5062_v15  ;;  %vm1600_vm3 = vcmask 1043456   ;;  %vm802_vm4 = vcmask 130144   ;;  %vm932_vm5 = vcmask 162944  }
  0x12   : > { %374 = vst.msk [vmem:[#allocation2 + $0x40] sm:$0xff] %vm365_vm0, %v8170_v0  ;;  %375 = vst.msk [vmem:[#allocation2 + $0x48] sm:$0xff] %vm365_vm0, %v8170_v0  ;;  %v5429_v1 = vld [vmem:[%s5426_s15] sm:$0xff]  ;;  %v5432_v2 = vld [vmem:[%s5426_s15 + $0x8] sm:$0xff]  ;;  %5065 = vmatpush3.bf16.msra.mxu0 %v5062_v15  ;;  %s5279_s11 = smov 28   ;;  %s5280_s21 = smov 32  }
  0x13   : > { %376 = vst.msk [vmem:[#allocation2 + $0x50] sm:$0xff] %vm365_vm0, %v8170_v0  ;;  %377 = vst.msk [vmem:[#allocation2 + $0x58] sm:$0xff] %vm365_vm0, %v8170_v0  ;;  %v5435_v3 = vld [vmem:[%s5426_s15 + $0x18] sm:$0xff]  ;;  %836 = vrot.lane.b32.xlu1 %v5429_v1, %s5273_s16  ;;  %706 = vrot.lane.b32.xlu0 %v5429_v1, %s5274_s17  ;;  %v5442_v4 = vld [vmem:[%s5426_s15 + $0x10] sm:$0xff]  ;;  %vm804_vm6 = vcmask 129120   ;;  %vm551_vm7 = vcmask 64544   ;;  %s7817_s24 = scalar_lea.vmem %s8147_s9, %s4651_s12 }
  0x14   : > { %378 = vst.msk [vmem:[#allocation2 + $0x60] sm:$0xff] %vm365_vm0, %v8170_v0  ;;  %379 = vst.msk [vmem:[#allocation2 + $0x68] sm:$0xff] %vm365_vm0, %v8170_v0  ;;  %v5445_v5 = vld [vmem:[%s5426_s15 + $0x28] sm:$0xff]  ;;  %v5454_v6 = vld [vmem:[%s5426_s15 + $0x20] sm:$0xff]  ;;  %5067 = vmatprep.subr.bf16.mxu0 %v5066_v18  ;;  %vm1063_vm8 = vcmask 195744   ;;  %vm1061_vm9 = vcmask 195745  }
  0x15   : > { %380 = vst.msk [vmem:[#allocation2 + $0x70] sm:$0xff] %vm365_vm0, %v8170_v0  ;;  %381 = vst.msk [vmem:[#allocation2 + $0x78] sm:$0xff] %vm365_vm0, %v8170_v0  ;;  %v5457_v7 = vld [vmem:[%s5426_s15 + $0x38] sm:$0xff]  ;;  %v5460_v8 = vld [vmem:[%s5426_s15 + $0x30] sm:$0xff]  ;;  %vm674_vm10 = vcmask 97344   ;;  %vm672_vm11 = vcmask 97345  }
  0x16   : > { %382 = vst.msk [vmem:[#allocation2 + $0x80] sm:$0xff] %vm365_vm0, %v8170_v0  ;;  %383 = vst.msk [vmem:[#allocation2 + $0x88] sm:$0xff] %vm365_vm0, %v8170_v0  ;;  %v5467_v9 = vld [vmem:[%s5426_s15 + $0x48] sm:$0xff]  ;;  %v5470_v10 = vld [vmem:[%s5426_s15 + $0x40] sm:$0xff]  ;;  %5069 = vmatpush3.bf16.msra.mxu0 %v5066_v18  ;;  %vm1187_vm12 = vcmask 227520   ;;  %vm1185_vm13 = vcmask 228544  }
  0x17   : > { %384 = vst.msk [vmem:[#allocation2 + $0x90] sm:$0xff] %vm365_vm0, %v8170_v0  ;;  %385 = vst.msk [vmem:[#allocation2 + $0x98] sm:$0xff] %vm365_vm0, %v8170_v0  ;;  %838 = vrot.lane.b32.xlu1 %v5432_v2, %s5273_s16  ;;  %708 = vrot.lane.b32.xlu0 %v5432_v2, %s5274_s17  ;;  %v5499_v11 = vld [vmem:[%s5426_s15 + $0x58] sm:$0xff]  ;;  %v5502_v12 = vld [vmem:[%s5426_s15 + $0x50] sm:$0xff]  ;;  %vm1307_vm14 = vcmask 261344   ;;  %vm1430_vm15 = vcmask 294144  }
  0x18   : > { %386 = vst.msk [vmem:[#allocation2 + $0xa0] sm:$0xff] %vm365_vm0, %v8170_v0  ;;  %387 = vst.msk [vmem:[#allocation2 + $0xa8] sm:$0xff] %vm365_vm0, %v8170_v0  ;;  %4852 = vmatprep.subr.msk.mxu0 %vm1600_vm3, %v1496_v19  ;;  %v5556_v20 = vld [vmem:[%s5426_s15 + $0x68] sm:$0xff]  ;;  %v5565_v21 = vld [vmem:[%s5426_s15 + $0x60] sm:$0xff]  ;;  %s5282_s29 = smov 40   ;;  %s5283_s25 = smov 48  }
  0x19   : > { %388 = vst.msk [vmem:[#allocation2 + $0xb0] sm:$0xff] %vm365_vm0, %v8170_v0  ;;  %389 = vst.msk [vmem:[#allocation2 + $0xb8] sm:$0xff] %vm365_vm0, %v8170_v0  ;;  %v5598_v22 = vld [vmem:[%s5426_s15 + $0x78] sm:$0xff]  ;;  %v5607_v23 = vld [vmem:[%s5426_s15 + $0x70] sm:$0xff]  ;;  %s5284_s13 = smov 56  }
  0x1a   : > { %390 = vst.msk [vmem:[#allocation2 + $0xc0] sm:$0xff] %vm365_vm0, %v8170_v0  ;;  %391 = vst.msk [vmem:[#allocation2 + $0xc8] sm:$0xff] %vm365_vm0, %v8170_v0  ;;  %4853 = vmatpush3.msk.msra.mxu0 %vm1600_vm3, %v1496_v19  ;;  %v5641_v26 = vld [vmem:[%s5426_s15 + $0x88] sm:$0xff]  ;;  %v5651_v27 = vld [vmem:[%s5426_s15 + $0x80] sm:$0xff]  ;;  %vm1428_vm3 = vcmask 294145  }
  0x1b   : > { %392 = vst.msk [vmem:[#allocation2 + $0xd0] sm:$0xff] %vm365_vm0, %v8170_v0  ;;  %393 = vst.msk [vmem:[#allocation2 + $0xd8] sm:$0xff] %vm365_vm0, %v8170_v0  ;;  %463 = vrot.lane.b32.xlu1 %v5432_v2, %s5275_s18  ;;  %461 = vrot.lane.b32.xlu0 %v5429_v1, %s5275_s18  ;;  %v5700_v44 = vld [vmem:[%s5426_s15 + $0x98] sm:$0xff]  ;;  %v5709_v45 = vld [vmem:[%s5426_s15 + $0x90] sm:$0xff] }
  0x1c   : > { %394 = vst.msk [vmem:[#allocation2 + $0xe0] sm:$0xff] %vm365_vm0, %v8170_v0  ;;  %395 = vst.msk [vmem:[#allocation2 + $0xe8] sm:$0xff] %vm365_vm0, %v8170_v0  ;;  %v5760_v13 = vld [vmem:[%s5426_s15 + $0xa8] sm:$0xff]  ;;  %v5769_v14 = vld [vmem:[%s5426_s15 + $0xa0] sm:$0xff] }
  0x1d   : > { %396 = vst.msk [vmem:[#allocation2 + $0xf0] sm:$0xff] %vm365_vm0, %v8170_v0  ;;  %397 = vst.msk [vmem:[#allocation2 + $0xf8] sm:$0xff] %vm365_vm0, %v8170_v0 }
  0x1e   : > { %8201 = vst [vmem:[#allocation5_spill] sm:$0xff] %v5429_v1  ;;  %8202 = vst [vmem:[#allocation6_spill] sm:$0xff] %v5432_v2 }
  0x1f   : > { %402 = vst.msk [vmem:[#allocation2 + $0x19] sm:$0x7f] %vm401_vm2, %v5432_v2  ;;  %404 = vst.msk [vmem:[#allocation2 + $0x29] sm:$0x7f] %vm401_vm2, %v5435_v3  ;;  %967 = vrot.lane.b32.xlu1 %v5432_v2, %s5276_s19  ;;  %965 = vrot.lane.b32.xlu0 %v5429_v1, %s5276_s19 }
  0x20   : > { %400 = vst.msk [vmem:[#allocation2 + $0x11] sm:$0xff] %vm399_vm1, %v5429_v1  ;;  %403 = vst.msk [vmem:[#allocation2 + $0x21] sm:$0xff] %vm399_vm1, %v5442_v4 }
  0x21   : > { %406 = vst.msk [vmem:[#allocation2 + $0x39] sm:$0x7f] %vm401_vm2, %v5445_v5  ;;  %408 = vst.msk [vmem:[#allocation2 + $0x49] sm:$0x7f] %vm401_vm2, %v5457_v7 }
  0x22   : > { %405 = vst.msk [vmem:[#allocation2 + $0x31] sm:$0xff] %vm399_vm1, %v5454_v6  ;;  %407 = vst.msk [vmem:[#allocation2 + $0x41] sm:$0xff] %vm399_vm1, %v5460_v8 }
  0x23   : > { %409 = vst.msk [vmem:[#allocation2 + $0x51] sm:$0xff] %vm399_vm1, %v5470_v10  ;;  %584 = vrot.lane.b32.xlu1 %v5432_v2, %s5277_s20  ;;  %582 = vrot.lane.b32.xlu0 %v5429_v1, %s5277_s20  ;;  %411 = vst.msk [vmem:[#allocation2 + $0x61] sm:$0xff] %vm399_vm1, %v5502_v12 }
  0x24   : > { %410 = vst.msk [vmem:[#allocation2 + $0x59] sm:$0x7f] %vm401_vm2, %v5467_v9  ;;  %412 = vst.msk [vmem:[#allocation2 + $0x69] sm:$0x7f] %vm401_vm2, %v5499_v11 }
  0x25   : > { %414 = vst.msk [vmem:[#allocation2 + $0x79] sm:$0x7f] %vm401_vm2, %v5556_v20  ;;  %8203 = vst [vmem:[#allocation7_spill] sm:$0xff] %v5598_v22 }
  0x26   : > { %413 = vst.msk [vmem:[#allocation2 + $0x71] sm:$0xff] %vm399_vm1, %v5565_v21  ;;  %8204 = vst [vmem:[#allocation8_spill] sm:$0xff] %v5607_v23 }
  0x27   : > { %1097 = vrot.lane.b32.xlu1 %v5435_v3, %s5278_s23  ;;  %1095 = vrot.lane.b32.xlu0 %v5442_v4, %s5278_s23  ;;  %416 = vst.msk [vmem:[#allocation2 + $0x89] sm:$0x7f] %vm401_vm2, %v5598_v22  ;;  %8205 = vst [vmem:[#allocation9_spill] sm:$0xff] %v5641_v26 }
  0x28   : > { %415 = vst.msk [vmem:[#allocation2 + $0x81] sm:$0xff] %vm399_vm1, %v5607_v23  ;;  %8206 = vst [vmem:[#allocation10_spill] sm:$0xff] %v5651_v27 }
  0x29   : > { %418 = vst.msk [vmem:[#allocation2 + $0x99] sm:$0x7f] %vm401_vm2, %v5641_v26  ;;  %8207 = vst [vmem:[#allocation11_spill] sm:$0xff] %v5700_v44 }
  0x2a   : > { %417 = vst.msk [vmem:[#allocation2 + $0x91] sm:$0xff] %vm399_vm1, %v5651_v27  ;;  %8208 = vst [vmem:[#allocation12_spill] sm:$0xff] %v5709_v45 }
  0x2b   : > { %712 = vrot.lane.b32.xlu1 %v5435_v3, %s5274_s17  ;;  %710 = vrot.lane.b32.xlu0 %v5442_v4, %s5274_s17  ;;  %420 = vst.msk [vmem:[#allocation2 + $0xa9] sm:$0x7f] %vm401_vm2, %v5700_v44  ;;  %8209 = vst [vmem:[#allocation13_spill] sm:$0xff] %v5760_v13 }
  0x2c   : > { %419 = vst.msk [vmem:[#allocation2 + $0xa1] sm:$0xff] %vm399_vm1, %v5709_v45  ;;  %8210 = vst [vmem:[#allocation14_spill] sm:$0xff] %v5769_v14 }
  0x2d   : > { %422 = vst.msk [vmem:[#allocation2 + $0xb9] sm:$0x7f] %vm401_vm2, %v5760_v13 }
  0x2e   : > { %421 = vst.msk [vmem:[#allocation2 + $0xb1] sm:$0xff] %vm399_vm1, %v5769_v14 }
  0x2f   : > { %1219 = vrot.lane.b32.xlu1 %v5435_v3, %s5279_s11  ;;  %1217 = vrot.lane.b32.xlu0 %v5442_v4, %s5279_s11 }
  0x33   : > { %842 = vrot.lane.b32.xlu1 %v5435_v3, %s5273_s16  ;;  %840 = vrot.lane.b32.xlu0 %v5442_v4, %s5273_s16 }
  0x37   : > { %1340 = vrot.lane.b32.xlu1 %v5435_v3, %s5280_s21  ;;  %1338 = vrot.lane.b32.xlu0 %v5442_v4, %s5280_s21 }
  0x3b   : > { %467 = vrot.lane.b32.xlu1 %v5435_v3, %s5275_s18  ;;  %465 = vrot.lane.b32.xlu0 %v5442_v4, %s5275_s18 }
  0x3f   : > { %971 = vrot.lane.b32.xlu1 %v5435_v3, %s5276_s19  ;;  %969 = vrot.lane.b32.xlu0 %v5442_v4, %s5276_s19 }
  0x43   : > { %588 = vrot.lane.b32.xlu1 %v5435_v3, %s5277_s20  ;;  %586 = vrot.lane.b32.xlu0 %v5442_v4, %s5277_s20 }
  0x47   : > { %1101 = vrot.lane.b32.xlu1 %v5445_v5, %s5278_s23  ;;  %1099 = vrot.lane.b32.xlu0 %v5454_v6, %s5278_s23 }
  0x4b   : > { %716 = vrot.lane.b32.xlu1 %v5445_v5, %s5274_s17  ;;  %714 = vrot.lane.b32.xlu0 %v5454_v6, %s5274_s17 }
  0x4f   : > { %1223 = vrot.lane.b32.xlu1 %v5445_v5, %s5279_s11  ;;  %1221 = vrot.lane.b32.xlu0 %v5454_v6, %s5279_s11 }
  0x53   : > { %846 = vrot.lane.b32.xlu1 %v5445_v5, %s5273_s16  ;;  %844 = vrot.lane.b32.xlu0 %v5454_v6, %s5273_s16 }
  0x57   : > { %1344 = vrot.lane.b32.xlu1 %v5445_v5, %s5280_s21  ;;  %1342 = vrot.lane.b32.xlu0 %v5454_v6, %s5280_s21 }
  0x5b   : > { %471 = vrot.lane.b32.xlu1 %v5445_v5, %s5275_s18  ;;  %469 = vrot.lane.b32.xlu0 %v5454_v6, %s5275_s18 }
  0x5f   : > { %975 = vrot.lane.b32.xlu1 %v5445_v5, %s5276_s19  ;;  %973 = vrot.lane.b32.xlu0 %v5454_v6, %s5276_s19 }
  0x63   : > { %592 = vrot.lane.b32.xlu1 %v5445_v5, %s5277_s20  ;;  %590 = vrot.lane.b32.xlu0 %v5454_v6, %s5277_s20 }
  0x67   : > { %1105 = vrot.lane.b32.xlu1 %v5457_v7, %s5278_s23  ;;  %1103 = vrot.lane.b32.xlu0 %v5460_v8, %s5278_s23 }
  0x6b   : > { %720 = vrot.lane.b32.xlu1 %v5457_v7, %s5274_s17  ;;  %718 = vrot.lane.b32.xlu0 %v5460_v8, %s5274_s17 }
  0x6f   : > { %1227 = vrot.lane.b32.xlu1 %v5457_v7, %s5279_s11  ;;  %1225 = vrot.lane.b32.xlu0 %v5460_v8, %s5279_s11 }
  0x73   : > { %850 = vrot.lane.b32.xlu1 %v5457_v7, %s5273_s16  ;;  %848 = vrot.lane.b32.xlu0 %v5460_v8, %s5273_s16 }
  0x77   : > { %1348 = vrot.lane.b32.xlu1 %v5457_v7, %s5280_s21  ;;  %1346 = vrot.lane.b32.xlu0 %v5460_v8, %s5280_s21 }
  0x7b   : > { %475 = vrot.lane.b32.xlu1 %v5457_v7, %s5275_s18  ;;  %473 = vrot.lane.b32.xlu0 %v5460_v8, %s5275_s18 }
  0x7f   : > { %979 = vrot.lane.b32.xlu1 %v5457_v7, %s5276_s19  ;;  %977 = vrot.lane.b32.xlu0 %v5460_v8, %s5276_s19 }
  0x83   : > { %596 = vrot.lane.b32.xlu1 %v5457_v7, %s5277_s20  ;;  %594 = vrot.lane.b32.xlu0 %v5460_v8, %s5277_s20 }
  0x85   : > { %v837_v24 = vpop.permute.xlu1 %836  ;;  %v707_v25 = vpop.permute.xlu0 %706 }
  0x86   : > { %803 = vst.msk [vmem:[#allocation2 + $0x1] sm:$0xff] %vm802_vm4, %v707_v25 }
  0x87   : > { %1109 = vrot.lane.b32.xlu1 %v5467_v9, %s5278_s23  ;;  %1107 = vrot.lane.b32.xlu0 %v5470_v10, %s5278_s23  ;;  %933 = vst.msk [vmem:[#allocation2] sm:$0xff] %vm932_vm5, %v837_v24 }
  0x89   : > { %v839_v28 = vpop.permute.xlu1 %838  ;;  %v709_v29 = vpop.permute.xlu0 %708 }
  0x8a   : > { %805 = vst.msk [vmem:[#allocation2 + $0x9] sm:$0x7f] %vm804_vm6, %v709_v29 }
  0x8b   : > { %934 = vst.msk [vmem:[#allocation2 + $0x8] sm:$0xff] %vm932_vm5, %v839_v28  ;;  %724 = vrot.lane.b32.xlu1 %v5467_v9, %s5274_s17  ;;  %722 = vrot.lane.b32.xlu0 %v5470_v10, %s5274_s17 }
  0x8d   : > { %v464_v30 = vpop.permute.xlu1 %463  ;;  %v462_v31 = vpop.permute.xlu0 %461 }
  0x8e   : > { %553 = vst.msk [vmem:[#allocation2 + $0x18] sm:$0xff] %vm551_vm7, %v464_v30  ;;  %552 = vst.msk [vmem:[#allocation2 + $0x10] sm:$0xff] %vm551_vm7, %v462_v31 }
  0x8f   : > { %1231 = vrot.lane.b32.xlu1 %v5467_v9, %s5279_s11  ;;  %1229 = vrot.lane.b32.xlu0 %v5470_v10, %s5279_s11 }
  0x91   : > { %v968_v32 = vpop.permute.xlu1 %967  ;;  %v966_v33 = vpop.permute.xlu0 %965 }
  0x92   : > { %1064 = vst.msk [vmem:[#allocation2 + $0x7] sm:$0xff] %vm1063_vm8, %v968_v32 }
  0x93   : > { %1062 = vst.msk [vmem:[#allocation2 - $0x1] sm:$0xfe] %vm1061_vm9, %v966_v33  ;;  %854 = vrot.lane.b32.xlu1 %v5467_v9, %s5273_s16  ;;  %852 = vrot.lane.b32.xlu0 %v5470_v10, %s5273_s16 }
  0x95   : > { %v585_v34 = vpop.permute.xlu1 %584  ;;  %v583_v35 = vpop.permute.xlu0 %582 }
  0x96   : > { %675 = vst.msk [vmem:[#allocation2 + $0x17] sm:$0xff] %vm674_vm10, %v585_v34 }
  0x97   : > { %673 = vst.msk [vmem:[#allocation2 + $0xf] sm:$0xfe] %vm672_vm11, %v583_v35  ;;  %1352 = vrot.lane.b32.xlu1 %v5467_v9, %s5280_s21  ;;  %1350 = vrot.lane.b32.xlu0 %v5470_v10, %s5280_s21 }
  0x99   : > { %v1098_v36 = vpop.permute.xlu1 %1097  ;;  %v1096_v37 = vpop.permute.xlu0 %1095 }
  0x9a   : > { %1188 = vst.msk [vmem:[#allocation2 + $0x9] sm:$0x7f] %vm1187_vm12, %v1098_v36 }
  0x9b   : > { %1186 = vst.msk [vmem:[#allocation2 + $0x1] sm:$0xff] %vm1185_vm13, %v1096_v37  ;;  %479 = vrot.lane.b32.xlu1 %v5467_v9, %s5275_s18  ;;  %477 = vrot.lane.b32.xlu0 %v5470_v10, %s5275_s18 }
  0x9d   : > { %v713_v38 = vpop.permute.xlu1 %712  ;;  %v711_v39 = vpop.permute.xlu0 %710 }
  0x9e   : > { %807 = vst.msk [vmem:[#allocation2 + $0x19] sm:$0x7f] %vm804_vm6, %v713_v38 }
  0x9f   : > { %806 = vst.msk [vmem:[#allocation2 + $0x11] sm:$0xff] %vm802_vm4, %v711_v39  ;;  %983 = vrot.lane.b32.xlu1 %v5467_v9, %s5276_s19  ;;  %981 = vrot.lane.b32.xlu0 %v5470_v10, %s5276_s19  ;;  %v5820_v39 = vld [vmem:[%s5426_s15 + $0xb8] sm:$0xff] }
  0xa0   : > { %8211 = vst [vmem:[#allocation15_spill] sm:$0xff] %v5820_v39  ;;  %424 = vst.msk [vmem:[#allocation2 + $0xc9] sm:$0x7f] %vm401_vm2, %v5820_v39 }
  0xa1   : > { %v1220_v40 = vpop.permute.xlu1 %1219  ;;  %v1218_v41 = vpop.permute.xlu0 %1217 }
  0xa2   : > { %1309 = vst.msk [vmem:[#allocation2 + $0x8] sm:$0xff] %vm1307_vm14, %v1220_v40  ;;  %1308 = vst.msk [vmem:[#allocation2] sm:$0xff] %vm1307_vm14, %v1218_v41  ;;  %v5829_v40 = vld [vmem:[%s5426_s15 + $0xb0] sm:$0xff] }
  0xa3   : > { %600 = vrot.lane.b32.xlu1 %v5467_v9, %s5277_s20  ;;  %598 = vrot.lane.b32.xlu0 %v5470_v10, %s5277_s20  ;;  %8212 = vst [vmem:[#allocation16_spill] sm:$0xff] %v5829_v40  ;;  %423 = vst.msk [vmem:[#allocation2 + $0xc1] sm:$0xff] %vm399_vm1, %v5829_v40 }
  0xa5   : > { %v843_v42 = vpop.permute.xlu1 %842  ;;  %v841_v43 = vpop.permute.xlu0 %840 }
  0xa6   : > { %936 = vst.msk [vmem:[#allocation2 + $0x18] sm:$0xff] %vm932_vm5, %v843_v42  ;;  %935 = vst.msk [vmem:[#allocation2 + $0x10] sm:$0xff] %vm932_vm5, %v841_v43 }
  0xa7   : > { %1113 = vrot.lane.b32.xlu1 %v5499_v11, %s5278_s23  ;;  %1111 = vrot.lane.b32.xlu0 %v5502_v12, %s5278_s23 }
  0xa9   : > { %v1341_v46 = vpop.permute.xlu1 %1340  ;;  %v1339_v47 = vpop.permute.xlu0 %1338 }
  0xaa   : > { %1431 = vst.msk [vmem:[#allocation2 + $0x7] sm:$0xff] %vm1430_vm15, %v1341_v46 }
  0xab   : > { %1429 = vst.msk [vmem:[#allocation2 - $0x1] sm:$0xfe] %vm1428_vm3, %v1339_v47  ;;  %728 = vrot.lane.b32.xlu1 %v5499_v11, %s5274_s17  ;;  %726 = vrot.lane.b32.xlu0 %v5502_v12, %s5274_s17 }
  0xad   : > { %v468_v48 = vpop.permute.xlu1 %467  ;;  %v466_v49 = vpop.permute.xlu0 %465 }
  0xae   : > { %555 = vst.msk [vmem:[#allocation2 + $0x28] sm:$0xff] %vm551_vm7, %v468_v48  ;;  %554 = vst.msk [vmem:[#allocation2 + $0x20] sm:$0xff] %vm551_vm7, %v466_v49 }
  0xaf   : > { %1235 = vrot.lane.b32.xlu1 %v5499_v11, %s5279_s11  ;;  %1233 = vrot.lane.b32.xlu0 %v5502_v12, %s5279_s11 }
  0xb1   : > { %v972_v50 = vpop.permute.xlu1 %971  ;;  %v970_v51 = vpop.permute.xlu0 %969  ;;  %v1461_v53 = vld [vmem:[#allocation2 + $0x8] sm:$0xff] }
  0xb2   : > { %v1460_v52 = vld [vmem:[#allocation2] sm:$0xff]  ;;  %1066 = vst.msk [vmem:[#allocation2 + $0x17] sm:$0xff] %vm1063_vm8, %v972_v50 }
  0xb3   : > { %1065 = vst.msk [vmem:[#allocation2 + $0xf] sm:$0xfe] %vm1061_vm9, %v970_v51  ;;  %4854 = vmatprep.mubr.msk.f32.mxu0 %vm365_vm0, %v1460_v52  ;;  %858 = vrot.lane.b32.xlu1 %v5499_v11, %s5273_s16 }
  0xb4   : > { %856 = vrot.lane.b32.xlu0 %v5502_v12, %s5273_s16  ;;  %4855 = vmatmul.mubr.msk.f32.vlgmr.msra.gmra.mrb[0].mxu0 %vm365_vm0, %v1461_v53 }
  0xb5   : > { %v589_v54 = vpop.permute.xlu1 %588  ;;  %v587_v55 = vpop.permute.xlu0 %586 }
  0xb6   : > { %677 = vst.msk [vmem:[#allocation2 + $0x27] sm:$0xff] %vm674_vm10, %v589_v54 }
  0xb7   : > { %676 = vst.msk [vmem:[#allocation2 + $0x1f] sm:$0xfe] %vm672_vm11, %v587_v55  ;;  %1356 = vrot.lane.b32.xlu1 %v5499_v11, %s5280_s21 }
  0xb8   : > { %1354 = vrot.lane.b32.xlu0 %v5502_v12, %s5280_s21 }
  0xb9   : > { %v1102_v56 = vpop.permute.xlu1 %1101  ;;  %v1100_v57 = vpop.permute.xlu0 %1099 }
  0xba   : > { %1190 = vst.msk [vmem:[#allocation2 + $0x19] sm:$0x7f] %vm1187_vm12, %v1102_v56 }
  0xbb   : > { %1189 = vst.msk [vmem:[#allocation2 + $0x11] sm:$0xff] %vm1185_vm13, %v1100_v57  ;;  %483 = vrot.lane.b32.xlu1 %v5499_v11, %s5275_s18 }
  0xbc   : > { %481 = vrot.lane.b32.xlu0 %v5502_v12, %s5275_s18 }
  0xbd   : > { %v717_v58 = vpop.permute.xlu1 %716  ;;  %v715_v59 = vpop.permute.xlu0 %714 }
  0xbe   : > { %809 = vst.msk [vmem:[#allocation2 + $0x29] sm:$0x7f] %vm804_vm6, %v717_v58 }
  0xbf   : > { %808 = vst.msk [vmem:[#allocation2 + $0x21] sm:$0xff] %vm802_vm4, %v715_v59  ;;  %987 = vrot.lane.b32.xlu1 %v5499_v11, %s5276_s19 }
  0xc0   : > { %985 = vrot.lane.b32.xlu0 %v5502_v12, %s5276_s19 }
  0xc1   : > { %v1224_v60 = vpop.permute.xlu1 %1223  ;;  %v1222_v61 = vpop.permute.xlu0 %1221 }
  0xc2   : > { %1311 = vst.msk [vmem:[#allocation2 + $0x18] sm:$0xff] %vm1307_vm14, %v1224_v60  ;;  %1310 = vst.msk [vmem:[#allocation2 + $0x10] sm:$0xff] %vm1307_vm14, %v1222_v61  ;;  %v5884_v61 = vld [vmem:[%s5426_s15 + $0xc8] sm:$0xff] }
  0xc3   : > { %604 = vrot.lane.b32.xlu1 %v5499_v11, %s5277_s20  ;;  %8213 = vst [vmem:[#allocation17_spill] sm:$0xff] %v5884_v61  ;;  %426 = vst.msk [vmem:[#allocation2 + $0xd9] sm:$0x7f] %vm401_vm2, %v5884_v61 }
  0xc4   : > { %602 = vrot.lane.b32.xlu0 %v5502_v12, %s5277_s20 }
  0xc5   : > { %v847_v62 = vpop.permute.xlu1 %846  ;;  %v845_v63 = vpop.permute.xlu0 %844 }
  0xc6   : > { %938 = vst.msk [vmem:[#allocation2 + $0x28] sm:$0xff] %vm932_vm5, %v847_v62  ;;  %937 = vst.msk [vmem:[#allocation2 + $0x20] sm:$0xff] %vm932_vm5, %v845_v63  ;;  %v5889_v62 = vld [vmem:[%s5426_s15 + $0xc0] sm:$0xff] }
  0xc7   : > { %1117 = vrot.lane.b32.xlu1 %v5556_v20, %s5278_s23  ;;  %8214 = vst [vmem:[#allocation18_spill] sm:$0xff] %v5889_v62  ;;  %425 = vst.msk [vmem:[#allocation2 + $0xd1] sm:$0xff] %vm399_vm1, %v5889_v62 }
  0xc8   : > { %1115 = vrot.lane.b32.xlu0 %v5565_v21, %s5278_s23 }
  0xc9   : > { %v1345_v15 = vpop.permute.xlu1 %1344  ;;  %v1343_v16 = vpop.permute.xlu0 %1342 }
  0xca   : > { %1433 = vst.msk [vmem:[#allocation2 + $0x17] sm:$0xff] %vm1430_vm15, %v1345_v15 }
  0xcb   : > { %1432 = vst.msk [vmem:[#allocation2 + $0xf] sm:$0xfe] %vm1428_vm3, %v1343_v16  ;;  %732 = vrot.lane.b32.xlu1 %v5556_v20, %s5274_s17 }
  0xcc   : > { %730 = vrot.lane.b32.xlu0 %v5565_v21, %s5274_s17 }
  0xcd   : > { %v472_v17 = vpop.permute.xlu1 %471  ;;  %v470_v18 = vpop.permute.xlu0 %469 }
  0xce   : > { %557 = vst.msk [vmem:[#allocation2 + $0x38] sm:$0xff] %vm551_vm7, %v472_v17  ;;  %556 = vst.msk [vmem:[#allocation2 + $0x30] sm:$0xff] %vm551_vm7, %v470_v18 }
  0xcf   : > { %1239 = vrot.lane.b32.xlu1 %v5556_v20, %s5279_s11 }
  0xd0   : > { %1237 = vrot.lane.b32.xlu0 %v5565_v21, %s5279_s11 }
  0xd1   : > { %v976_v19 = vpop.permute.xlu1 %975  ;;  %v974_v24 = vpop.permute.xlu0 %973  ;;  %v1463_v28 = vld [vmem:[#allocation2 + $0x18] sm:$0xff] }
  0xd2   : > { %v1462_v25 = vld [vmem:[#allocation2 + $0x10] sm:$0xff]  ;;  %1068 = vst.msk [vmem:[#allocation2 + $0x27] sm:$0xff] %vm1063_vm8, %v976_v19 }
  0xd3   : > { %1067 = vst.msk [vmem:[#allocation2 + $0x1f] sm:$0xfe] %vm1061_vm9, %v974_v24  ;;  %4857 = vmatprep.mubr.msk.f32.mxu0 %vm365_vm0, %v1462_v25  ;;  %862 = vrot.lane.b32.xlu1 %v5556_v20, %s5273_s16 }
  0xd4   : > { %860 = vrot.lane.b32.xlu0 %v5565_v21, %s5273_s16  ;;  %4858 = vmatmul.mubr.msk.f32.gmra.mrb[2].mxu0 %vm365_vm0, %v1463_v28 }
  0xd5   : > { %v593_v29 = vpop.permute.xlu1 %592  ;;  %v591_v30 = vpop.permute.xlu0 %590 }
  0xd6   : > { %679 = vst.msk [vmem:[#allocation2 + $0x37] sm:$0xff] %vm674_vm10, %v593_v29 }
  0xd7   : > { %678 = vst.msk [vmem:[#allocation2 + $0x2f] sm:$0xfe] %vm672_vm11, %v591_v30  ;;  %1360 = vrot.lane.b32.xlu1 %v5556_v20, %s5280_s21 }
  0xd8   : > { %1358 = vrot.lane.b32.xlu0 %v5565_v21, %s5280_s21 }
  0xd9   : > { %v1106_v31 = vpop.permute.xlu1 %1105  ;;  %v1104_v32 = vpop.permute.xlu0 %1103 }
  0xda   : > { %1192 = vst.msk [vmem:[#allocation2 + $0x29] sm:$0x7f] %vm1187_vm12, %v1106_v31 }
  0xdb   : > { %1191 = vst.msk [vmem:[#allocation2 + $0x21] sm:$0xff] %vm1185_vm13, %v1104_v32  ;;  %487 = vrot.lane.b32.xlu1 %v5556_v20, %s5275_s18 }
  0xdc   : > { %485 = vrot.lane.b32.xlu0 %v5565_v21, %s5275_s18 }
  0xdd   : > { %v721_v33 = vpop.permute.xlu1 %720  ;;  %v719_v34 = vpop.permute.xlu0 %718 }
  0xde   : > { %811 = vst.msk [vmem:[#allocation2 + $0x39] sm:$0x7f] %vm804_vm6, %v721_v33 }
  0xdf   : > { %810 = vst.msk [vmem:[#allocation2 + $0x31] sm:$0xff] %vm802_vm4, %v719_v34  ;;  %991 = vrot.lane.b32.xlu1 %v5556_v20, %s5276_s19 }
  0xe0   : > { %989 = vrot.lane.b32.xlu0 %v5565_v21, %s5276_s19 }
  0xe1   : > { %v1228_v35 = vpop.permute.xlu1 %1227  ;;  %v1226_v36 = vpop.permute.xlu0 %1225 }
  0xe2   : > { %1313 = vst.msk [vmem:[#allocation2 + $0x28] sm:$0xff] %vm1307_vm14, %v1228_v35  ;;  %1312 = vst.msk [vmem:[#allocation2 + $0x20] sm:$0xff] %vm1307_vm14, %v1226_v36 }
  0xe3   : > { %608 = vrot.lane.b32.xlu1 %v5556_v20, %s5277_s20 }
  0xe4   : > { %606 = vrot.lane.b32.xlu0 %v5565_v21, %s5277_s20 }
  0xe5   : > { %v851_v37 = vpop.permute.xlu1 %850  ;;  %v849_v38 = vpop.permute.xlu0 %848 }
  0xe6   : > { %940 = vst.msk [vmem:[#allocation2 + $0x38] sm:$0xff] %vm932_vm5, %v851_v37  ;;  %939 = vst.msk [vmem:[#allocation2 + $0x30] sm:$0xff] %vm932_vm5, %v849_v38  ;;  %v5944_v38 = vld [vmem:[%s5426_s15 + $0xd8] sm:$0xff] }
  0xe7   : > { %1121 = vrot.lane.b32.xlu1 %v5598_v22, %s5278_s23  ;;  %8215 = vst [vmem:[#allocation19_spill] sm:$0xff] %v5944_v38  ;;  %428 = vst.msk [vmem:[#allocation2 + $0xe9] sm:$0x7f] %vm401_vm2, %v5944_v38 }
  0xe8   : > { %1119 = vrot.lane.b32.xlu0 %v5607_v23, %s5278_s23 }
  0xe9   : > { %v1349_v41 = vpop.permute.xlu1 %1348  ;;  %v1347_v42 = vpop.permute.xlu0 %1346 }
  0xea   : > { %1435 = vst.msk [vmem:[#allocation2 + $0x27] sm:$0xff] %vm1430_vm15, %v1349_v41  ;;  %v5947_v41 = vld [vmem:[%s5426_s15 + $0xd0] sm:$0xff] }
  0xeb   : > { %1434 = vst.msk [vmem:[#allocation2 + $0x1f] sm:$0xfe] %vm1428_vm3, %v1347_v42  ;;  %736 = vrot.lane.b32.xlu1 %v5598_v22, %s5274_s17  ;;  %8216 = vst [vmem:[#allocation20_spill] sm:$0xff] %v5947_v41 }
  0xec   : > { %734 = vrot.lane.b32.xlu0 %v5607_v23, %s5274_s17  ;;  %427 = vst.msk [vmem:[#allocation2 + $0xe1] sm:$0xff] %vm399_vm1, %v5947_v41 }
  0xed   : > { %v476_v43 = vpop.permute.xlu1 %475  ;;  %v474_v46 = vpop.permute.xlu0 %473 }
  0xee   : > { %559 = vst.msk [vmem:[#allocation2 + $0x48] sm:$0xff] %vm551_vm7, %v476_v43  ;;  %558 = vst.msk [vmem:[#allocation2 + $0x40] sm:$0xff] %vm551_vm7, %v474_v46 }
  0xef   : > { %1243 = vrot.lane.b32.xlu1 %v5598_v22, %s5279_s11 }
  0xf0   : > { %1241 = vrot.lane.b32.xlu0 %v5607_v23, %s5279_s11 }
  0xf1   : > { %v980_v47 = vpop.permute.xlu1 %979  ;;  %v978_v48 = vpop.permute.xlu0 %977  ;;  %v1465_v50 = vld [vmem:[#allocation2 + $0x28] sm:$0xff] }
  0xf2   : > { %v1464_v49 = vld [vmem:[#allocation2 + $0x20] sm:$0xff]  ;;  %1070 = vst.msk [vmem:[#allocation2 + $0x37] sm:$0xff] %vm1063_vm8, %v980_v47 }
  0xf3   : > { %1069 = vst.msk [vmem:[#allocation2 + $0x2f] sm:$0xfe] %vm1061_vm9, %v978_v48  ;;  %4860 = vmatprep.mubr.msk.f32.mxu0 %vm365_vm0, %v1464_v49  ;;  %866 = vrot.lane.b32.xlu1 %v5598_v22, %s5273_s16 }
  0xf4   : > { %864 = vrot.lane.b32.xlu0 %v5607_v23, %s5273_s16  ;;  %4861 = vmatmul.mubr.msk.f32.gmra.mrb[4].mxu0 %vm365_vm0, %v1465_v50 }
  0xf5   : > { %v597_v51 = vpop.permute.xlu1 %596  ;;  %v595_v52 = vpop.permute.xlu0 %594 }
  0xf6   : > { %681 = vst.msk [vmem:[#allocation2 + $0x47] sm:$0xff] %vm674_vm10, %v597_v51 }
  0xf7   : > { %680 = vst.msk [vmem:[#allocation2 + $0x3f] sm:$0xfe] %vm672_vm11, %v595_v52  ;;  %1364 = vrot.lane.b32.xlu1 %v5598_v22, %s5280_s21 }
  0xf8   : > { %1362 = vrot.lane.b32.xlu0 %v5607_v23, %s5280_s21 }
  0xf9   : > { %v1110_v53 = vpop.permute.xlu1 %1109  ;;  %v1108_v54 = vpop.permute.xlu0 %1107 }
  0xfa   : > { %1194 = vst.msk [vmem:[#allocation2 + $0x39] sm:$0x7f] %vm1187_vm12, %v1110_v53 }
  0xfb   : > { %1193 = vst.msk [vmem:[#allocation2 + $0x31] sm:$0xff] %vm1185_vm13, %v1108_v54  ;;  %491 = vrot.lane.b32.xlu1 %v5598_v22, %s5275_s18 }
  0xfc   : > { %489 = vrot.lane.b32.xlu0 %v5607_v23, %s5275_s18 }
  0xfd   : > { %v725_v55 = vpop.permute.xlu1 %724  ;;  %v723_v56 = vpop.permute.xlu0 %722 }
  0xfe   : > { %813 = vst.msk [vmem:[#allocation2 + $0x49] sm:$0x7f] %vm804_vm6, %v725_v55 }
  0xff   : > { %812 = vst.msk [vmem:[#allocation2 + $0x41] sm:$0xff] %vm802_vm4, %v723_v56  ;;  %995 = vrot.lane.b32.xlu1 %v5598_v22, %s5276_s19 }
 0x100   : > { %993 = vrot.lane.b32.xlu0 %v5607_v23, %s5276_s19 }
 0x101   : > { %v1232_v57 = vpop.permute.xlu1 %1231  ;;  %v1230_v58 = vpop.permute.xlu0 %1229 }
 0x102   : > { %1315 = vst.msk [vmem:[#allocation2 + $0x38] sm:$0xff] %vm1307_vm14, %v1232_v57  ;;  %1314 = vst.msk [vmem:[#allocation2 + $0x30] sm:$0xff] %vm1307_vm14, %v1230_v58 }
 0x103   : > { %612 = vrot.lane.b32.xlu1 %v5598_v22, %s5277_s20 }
 0x104   : > { %610 = vrot.lane.b32.xlu0 %v5607_v23, %s5277_s20 }
 0x105   : > { %v855_v59 = vpop.permute.xlu1 %854  ;;  %v853_v60 = vpop.permute.xlu0 %852 }
 0x106   : > { %942 = vst.msk [vmem:[#allocation2 + $0x48] sm:$0xff] %vm932_vm5, %v855_v59  ;;  %941 = vst.msk [vmem:[#allocation2 + $0x40] sm:$0xff] %vm932_vm5, %v853_v60 }
 0x107   : > { %1125 = vrot.lane.b32.xlu1 %v5641_v26, %s5278_s23 }
 0x108   : > { %1123 = vrot.lane.b32.xlu0 %v5651_v27, %s5278_s23 }
 0x109   : > { %v1353_v63 = vpop.permute.xlu1 %1352  ;;  %v1351_v15 = vpop.permute.xlu0 %1350 }
 0x10a   : > { %1437 = vst.msk [vmem:[#allocation2 + $0x37] sm:$0xff] %vm1430_vm15, %v1353_v63 }
 0x10b   : > { %1436 = vst.msk [vmem:[#allocation2 + $0x2f] sm:$0xfe] %vm1428_vm3, %v1351_v15  ;;  %740 = vrot.lane.b32.xlu1 %v5641_v26, %s5274_s17  ;;  %v6004_v15 = vld [vmem:[%s5426_s15 + $0xe8] sm:$0xff] }
 0x10c   : > { %738 = vrot.lane.b32.xlu0 %v5651_v27, %s5274_s17  ;;  %8217 = vst [vmem:[#allocation21_spill] sm:$0xff] %v6004_v15  ;;  %430 = vst.msk [vmem:[#allocation2 + $0xf9] sm:$0x7f] %vm401_vm2, %v6004_v15  ;;  %vm2120_vm2 = vcmask 63488  }
 0x10d   : > { %v480_v16 = vpop.permute.xlu1 %479  ;;  %v478_v17 = vpop.permute.xlu0 %477 }
 0x10e   : > { %561 = vst.msk [vmem:[#allocation2 + $0x58] sm:$0xff] %vm551_vm7, %v480_v16  ;;  %560 = vst.msk [vmem:[#allocation2 + $0x50] sm:$0xff] %vm551_vm7, %v478_v17  ;;  %v6007_v16 = vld [vmem:[%s5426_s15 + $0xe0] sm:$0xff] }
 0x10f   : > { %1247 = vrot.lane.b32.xlu1 %v5641_v26, %s5279_s11  ;;  %8218 = vst [vmem:[#allocation22_spill] sm:$0xff] %v6007_v16  ;;  %429 = vst.msk [vmem:[#allocation2 + $0xf1] sm:$0xff] %vm399_vm1, %v6007_v16 }
 0x110   : > { %1245 = vrot.lane.b32.xlu0 %v5651_v27, %s5279_s11 }
 0x111   : > { %v984_v18 = vpop.permute.xlu1 %983  ;;  %v982_v19 = vpop.permute.xlu0 %981  ;;  %v1467_v25 = vld [vmem:[#allocation2 + $0x38] sm:$0xff] }
 0x112   : > { %v1466_v24 = vld [vmem:[#allocation2 + $0x30] sm:$0xff]  ;;  %1072 = vst.msk [vmem:[#allocation2 + $0x47] sm:$0xff] %vm1063_vm8, %v984_v18 }
 0x113   : > { %1071 = vst.msk [vmem:[#allocation2 + $0x3f] sm:$0xfe] %vm1061_vm9, %v982_v19  ;;  %4863 = vmatprep.mubr.msk.f32.mxu0 %vm365_vm0, %v1466_v24  ;;  %870 = vrot.lane.b32.xlu1 %v5641_v26, %s5273_s16 }
 0x114   : > { %868 = vrot.lane.b32.xlu0 %v5651_v27, %s5273_s16  ;;  %4864 = vmatmul.mubr.msk.f32.gmra.mrb[6].mxu0 %vm365_vm0, %v1467_v25 }
 0x115   : > { %v601_v28 = vpop.permute.xlu1 %600  ;;  %v599_v29 = vpop.permute.xlu0 %598 }
 0x116   : > { %683 = vst.msk [vmem:[#allocation2 + $0x57] sm:$0xff] %vm674_vm10, %v601_v28 }
 0x117   : > { %682 = vst.msk [vmem:[#allocation2 + $0x4f] sm:$0xfe] %vm672_vm11, %v599_v29  ;;  %1368 = vrot.lane.b32.xlu1 %v5641_v26, %s5280_s21 }
 0x118   : > { %1366 = vrot.lane.b32.xlu0 %v5651_v27, %s5280_s21 }
 0x119   : > { %v1114_v30 = vpop.permute.xlu1 %1113  ;;  %v1112_v31 = vpop.permute.xlu0 %1111 }
 0x11a   : > { %1196 = vst.msk [vmem:[#allocation2 + $0x49] sm:$0x7f] %vm1187_vm12, %v1114_v30 }
 0x11b   : > { %1195 = vst.msk [vmem:[#allocation2 + $0x41] sm:$0xff] %vm1185_vm13, %v1112_v31  ;;  %495 = vrot.lane.b32.xlu1 %v5641_v26, %s5275_s18 }
 0x11c   : > { %493 = vrot.lane.b32.xlu0 %v5651_v27, %s5275_s18 }
 0x11d   : > { %v729_v32 = vpop.permute.xlu1 %728  ;;  %v727_v33 = vpop.permute.xlu0 %726 }
 0x11e   : > { %815 = vst.msk [vmem:[#allocation2 + $0x59] sm:$0x7f] %vm804_vm6, %v729_v32 }
 0x11f   : > { %814 = vst.msk [vmem:[#allocation2 + $0x51] sm:$0xff] %vm802_vm4, %v727_v33  ;;  %999 = vrot.lane.b32.xlu1 %v5641_v26, %s5276_s19 }
 0x120   : > { %997 = vrot.lane.b32.xlu0 %v5651_v27, %s5276_s19 }
 0x121   : > { %v1236_v34 = vpop.permute.xlu1 %1235  ;;  %v1234_v35 = vpop.permute.xlu0 %1233 }
 0x122   : > { %1317 = vst.msk [vmem:[#allocation2 + $0x48] sm:$0xff] %vm1307_vm14, %v1236_v34  ;;  %1316 = vst.msk [vmem:[#allocation2 + $0x40] sm:$0xff] %vm1307_vm14, %v1234_v35 }
 0x123   : > { %616 = vrot.lane.b32.xlu1 %v5641_v26, %s5277_s20 }
 0x124   : > { %614 = vrot.lane.b32.xlu0 %v5651_v27, %s5277_s20 }
 0x125   : > { %v859_v36 = vpop.permute.xlu1 %858 }
 0x126   : > { %v857_v37 = vpop.permute.xlu0 %856  ;;  %944 = vst.msk [vmem:[#allocation2 + $0x58] sm:$0xff] %vm932_vm5, %v859_v36 }
 0x127   : > { %943 = vst.msk [vmem:[#allocation2 + $0x50] sm:$0xff] %vm932_vm5, %v857_v37  ;;  %1129 = vrot.lane.b32.xlu1 %v5700_v44, %s5278_s23 }
 0x128   : > { %1127 = vrot.lane.b32.xlu0 %v5709_v45, %s5278_s23 }
 0x129   : > { %v1357_v42 = vpop.permute.xlu1 %1356 }
 0x12a   : > { %v1355_v43 = vpop.permute.xlu0 %1354  ;;  %1439 = vst.msk [vmem:[#allocation2 + $0x47] sm:$0xff] %vm1430_vm15, %v1357_v42 }
 0x12b   : > { %1438 = vst.msk [vmem:[#allocation2 + $0x3f] sm:$0xfe] %vm1428_vm3, %v1355_v43  ;;  %744 = vrot.lane.b32.xlu1 %v5700_v44, %s5274_s17 }
 0x12c   : > { %742 = vrot.lane.b32.xlu0 %v5709_v45, %s5274_s17 }
 0x12d   : > { %v484_v46 = vpop.permute.xlu1 %483 }
 0x12e   : > { %v482_v47 = vpop.permute.xlu0 %481  ;;  %563 = vst.msk [vmem:[#allocation2 + $0x68] sm:$0xff] %vm551_vm7, %v484_v46 }
 0x12f   : > { %562 = vst.msk [vmem:[#allocation2 + $0x60] sm:$0xff] %vm551_vm7, %v482_v47  ;;  %1251 = vrot.lane.b32.xlu1 %v5700_v44, %s5279_s11 }
 0x130   : > { %1249 = vrot.lane.b32.xlu0 %v5709_v45, %s5279_s11 }
 0x131   : > { %v988_v48 = vpop.permute.xlu1 %987  ;;  %v1469_v51 = vld [vmem:[#allocation2 + $0x48] sm:$0xff] }
 0x132   : > { %v986_v49 = vpop.permute.xlu0 %985  ;;  %v1468_v50 = vld [vmem:[#allocation2 + $0x40] sm:$0xff]  ;;  %1074 = vst.msk [vmem:[#allocation2 + $0x57] sm:$0xff] %vm1063_vm8, %v988_v48 }
 0x133   : > { %1073 = vst.msk [vmem:[#allocation2 + $0x4f] sm:$0xfe] %vm1061_vm9, %v986_v49  ;;  %4866 = vmatprep.mubr.msk.f32.mxu0 %vm365_vm0, %v1468_v50  ;;  %874 = vrot.lane.b32.xlu1 %v5700_v44, %s5273_s16 }
 0x134   : > { %872 = vrot.lane.b32.xlu0 %v5709_v45, %s5273_s16  ;;  %4867 = vmatmul.mubr.msk.f32.gmra.mrb[8].mxu0 %vm365_vm0, %v1469_v51 }
 0x135   : > { %v605_v52 = vpop.permute.xlu1 %604 }
 0x136   : > { %v603_v53 = vpop.permute.xlu0 %602  ;;  %685 = vst.msk [vmem:[#allocation2 + $0x67] sm:$0xff] %vm674_vm10, %v605_v52 }
 0x137   : > { %684 = vst.msk [vmem:[#allocation2 + $0x5f] sm:$0xfe] %vm672_vm11, %v603_v53  ;;  %1372 = vrot.lane.b32.xlu1 %v5700_v44, %s5280_s21 }
 0x138   : > { %1370 = vrot.lane.b32.xlu0 %v5709_v45, %s5280_s21 }
 0x139   : > { %v1118_v54 = vpop.permute.xlu1 %1117 }
 0x13a   : > { %v1116_v55 = vpop.permute.xlu0 %1115  ;;  %1198 = vst.msk [vmem:[#allocation2 + $0x59] sm:$0x7f] %vm1187_vm12, %v1118_v54 }
 0x13b   : > { %1197 = vst.msk [vmem:[#allocation2 + $0x51] sm:$0xff] %vm1185_vm13, %v1116_v55  ;;  %499 = vrot.lane.b32.xlu1 %v5700_v44, %s5275_s18 }
 0x13c   : > { %497 = vrot.lane.b32.xlu0 %v5709_v45, %s5275_s18 }
 0x13d   : > { %v733_v56 = vpop.permute.xlu1 %732 }
 0x13e   : > { %v731_v57 = vpop.permute.xlu0 %730  ;;  %817 = vst.msk [vmem:[#allocation2 + $0x69] sm:$0x7f] %vm804_vm6, %v733_v56 }
 0x13f   : > { %816 = vst.msk [vmem:[#allocation2 + $0x61] sm:$0xff] %vm802_vm4, %v731_v57  ;;  %1003 = vrot.lane.b32.xlu1 %v5700_v44, %s5276_s19 }
 0x140   : > { %1001 = vrot.lane.b32.xlu0 %v5709_v45, %s5276_s19 }
 0x141   : > { %v1240_v58 = vpop.permute.xlu1 %1239 }
 0x142   : > { %v1238_v59 = vpop.permute.xlu0 %1237  ;;  %1319 = vst.msk [vmem:[#allocation2 + $0x58] sm:$0xff] %vm1307_vm14, %v1240_v58 }
 0x143   : > { %1318 = vst.msk [vmem:[#allocation2 + $0x50] sm:$0xff] %vm1307_vm14, %v1238_v59  ;;  %620 = vrot.lane.b32.xlu1 %v5700_v44, %s5277_s20 }
 0x144   : > { %618 = vrot.lane.b32.xlu0 %v5709_v45, %s5277_s20 }
 0x145   : > { %v863_v60 = vpop.permute.xlu1 %862 }
 0x146   : > { %v861_v63 = vpop.permute.xlu0 %860  ;;  %946 = vst.msk [vmem:[#allocation2 + $0x68] sm:$0xff] %vm932_vm5, %v863_v60 }
 0x147   : > { %945 = vst.msk [vmem:[#allocation2 + $0x60] sm:$0xff] %vm932_vm5, %v861_v63  ;;  %1133 = vrot.lane.b32.xlu1 %v5760_v13, %s5278_s23 }
 0x148   : > { %1131 = vrot.lane.b32.xlu0 %v5769_v14, %s5278_s23 }
 0x149   : > { %v1361_v17 = vpop.permute.xlu1 %1360 }
 0x14a   : > { %v1359_v18 = vpop.permute.xlu0 %1358  ;;  %1441 = vst.msk [vmem:[#allocation2 + $0x57] sm:$0xff] %vm1430_vm15, %v1361_v17 }
 0x14b   : > { %1440 = vst.msk [vmem:[#allocation2 + $0x4f] sm:$0xfe] %vm1428_vm3, %v1359_v18  ;;  %748 = vrot.lane.b32.xlu1 %v5760_v13, %s5274_s17 }
 0x14c   : > { %746 = vrot.lane.b32.xlu0 %v5769_v14, %s5274_s17 }
 0x14d   : > { %v488_v19 = vpop.permute.xlu1 %487 }
 0x14e   : > { %v486_v24 = vpop.permute.xlu0 %485  ;;  %565 = vst.msk [vmem:[#allocation2 + $0x78] sm:$0xff] %vm551_vm7, %v488_v19 }
 0x14f   : > { %564 = vst.msk [vmem:[#allocation2 + $0x70] sm:$0xff] %vm551_vm7, %v486_v24  ;;  %1255 = vrot.lane.b32.xlu1 %v5760_v13, %s5279_s11 }
 0x150   : > { %1253 = vrot.lane.b32.xlu0 %v5769_v14, %s5279_s11 }
 0x151   : > { %v992_v25 = vpop.permute.xlu1 %991  ;;  %v1471_v30 = vld [vmem:[#allocation2 + $0x58] sm:$0xff] }
 0x152   : > { %v990_v28 = vpop.permute.xlu0 %989  ;;  %v1470_v29 = vld [vmem:[#allocation2 + $0x50] sm:$0xff]  ;;  %1076 = vst.msk [vmem:[#allocation2 + $0x67] sm:$0xff] %vm1063_vm8, %v992_v25 }
 0x153   : > { %1075 = vst.msk [vmem:[#allocation2 + $0x5f] sm:$0xfe] %vm1061_vm9, %v990_v28  ;;  %4869 = vmatprep.mubr.msk.f32.mxu0 %vm365_vm0, %v1470_v29  ;;  %878 = vrot.lane.b32.xlu1 %v5760_v13, %s5273_s16 }
 0x154   : > { %876 = vrot.lane.b32.xlu0 %v5769_v14, %s5273_s16  ;;  %4870 = vmatmul.mubr.msk.f32.gmra.mrb[10].mxu0 %vm365_vm0, %v1471_v30 }
 0x155   : > { %v609_v31 = vpop.permute.xlu1 %608 }
 0x156   : > { %v607_v32 = vpop.permute.xlu0 %606  ;;  %687 = vst.msk [vmem:[#allocation2 + $0x77] sm:$0xff] %vm674_vm10, %v609_v31 }
 0x157   : > { %686 = vst.msk [vmem:[#allocation2 + $0x6f] sm:$0xfe] %vm672_vm11, %v607_v32  ;;  %1376 = vrot.lane.b32.xlu1 %v5760_v13, %s5280_s21 }
 0x158   : > { %1374 = vrot.lane.b32.xlu0 %v5769_v14, %s5280_s21 }
 0x159   : > { %v1122_v33 = vpop.permute.xlu1 %1121 }
 0x15a   : > { %v1120_v34 = vpop.permute.xlu0 %1119  ;;  %1200 = vst.msk [vmem:[#allocation2 + $0x69] sm:$0x7f] %vm1187_vm12, %v1122_v33 }
 0x15b   : > { %1199 = vst.msk [vmem:[#allocation2 + $0x61] sm:$0xff] %vm1185_vm13, %v1120_v34  ;;  %503 = vrot.lane.b32.xlu1 %v5760_v13, %s5275_s18 }
 0x15c   : > { %501 = vrot.lane.b32.xlu0 %v5769_v14, %s5275_s18 }
 0x15d   : > { %v737_v35 = vpop.permute.xlu1 %736 }
 0x15e   : > { %v735_v36 = vpop.permute.xlu0 %734  ;;  %819 = vst.msk [vmem:[#allocation2 + $0x79] sm:$0x7f] %vm804_vm6, %v737_v35 }
 0x15f   : > { %818 = vst.msk [vmem:[#allocation2 + $0x71] sm:$0xff] %vm802_vm4, %v735_v36  ;;  %1007 = vrot.lane.b32.xlu1 %v5760_v13, %s5276_s19 }
 0x160   : > { %1005 = vrot.lane.b32.xlu0 %v5769_v14, %s5276_s19 }
 0x161   : > { %v1244_v37 = vpop.permute.xlu1 %1243 }
 0x162   : > { %v1242_v42 = vpop.permute.xlu0 %1241  ;;  %1321 = vst.msk [vmem:[#allocation2 + $0x68] sm:$0xff] %vm1307_vm14, %v1244_v37 }
 0x163   : > { %1320 = vst.msk [vmem:[#allocation2 + $0x60] sm:$0xff] %vm1307_vm14, %v1242_v42  ;;  %624 = vrot.lane.b32.xlu1 %v5760_v13, %s5277_s20 }
 0x164   : > { %622 = vrot.lane.b32.xlu0 %v5769_v14, %s5277_s20 }
 0x165   : > { %v867_v43 = vpop.permute.xlu1 %866 }
 0x166   : > { %v865_v46 = vpop.permute.xlu0 %864  ;;  %948 = vst.msk [vmem:[#allocation2 + $0x78] sm:$0xff] %vm932_vm5, %v867_v43 }
 0x167   : > { %947 = vst.msk [vmem:[#allocation2 + $0x70] sm:$0xff] %vm932_vm5, %v865_v46  ;;  %1137 = vrot.lane.b32.xlu1 %v5820_v39, %s5278_s23 }
 0x168   : > { %1135 = vrot.lane.b32.xlu0 %v5829_v40, %s5278_s23 }
 0x169   : > { %v1365_v47 = vpop.permute.xlu1 %1364 }
 0x16a   : > { %v1363_v48 = vpop.permute.xlu0 %1362  ;;  %1443 = vst.msk [vmem:[#allocation2 + $0x67] sm:$0xff] %vm1430_vm15, %v1365_v47 }
 0x16b   : > { %1442 = vst.msk [vmem:[#allocation2 + $0x5f] sm:$0xfe] %vm1428_vm3, %v1363_v48  ;;  %752 = vrot.lane.b32.xlu1 %v5820_v39, %s5274_s17 }
 0x16c   : > { %750 = vrot.lane.b32.xlu0 %v5829_v40, %s5274_s17 }
 0x16d   : > { %v492_v49 = vpop.permute.xlu1 %491 }
 0x16e   : > { %v490_v50 = vpop.permute.xlu0 %489  ;;  %567 = vst.msk [vmem:[#allocation2 + $0x88] sm:$0xff] %vm551_vm7, %v492_v49 }
 0x16f   : > { %566 = vst.msk [vmem:[#allocation2 + $0x80] sm:$0xff] %vm551_vm7, %v490_v50  ;;  %1259 = vrot.lane.b32.xlu1 %v5820_v39, %s5279_s11 }
 0x170   : > { %1257 = vrot.lane.b32.xlu0 %v5829_v40, %s5279_s11 }
 0x171   : > { %v996_v51 = vpop.permute.xlu1 %995  ;;  %v1473_v54 = vld [vmem:[#allocation2 + $0x68] sm:$0xff] }
 0x172   : > { %v994_v52 = vpop.permute.xlu0 %993  ;;  %v1472_v53 = vld [vmem:[#allocation2 + $0x60] sm:$0xff]  ;;  %1078 = vst.msk [vmem:[#allocation2 + $0x77] sm:$0xff] %vm1063_vm8, %v996_v51 }
 0x173   : > { %1077 = vst.msk [vmem:[#allocation2 + $0x6f] sm:$0xfe] %vm1061_vm9, %v994_v52  ;;  %4872 = vmatprep.mubr.msk.f32.mxu0 %vm365_vm0, %v1472_v53  ;;  %882 = vrot.lane.b32.xlu1 %v5820_v39, %s5273_s16 }
 0x174   : > { %880 = vrot.lane.b32.xlu0 %v5829_v40, %s5273_s16  ;;  %4873 = vmatmul.mubr.msk.f32.gmra.mrb[12].mxu0 %vm365_vm0, %v1473_v54 }
 0x175   : > { %v613_v55 = vpop.permute.xlu1 %612 }
 0x176   : > { %v611_v56 = vpop.permute.xlu0 %610  ;;  %689 = vst.msk [vmem:[#allocation2 + $0x87] sm:$0xff] %vm674_vm10, %v613_v55 }
 0x177   : > { %688 = vst.msk [vmem:[#allocation2 + $0x7f] sm:$0xfe] %vm672_vm11, %v611_v56  ;;  %1380 = vrot.lane.b32.xlu1 %v5820_v39, %s5280_s21 }
 0x178   : > { %1378 = vrot.lane.b32.xlu0 %v5829_v40, %s5280_s21 }
 0x179   : > { %v1126_v57 = vpop.permute.xlu1 %1125 }
 0x17a   : > { %v1124_v58 = vpop.permute.xlu0 %1123  ;;  %1202 = vst.msk [vmem:[#allocation2 + $0x79] sm:$0x7f] %vm1187_vm12, %v1126_v57 }
 0x17b   : > { %1201 = vst.msk [vmem:[#allocation2 + $0x71] sm:$0xff] %vm1185_vm13, %v1124_v58  ;;  %507 = vrot.lane.b32.xlu1 %v5820_v39, %s5275_s18 }
 0x17c   : > { %505 = vrot.lane.b32.xlu0 %v5829_v40, %s5275_s18 }
 0x17d   : > { %v741_v59 = vpop.permute.xlu1 %740 }
 0x17e   : > { %v739_v60 = vpop.permute.xlu0 %738  ;;  %821 = vst.msk [vmem:[#allocation2 + $0x89] sm:$0x7f] %vm804_vm6, %v741_v59 }
 0x17f   : > { %820 = vst.msk [vmem:[#allocation2 + $0x81] sm:$0xff] %vm802_vm4, %v739_v60  ;;  %1011 = vrot.lane.b32.xlu1 %v5820_v39, %s5276_s19 }
 0x180   : > { %1009 = vrot.lane.b32.xlu0 %v5829_v40, %s5276_s19 }
 0x181   : > { %v1248_v63 = vpop.permute.xlu1 %1247 }
 0x182   : > { %v1246_v17 = vpop.permute.xlu0 %1245  ;;  %1323 = vst.msk [vmem:[#allocation2 + $0x78] sm:$0xff] %vm1307_vm14, %v1248_v63 }
 0x183   : > { %1322 = vst.msk [vmem:[#allocation2 + $0x70] sm:$0xff] %vm1307_vm14, %v1246_v17  ;;  %628 = vrot.lane.b32.xlu1 %v5820_v39, %s5277_s20  ;;  %v1862_v39 = vld [vmem:[%s8141_s3 + $0x8] sm:$0xff] }
 0x184   : > { %626 = vrot.lane.b32.xlu0 %v5829_v40, %s5277_s20  ;;  %2069 = vmatprep.mubr.f32.mxu1 %v1862_v39 }
 0x185   : > { %v871_v18 = vpop.permute.xlu1 %870 }
 0x186   : > { %v869_v19 = vpop.permute.xlu0 %868  ;;  %950 = vst.msk [vmem:[#allocation2 + $0x88] sm:$0xff] %vm932_vm5, %v871_v18 }
 0x187   : > { %949 = vst.msk [vmem:[#allocation2 + $0x80] sm:$0xff] %vm932_vm5, %v869_v19  ;;  %v6109_v24 = vpop.f32.mrb[0].mxu0  ;;  %1141 = vrot.lane.b32.xlu1 %v5884_v61, %s5278_s23 }
 0x188   : > { %1139 = vrot.lane.b32.xlu0 %v5889_v62, %s5278_s23  ;;  %v6115_v25 = vpop.f32.mrb[1].mxu0 }
 0x189   : > { %v1369_v28 = vpop.permute.xlu1 %1368 }
 0x18a   : > { %v1367_v29 = vpop.permute.xlu0 %1366  ;;  %1445 = vst.msk [vmem:[#allocation2 + $0x77] sm:$0xff] %vm1430_vm15, %v1369_v28 }
 0x18b   : > { %1444 = vst.msk [vmem:[#allocation2 + $0x6f] sm:$0xfe] %vm1428_vm3, %v1367_v29  ;;  %756 = vrot.lane.b32.xlu1 %v5884_v61, %s5274_s17 }
 0x18c   : > { %754 = vrot.lane.b32.xlu0 %v5889_v62, %s5274_s17 }
 0x18d   : > { %v496_v30 = vpop.permute.xlu1 %495 }
 0x18e   : > { %v494_v31 = vpop.permute.xlu0 %493  ;;  %569 = vst.msk [vmem:[#allocation2 + $0x98] sm:$0xff] %vm551_vm7, %v496_v30 }
 0x18f   : > { %568 = vst.msk [vmem:[#allocation2 + $0x90] sm:$0xff] %vm551_vm7, %v494_v31  ;;  %1263 = vrot.lane.b32.xlu1 %v5884_v61, %s5279_s11 }
 0x190   : > { %1261 = vrot.lane.b32.xlu0 %v5889_v62, %s5279_s11 }
 0x191   : > { %v1000_v32 = vpop.permute.xlu1 %999  ;;  %v1475_v35 = vld [vmem:[#allocation2 + $0x78] sm:$0xff] }
 0x192   : > { %v998_v33 = vpop.permute.xlu0 %997  ;;  %v1474_v34 = vld [vmem:[#allocation2 + $0x70] sm:$0xff]  ;;  %1080 = vst.msk [vmem:[#allocation2 + $0x87] sm:$0xff] %vm1063_vm8, %v1000_v32 }
 0x193   : > { %1079 = vst.msk [vmem:[#allocation2 + $0x7f] sm:$0xfe] %vm1061_vm9, %v998_v33  ;;  %4875 = vmatprep.mubr.msk.f32.mxu0 %vm365_vm0, %v1474_v34  ;;  %886 = vrot.lane.b32.xlu1 %v5884_v61, %s5273_s16 }
 0x194   : > { %884 = vrot.lane.b32.xlu0 %v5889_v62, %s5273_s16  ;;  %4876 = vmatmul.mubr.msk.f32.gmra.mrb[14].mxu0 %vm365_vm0, %v1475_v35 }
 0x195   : > { %v617_v36 = vpop.permute.xlu1 %616 }
 0x196   : > { %v615_v37 = vpop.permute.xlu0 %614  ;;  %691 = vst.msk [vmem:[#allocation2 + $0x97] sm:$0xff] %vm674_vm10, %v617_v36 }
 0x197   : > { %690 = vst.msk [vmem:[#allocation2 + $0x8f] sm:$0xfe] %vm672_vm11, %v615_v37  ;;  %1384 = vrot.lane.b32.xlu1 %v5884_v61, %s5280_s21 }
 0x198   : > { %1382 = vrot.lane.b32.xlu0 %v5889_v62, %s5280_s21 }
 0x199   : > { %v1130_v42 = vpop.permute.xlu1 %1129 }
 0x19a   : > { %v1128_v43 = vpop.permute.xlu0 %1127  ;;  %1204 = vst.msk [vmem:[#allocation2 + $0x89] sm:$0x7f] %vm1187_vm12, %v1130_v42 }
 0x19b   : > { %1203 = vst.msk [vmem:[#allocation2 + $0x81] sm:$0xff] %vm1185_vm13, %v1128_v43  ;;  %511 = vrot.lane.b32.xlu1 %v5884_v61, %s5275_s18 }
 0x19c   : > { %509 = vrot.lane.b32.xlu0 %v5889_v62, %s5275_s18 }
 0x19d   : > { %v745_v46 = vpop.permute.xlu1 %744 }
 0x19e   : > { %v743_v47 = vpop.permute.xlu0 %742  ;;  %823 = vst.msk [vmem:[#allocation2 + $0x99] sm:$0x7f] %vm804_vm6, %v745_v46 }
 0x19f   : > { %822 = vst.msk [vmem:[#allocation2 + $0x91] sm:$0xff] %vm802_vm4, %v743_v47  ;;  %1015 = vrot.lane.b32.xlu1 %v5884_v61, %s5276_s19 }
 0x1a0   : > { %1013 = vrot.lane.b32.xlu0 %v5889_v62, %s5276_s19 }
 0x1a1   : > { %v1252_v48 = vpop.permute.xlu1 %1251 }
 0x1a2   : > { %v1250_v49 = vpop.permute.xlu0 %1249  ;;  %1325 = vst.msk [vmem:[#allocation2 + $0x88] sm:$0xff] %vm1307_vm14, %v1252_v48 }
 0x1a3   : > { %1324 = vst.msk [vmem:[#allocation2 + $0x80] sm:$0xff] %vm1307_vm14, %v1250_v49  ;;  %632 = vrot.lane.b32.xlu1 %v5884_v61, %s5277_s20 }
 0x1a4   : > { %630 = vrot.lane.b32.xlu0 %v5889_v62, %s5277_s20 }
 0x1a5   : > { %v875_v50 = vpop.permute.xlu1 %874 }
 0x1a6   : > { %v873_v51 = vpop.permute.xlu0 %872  ;;  %952 = vst.msk [vmem:[#allocation2 + $0x98] sm:$0xff] %vm932_vm5, %v875_v50 }
 0x1a7   : > { %951 = vst.msk [vmem:[#allocation2 + $0x90] sm:$0xff] %vm932_vm5, %v873_v51  ;;  %v6163_v52 = vpop.f32.mrb[2].mxu0  ;;  %1145 = vrot.lane.b32.xlu1 %v5944_v38, %s5278_s23 }
 0x1a8   : > { %1143 = vrot.lane.b32.xlu0 %v5947_v41, %s5278_s23  ;;  %v6169_v53 = vpop.f32.mrb[3].mxu0 }
 0x1a9   : > { %v1373_v54 = vpop.permute.xlu1 %1372 }
 0x1aa   : > { %v1371_v55 = vpop.permute.xlu0 %1370  ;;  %1447 = vst.msk [vmem:[#allocation2 + $0x87] sm:$0xff] %vm1430_vm15, %v1373_v54 }
 0x1ab   : > { %1446 = vst.msk [vmem:[#allocation2 + $0x7f] sm:$0xfe] %vm1428_vm3, %v1371_v55  ;;  %760 = vrot.lane.b32.xlu1 %v5944_v38, %s5274_s17 }
 0x1ac   : > { %758 = vrot.lane.b32.xlu0 %v5947_v41, %s5274_s17 }
 0x1ad   : > { %v500_v56 = vpop.permute.xlu1 %499 }
 0x1ae   : > { %v498_v57 = vpop.permute.xlu0 %497  ;;  %571 = vst.msk [vmem:[#allocation2 + $0xa8] sm:$0xff] %vm551_vm7, %v500_v56 }
 0x1af   : > { %570 = vst.msk [vmem:[#allocation2 + $0xa0] sm:$0xff] %vm551_vm7, %v498_v57  ;;  %1267 = vrot.lane.b32.xlu1 %v5944_v38, %s5279_s11  ;;  %v364_v57 = vld [vmem:[%s5426_s15 + $0xf8] sm:$0xff] }
 0x1b0   : > { %1265 = vrot.lane.b32.xlu0 %v5947_v41, %s5279_s11 }
 0x1b1   : > { %v1004_v58 = vpop.permute.xlu1 %1003  ;;  %v1477_v63 = vld [vmem:[#allocation2 + $0x88] sm:$0xff] }
 0x1b2   : > { %v1002_v59 = vpop.permute.xlu0 %1001  ;;  %v1476_v60 = vld [vmem:[#allocation2 + $0x80] sm:$0xff]  ;;  %1082 = vst.msk [vmem:[#allocation2 + $0x97] sm:$0xff] %vm1063_vm8, %v1004_v58  ;;  %v363_v58 = vld [vmem:[%s5426_s15 + $0xf0] sm:$0xff] }
 0x1b3   : > { %1081 = vst.msk [vmem:[#allocation2 + $0x8f] sm:$0xfe] %vm1061_vm9, %v1002_v59  ;;  %4878 = vmatprep.mubr.msk.f32.mxu0 %vm365_vm0, %v1476_v60  ;;  %890 = vrot.lane.b32.xlu1 %v5944_v38, %s5273_s16 }
 0x1b4   : > { %888 = vrot.lane.b32.xlu0 %v5947_v41, %s5273_s16  ;;  %4879 = vmatmul.mubr.msk.f32.gmra.mrb[16].mxu0 %vm365_vm0, %v1477_v63 }
 0x1b5   : > { %v621_v17 = vpop.permute.xlu1 %620 }
 0x1b6   : > { %v619_v18 = vpop.permute.xlu0 %618  ;;  %693 = vst.msk [vmem:[#allocation2 + $0xa7] sm:$0xff] %vm674_vm10, %v621_v17 }
 0x1b7   : > { %692 = vst.msk [vmem:[#allocation2 + $0x9f] sm:$0xfe] %vm672_vm11, %v619_v18  ;;  %1388 = vrot.lane.b32.xlu1 %v5944_v38, %s5280_s21 }
 0x1b8   : > { %1386 = vrot.lane.b32.xlu0 %v5947_v41, %s5280_s21 }
 0x1b9   : > { %v1134_v19 = vpop.permute.xlu1 %1133 }
 0x1ba   : > { %v1132_v28 = vpop.permute.xlu0 %1131  ;;  %1206 = vst.msk [vmem:[#allocation2 + $0x99] sm:$0x7f] %vm1187_vm12, %v1134_v19 }
 0x1bb   : > { %1205 = vst.msk [vmem:[#allocation2 + $0x91] sm:$0xff] %vm1185_vm13, %v1132_v28  ;;  %515 = vrot.lane.b32.xlu1 %v5944_v38, %s5275_s18 }
 0x1bc   : > { %513 = vrot.lane.b32.xlu0 %v5947_v41, %s5275_s18 }
 0x1bd   : > { %v749_v29 = vpop.permute.xlu1 %748 }
 0x1be   : > { %v747_v30 = vpop.permute.xlu0 %746  ;;  %825 = vst.msk [vmem:[#allocation2 + $0xa9] sm:$0x7f] %vm804_vm6, %v749_v29 }
 0x1bf   : > { %824 = vst.msk [vmem:[#allocation2 + $0xa1] sm:$0xff] %vm802_vm4, %v747_v30  ;;  %1019 = vrot.lane.b32.xlu1 %v5944_v38, %s5276_s19 }
 0x1c0   : > { %1017 = vrot.lane.b32.xlu0 %v5947_v41, %s5276_s19 }
 0x1c1   : > { %v1256_v31 = vpop.permute.xlu1 %1255 }
 0x1c2   : > { %v1254_v32 = vpop.permute.xlu0 %1253  ;;  %1327 = vst.msk [vmem:[#allocation2 + $0x98] sm:$0xff] %vm1307_vm14, %v1256_v31 }
 0x1c3   : > { %1326 = vst.msk [vmem:[#allocation2 + $0x90] sm:$0xff] %vm1307_vm14, %v1254_v32  ;;  %636 = vrot.lane.b32.xlu1 %v5944_v38, %s5277_s20 }
 0x1c4   : > { %634 = vrot.lane.b32.xlu0 %v5947_v41, %s5277_s20 }
 0x1c5   : > { %v879_v33 = vpop.permute.xlu1 %878 }
 0x1c6   : > { %v877_v34 = vpop.permute.xlu0 %876  ;;  %954 = vst.msk [vmem:[#allocation2 + $0xa8] sm:$0xff] %vm932_vm5, %v879_v33 }
 0x1c7   : > { %953 = vst.msk [vmem:[#allocation2 + $0xa0] sm:$0xff] %vm932_vm5, %v877_v34  ;;  %v6217_v35 = vpop.f32.mrb[4].mxu0  ;;  %1149 = vrot.lane.b32.xlu1 %v6004_v15, %s5278_s23 }
 0x1c8   : > { %1147 = vrot.lane.b32.xlu0 %v6007_v16, %s5278_s23  ;;  %v6223_v36 = vpop.f32.mrb[5].mxu0 }
 0x1c9   : > { %v1377_v37 = vpop.permute.xlu1 %1376 }
 0x1ca   : > { %v1375_v42 = vpop.permute.xlu0 %1374  ;;  %1449 = vst.msk [vmem:[#allocation2 + $0x97] sm:$0xff] %vm1430_vm15, %v1377_v37 }
 0x1cb   : > { %1448 = vst.msk [vmem:[#allocation2 + $0x8f] sm:$0xfe] %vm1428_vm3, %v1375_v42  ;;  %764 = vrot.lane.b32.xlu1 %v6004_v15, %s5274_s17 }
 0x1cc   : > { %762 = vrot.lane.b32.xlu0 %v6007_v16, %s5274_s17 }
 0x1cd   : > { %v504_v43 = vpop.permute.xlu1 %503 }
 0x1ce   : > { %v502_v46 = vpop.permute.xlu0 %501  ;;  %573 = vst.msk [vmem:[#allocation2 + $0xb8] sm:$0xff] %vm551_vm7, %v504_v43 }
 0x1cf   : > { %572 = vst.msk [vmem:[#allocation2 + $0xb0] sm:$0xff] %vm551_vm7, %v502_v46  ;;  %1271 = vrot.lane.b32.xlu1 %v6004_v15, %s5279_s11  ;;  %v6286_v46 = vld [vmem:[%s8140_s2] ss:$0 sm:$0xff] }
 0x1d0   : > { %1269 = vrot.lane.b32.xlu0 %v6007_v16, %s5279_s11 }
 0x1d1   : > { %v1008_v47 = vpop.permute.xlu1 %1007  ;;  %v1479_v50 = vld [vmem:[#allocation2 + $0x98] sm:$0xff] }
 0x1d2   : > { %v1006_v48 = vpop.permute.xlu0 %1005  ;;  %v1478_v49 = vld [vmem:[#allocation2 + $0x90] sm:$0xff]  ;;  %1084 = vst.msk [vmem:[#allocation2 + $0xa7] sm:$0xff] %vm1063_vm8, %v1008_v47  ;;  %v6296_v47 = vadd.f32 %v6109_v24, %v6286_v46  ;;  %v6312_v24 = vadd.f32 %v6286_v46, %v6169_v53 }
 0x1d3   : > { %1083 = vst.msk [vmem:[#allocation2 + $0x9f] sm:$0xfe] %vm1061_vm9, %v1006_v48  ;;  %4881 = vmatprep.mubr.msk.f32.mxu0 %vm365_vm0, %v1478_v49  ;;  %894 = vrot.lane.b32.xlu1 %v6004_v15, %s5273_s16  ;;  %v6300_v48 = vadd.f32 %v6286_v46, %v6115_v25 }
 0x1d4   : > { %892 = vrot.lane.b32.xlu0 %v6007_v16, %s5273_s16  ;;  %4882 = vmatmul.mubr.msk.f32.gmra.mrb[18].mxu0 %vm365_vm0, %v1479_v50  ;;  %v8167_v25 = vmax.f32 %v6296_v47, 0.0 }
 0x1d5   : > { %v625_v51 = vpop.permute.xlu1 %624 }
 0x1d6   : > { %v623_v54 = vpop.permute.xlu0 %622  ;;  %695 = vst.msk [vmem:[#allocation2 + $0xb7] sm:$0xff] %vm674_vm10, %v625_v51  ;;  %v6308_v51 = vadd.f32 %v6163_v52, %v6286_v46 }
 0x1d7   : > { %694 = vst.msk [vmem:[#allocation2 + $0xaf] sm:$0xfe] %vm672_vm11, %v623_v54  ;;  %1392 = vrot.lane.b32.xlu1 %v6004_v15, %s5280_s21  ;;  %v8166_v54 = vmax.f32 %v6300_v48, 0.0 }
 0x1d8   : > { %1390 = vrot.lane.b32.xlu0 %v6007_v16, %s5280_s21  ;;  %v8163_v52 = vmax.f32 %v6308_v51, 0.0 }
 0x1d9   : > { %v1138_v55 = vpop.permute.xlu1 %1137  ;;  %v5187_v53 = vpack.i.bf16 %v8167_v25, %v8166_v54 }
 0x1da   : > { %v1136_v56 = vpop.permute.xlu0 %1135  ;;  %1208 = vst.msk [vmem:[#allocation2 + $0xa9] sm:$0x7f] %vm1187_vm12, %v1138_v55 }
 0x1db   : > { %1207 = vst.msk [vmem:[#allocation2 + $0xa1] sm:$0xff] %vm1185_vm13, %v1136_v56  ;;  %1023 = vrot.lane.b32.xlu1 %v6004_v15, %s5276_s19 }
 0x1dc   : > { %1021 = vrot.lane.b32.xlu0 %v6007_v16, %s5276_s19 }
 0x1dd   : > { %v753_v59 = vpop.permute.xlu1 %752 }
 0x1de   : > { %v751_v60 = vpop.permute.xlu0 %750  ;;  %827 = vst.msk [vmem:[#allocation2 + $0xb9] sm:$0x7f] %vm804_vm6, %v753_v59  ;;  %v8162_v59 = vmax.f32 %v6312_v24, 0.0 }
 0x1df   : > { %826 = vst.msk [vmem:[#allocation2 + $0xb1] sm:$0xff] %vm802_vm4, %v751_v60  ;;  %1153 = vrot.lane.b32.xlu1 %v364_v57, %s5278_s23  ;;  %v6328_v60 = vadd.f32 %v6217_v35, %v6286_v46 }
 0x1e0   : > { %1151 = vrot.lane.b32.xlu0 %v363_v58, %s5278_s23 }
 0x1e1   : > { %v1260_v63 = vpop.permute.xlu1 %1259  ;;  %v8159_v35 = vmax.f32 %v6328_v60, 0.0 }
 0x1e2   : > { %v1258_v17 = vpop.permute.xlu0 %1257  ;;  %1329 = vst.msk [vmem:[#allocation2 + $0xa8] sm:$0xff] %vm1307_vm14, %v1260_v63  ;;  %v6332_v63 = vadd.f32 %v6286_v46, %v6223_v36 }
 0x1e3   : > { %1328 = vst.msk [vmem:[#allocation2 + $0xa0] sm:$0xff] %vm1307_vm14, %v1258_v17  ;;  %1275 = vrot.lane.b32.xlu1 %v364_v57, %s5279_s11 }
 0x1e4   : > { %1273 = vrot.lane.b32.xlu0 %v363_v58, %s5279_s11 }
 0x1e5   : > { %v883_v18 = vpop.permute.xlu1 %882 }
 0x1e6   : > { %v881_v19 = vpop.permute.xlu0 %880  ;;  %956 = vst.msk [vmem:[#allocation2 + $0xb8] sm:$0xff] %vm932_vm5, %v883_v18  ;;  %v8158_v18 = vmax.f32 %v6332_v63, 0.0 }
 0x1e7   : > { %955 = vst.msk [vmem:[#allocation2 + $0xb0] sm:$0xff] %vm932_vm5, %v881_v19  ;;  %v4865_v28 = vpop.f32.mrb[6].mxu0  ;;  %519 = vrot.lane.b32.xlu1 %v6004_v15, %s5275_s18 }
 0x1e8   : > { %517 = vrot.lane.b32.xlu0 %v6007_v16, %s5275_s18  ;;  %v1700_v29 = vpop.f32.mrb[7].mxu0  ;;  %v6344_v36 = vadd.f32 %v4865_v28, %v6286_v46 }
 0x1e9   : > { %v1381_v30 = vpop.permute.xlu1 %1380  ;;  %v6347_v19 = vadd.f32 %v6286_v46, %v1700_v29 }
 0x1ea   : > { %v1379_v31 = vpop.permute.xlu0 %1378  ;;  %1451 = vst.msk [vmem:[#allocation2 + $0xa7] sm:$0xff] %vm1430_vm15, %v1381_v30 }
 0x1eb   : > { %1450 = vst.msk [vmem:[#allocation2 + $0x9f] sm:$0xfe] %vm1428_vm3, %v1379_v31  ;;  %1396 = vrot.lane.b32.xlu1 %v364_v57, %s5280_s21  ;;  %v8154_v28 = vmax.f32 %v6347_v19, 0.0 }
 0x1ec   : > { %1394 = vrot.lane.b32.xlu0 %v363_v58, %s5280_s21 }
 0x1ed   : > { %v508_v32 = vpop.permute.xlu1 %507 }
 0x1ee   : > { %v506_v33 = vpop.permute.xlu0 %505  ;;  %575 = vst.msk [vmem:[#allocation2 + $0xc8] sm:$0xff] %vm551_vm7, %v508_v32  ;;  %v5207_v32 = vpack.i.bf16 %v8159_v35, %v8158_v18 }
 0x1ef   : > { %574 = vst.msk [vmem:[#allocation2 + $0xc0] sm:$0xff] %vm551_vm7, %v506_v33  ;;  %640 = vrot.lane.b32.xlu1 %v6004_v15, %s5277_s20  ;;  %v8155_v33 = vmax.f32 %v6344_v36, 0.0 }
 0x1f0   : > { %638 = vrot.lane.b32.xlu0 %v6007_v16, %s5277_s20 }
 0x1f1   : > { %v1012_v34 = vpop.permute.xlu1 %1011  ;;  %v1481_v43 = vld [vmem:[#allocation2 + $0xa8] sm:$0xff] }
 0x1f2   : > { %v1010_v37 = vpop.permute.xlu0 %1009  ;;  %v1480_v42 = vld [vmem:[#allocation2 + $0xa0] sm:$0xff]  ;;  %1086 = vst.msk [vmem:[#allocation2 + $0xb7] sm:$0xff] %vm1063_vm8, %v1012_v34 }
 0x1f3   : > { %1085 = vst.msk [vmem:[#allocation2 + $0xaf] sm:$0xfe] %vm1061_vm9, %v1010_v37  ;;  %4884 = vmatprep.mubr.msk.f32.mxu0 %vm365_vm0, %v1480_v42  ;;  %768 = vrot.lane.b32.xlu1 %v364_v57, %s5274_s17 }
 0x1f4   : > { %766 = vrot.lane.b32.xlu0 %v363_v58, %s5274_s17  ;;  %4885 = vmatmul.mubr.msk.f32.gmra.mrb[20].mxu0 %vm365_vm0, %v1481_v43  ;;  %s5281_s17 = smov 120  }
 0x1f5   : > { %v629_v49 = vpop.permute.xlu1 %628 }
 0x1f6   : > { %v627_v50 = vpop.permute.xlu0 %626  ;;  %697 = vst.msk [vmem:[#allocation2 + $0xc7] sm:$0xff] %vm674_vm10, %v629_v49  ;;  %v5217_v49 = vpack.i.bf16 %v8155_v33, %v8154_v28 }
 0x1f7   : > { %696 = vst.msk [vmem:[#allocation2 + $0xbf] sm:$0xfe] %vm672_vm11, %v627_v50  ;;  %898 = vrot.lane.b32.xlu1 %v364_v57, %s5273_s16 }
 0x1f8   : > { %896 = vrot.lane.b32.xlu0 %v363_v58, %s5273_s16 }
 0x1f9   : > { %v1142_v55 = vpop.permute.xlu1 %1141 }
 0x1fa   : > { %v1140_v56 = vpop.permute.xlu0 %1139  ;;  %1210 = vst.msk [vmem:[#allocation2 + $0xb9] sm:$0x7f] %vm1187_vm12, %v1142_v55 }
 0x1fb   : > { %1209 = vst.msk [vmem:[#allocation2 + $0xb1] sm:$0xff] %vm1185_vm13, %v1140_v56  ;;  %1027 = vrot.lane.b32.xlu1 %v364_v57, %s5276_s19 }
 0x1fc   : > { %1025 = vrot.lane.b32.xlu0 %v363_v58, %s5276_s19  ;;  %v5197_v58 = vpack.i.bf16 %v8163_v52, %v8162_v59  ;;  %s5285_s19 = smov 64  }
 0x1fd   : > { %v757_v57 = vpop.permute.xlu1 %756 }
 0x1fe   : > { %v755_v17 = vpop.permute.xlu0 %754  ;;  %829 = vst.msk [vmem:[#allocation2 + $0xc9] sm:$0x7f] %vm804_vm6, %v757_v57 }
 0x1ff   : > { %828 = vst.msk [vmem:[#allocation2 + $0xc1] sm:$0xff] %vm802_vm4, %v755_v17  ;;  %5188 = vrot.lane.b32.xlu1 %v5187_v53, %s5281_s17 }
 0x201   : > { %v1264_v30 = vpop.permute.xlu1 %1263 }
 0x202   : > { %v1262_v31 = vpop.permute.xlu0 %1261  ;;  %1331 = vst.msk [vmem:[#allocation2 + $0xb8] sm:$0xff] %vm1307_vm14, %v1264_v30 }
 0x203   : > { %1330 = vst.msk [vmem:[#allocation2 + $0xb0] sm:$0xff] %vm1307_vm14, %v1262_v31  ;;  %5198 = vrot.lane.b32.xlu1 %v5197_v58, %s5281_s17 }
 0x205   : > { %v887_v34 = vpop.permute.xlu1 %886 }
 0x206   : > { %v885_v29 = vpop.permute.xlu0 %884  ;;  %958 = vst.msk [vmem:[#allocation2 + $0xc8] sm:$0xff] %vm932_vm5, %v887_v34 }
 0x207   : > { %957 = vst.msk [vmem:[#allocation2 + $0xc0] sm:$0xff] %vm932_vm5, %v885_v29  ;;  %v4868_v37 = vpop.f32.mrb[8].mxu0  ;;  %5208 = vrot.lane.b32.xlu1 %v5207_v32, %s5281_s17 }
 0x208   : > { %v6362_v42 = vadd.f32 %v4868_v37, %v6286_v46  ;;  %v1710_v43 = vpop.f32.mrb[9].mxu0 }
 0x209   : > { %v6369_v50 = vadd.f32 %v6286_v46, %v1710_v43  ;;  %v1385_v55 = vpop.permute.xlu1 %1384 }
 0x20a   : > { %v1383_v56 = vpop.permute.xlu0 %1382  ;;  %v8151_v53 = vmax.f32 %v6362_v42, 0.0  ;;  %1453 = vst.msk [vmem:[#allocation2 + $0xb7] sm:$0xff] %vm1430_vm15, %v1385_v55 }
 0x20b   : > { %1452 = vst.msk [vmem:[#allocation2 + $0xaf] sm:$0xfe] %vm1428_vm3, %v1383_v56  ;;  %v8150_v57 = vmax.f32 %v6369_v50, 0.0  ;;  %5218 = vrot.lane.b32.xlu1 %v5217_v49, %s5281_s17 }
 0x20d   : > { %v5227_v17 = vpack.i.bf16 %v8151_v53, %v8150_v57  ;;  %v512_v58 = vpop.permute.xlu1 %511 }
 0x20e   : > { %v510_v30 = vpop.permute.xlu0 %509  ;;  %577 = vst.msk [vmem:[#allocation2 + $0xd8] sm:$0xff] %vm551_vm7, %v512_v58 }
 0x20f   : > { %576 = vst.msk [vmem:[#allocation2 + $0xd0] sm:$0xff] %vm551_vm7, %v510_v30  ;;  %5228 = vrot.lane.b32.xlu1 %v5227_v17, %s5281_s17 }
 0x211   : > { %v1016_v31 = vpop.permute.xlu1 %1015  ;;  %v1483_v29 = vld [vmem:[#allocation2 + $0xb8] sm:$0xff] }
 0x212   : > { %v1014_v32 = vpop.permute.xlu0 %1013  ;;  %v1482_v34 = vld [vmem:[#allocation2 + $0xb0] sm:$0xff]  ;;  %1088 = vst.msk [vmem:[#allocation2 + $0xc7] sm:$0xff] %vm1063_vm8, %v1016_v31 }
 0x213   : > { %1087 = vst.msk [vmem:[#allocation2 + $0xbf] sm:$0xfe] %vm1061_vm9, %v1014_v32  ;;  %4887 = vmatprep.mubr.msk.f32.mxu0 %vm365_vm0, %v1482_v34 }
 0x214   : > { %4888 = vmatmul.mubr.msk.f32.gmra.mrb[22].mxu0 %vm365_vm0, %v1483_v29 }
 0x215   : > { %v633_v37 = vpop.permute.xlu1 %632 }
 0x216   : > { %v631_v43 = vpop.permute.xlu0 %630  ;;  %699 = vst.msk [vmem:[#allocation2 + $0xd7] sm:$0xff] %vm674_vm10, %v633_v37 }
 0x217   : > { %698 = vst.msk [vmem:[#allocation2 + $0xcf] sm:$0xfe] %vm672_vm11, %v631_v43 }
 0x219   : > { %v1146_v49 = vpop.permute.xlu1 %1145 }
 0x21a   : > { %v1144_v55 = vpop.permute.xlu0 %1143  ;;  %1212 = vst.msk [vmem:[#allocation2 + $0xc9] sm:$0x7f] %vm1187_vm12, %v1146_v49 }
 0x21b   : > { %1211 = vst.msk [vmem:[#allocation2 + $0xc1] sm:$0xff] %vm1185_vm13, %v1144_v55 }
 0x21d   : > { %v761_v56 = vpop.permute.xlu1 %760 }
 0x21e   : > { %v759_v17 = vpop.permute.xlu0 %758  ;;  %831 = vst.msk [vmem:[#allocation2 + $0xd9] sm:$0x7f] %vm804_vm6, %v761_v56 }
 0x21f   : > { %830 = vst.msk [vmem:[#allocation2 + $0xd1] sm:$0xff] %vm802_vm4, %v759_v17 }
 0x221   : > { %v1268_v58 = vpop.permute.xlu1 %1267 }
 0x222   : > { %v1266_v30 = vpop.permute.xlu0 %1265  ;;  %1333 = vst.msk [vmem:[#allocation2 + $0xc8] sm:$0xff] %vm1307_vm14, %v1268_v58 }
 0x223   : > { %1332 = vst.msk [vmem:[#allocation2 + $0xc0] sm:$0xff] %vm1307_vm14, %v1266_v30 }
 0x225   : > { %v891_v31 = vpop.permute.xlu1 %890 }
 0x226   : > { %v889_v32 = vpop.permute.xlu0 %888  ;;  %960 = vst.msk [vmem:[#allocation2 + $0xd8] sm:$0xff] %vm932_vm5, %v891_v31 }
 0x227   : > { %959 = vst.msk [vmem:[#allocation2 + $0xd0] sm:$0xff] %vm932_vm5, %v889_v32  ;;  %v4871_v34 = vpop.f32.mrb[10].mxu0 }
 0x228   : > { %v6398_v29 = vadd.f32 %v4871_v34, %v6286_v46  ;;  %v1720_v37 = vpop.f32.mrb[11].mxu0 }
 0x229   : > { %v6401_v43 = vadd.f32 %v6286_v46, %v1720_v37  ;;  %v1389_v49 = vpop.permute.xlu1 %1388 }
 0x22a   : > { %v1387_v55 = vpop.permute.xlu0 %1386  ;;  %v8149_v56 = vmax.f32 %v6398_v29, 0.0  ;;  %1455 = vst.msk [vmem:[#allocation2 + $0xc7] sm:$0xff] %vm1430_vm15, %v1389_v49 }
 0x22b   : > { %1454 = vst.msk [vmem:[#allocation2 + $0xbf] sm:$0xfe] %vm1428_vm3, %v1387_v55  ;;  %v8148_v17 = vmax.f32 %v6401_v43, 0.0 }
 0x22d   : > { %v5237_v58 = vpack.i.bf16 %v8149_v56, %v8148_v17  ;;  %v516_v30 = vpop.permute.xlu1 %515 }
 0x22e   : > { %v514_v31 = vpop.permute.xlu0 %513  ;;  %579 = vst.msk [vmem:[#allocation2 + $0xe8] sm:$0xff] %vm551_vm7, %v516_v30 }
 0x22f   : > { %578 = vst.msk [vmem:[#allocation2 + $0xe0] sm:$0xff] %vm551_vm7, %v514_v31  ;;  %5238 = vrot.lane.b32.xlu1 %v5237_v58, %s5281_s17 }
 0x231   : > { %v1020_v32 = vpop.permute.xlu1 %1019  ;;  %v1485_v49 = vld [vmem:[#allocation2 + $0xc8] sm:$0xff] }
 0x232   : > { %v1018_v34 = vpop.permute.xlu0 %1017  ;;  %v1484_v37 = vld [vmem:[#allocation2 + $0xc0] sm:$0xff]  ;;  %1090 = vst.msk [vmem:[#allocation2 + $0xd7] sm:$0xff] %vm1063_vm8, %v1020_v32 }
 0x233   : > { %1089 = vst.msk [vmem:[#allocation2 + $0xcf] sm:$0xfe] %vm1061_vm9, %v1018_v34  ;;  %4890 = vmatprep.mubr.msk.f32.mxu0 %vm365_vm0, %v1484_v37 }
 0x234   : > { %4891 = vmatmul.mubr.msk.f32.gmra.mrb[24].mxu0 %vm365_vm0, %v1485_v49 }
 0x235   : > { %v637_v55 = vpop.permute.xlu1 %636 }
 0x236   : > { %v635_v17 = vpop.permute.xlu0 %634  ;;  %701 = vst.msk [vmem:[#allocation2 + $0xe7] sm:$0xff] %vm674_vm10, %v637_v55 }
 0x237   : > { %700 = vst.msk [vmem:[#allocation2 + $0xdf] sm:$0xfe] %vm672_vm11, %v635_v17 }
 0x239   : > { %v1150_v30 = vpop.permute.xlu1 %1149 }
 0x23a   : > { %v1148_v58 = vpop.permute.xlu0 %1147  ;;  %1214 = vst.msk [vmem:[#allocation2 + $0xd9] sm:$0x7f] %vm1187_vm12, %v1150_v30 }
 0x23b   : > { %1213 = vst.msk [vmem:[#allocation2 + $0xd1] sm:$0xff] %vm1185_vm13, %v1148_v58 }
 0x23d   : > { %v765_v31 = vpop.permute.xlu1 %764 }
 0x23e   : > { %v763_v32 = vpop.permute.xlu0 %762  ;;  %833 = vst.msk [vmem:[#allocation2 + $0xe9] sm:$0x7f] %vm804_vm6, %v765_v31 }
 0x23f   : > { %832 = vst.msk [vmem:[#allocation2 + $0xe1] sm:$0xff] %vm802_vm4, %v763_v32 }
 0x241   : > { %v1272_v34 = vpop.permute.xlu1 %1271 }
 0x242   : > { %v1270_v37 = vpop.permute.xlu0 %1269  ;;  %1335 = vst.msk [vmem:[#allocation2 + $0xd8] sm:$0xff] %vm1307_vm14, %v1272_v34 }
 0x243   : > { %1334 = vst.msk [vmem:[#allocation2 + $0xd0] sm:$0xff] %vm1307_vm14, %v1270_v37 }
 0x245   : > { %v895_v49 = vpop.permute.xlu1 %894 }
 0x246   : > { %v893_v17 = vpop.permute.xlu0 %892  ;;  %962 = vst.msk [vmem:[#allocation2 + $0xe8] sm:$0xff] %vm932_vm5, %v895_v49 }
 0x247   : > { %961 = vst.msk [vmem:[#allocation2 + $0xe0] sm:$0xff] %vm932_vm5, %v893_v17  ;;  %v4874_v55 = vpop.f32.mrb[12].mxu0 }
 0x248   : > { %v6429_v30 = vadd.f32 %v4874_v55, %v6286_v46  ;;  %v1730_v58 = vpop.f32.mrb[13].mxu0 }
 0x249   : > { %v6432_v31 = vadd.f32 %v6286_v46, %v1730_v58  ;;  %v1393_v32 = vpop.permute.xlu1 %1392 }
 0x24a   : > { %v1391_v56 = vpop.permute.xlu0 %1390  ;;  %v8153_v34 = vmax.f32 %v6429_v30, 0.0  ;;  %1457 = vst.msk [vmem:[#allocation2 + $0xd7] sm:$0xff] %vm1430_vm15, %v1393_v32 }
 0x24b   : > { %1456 = vst.msk [vmem:[#allocation2 + $0xcf] sm:$0xfe] %vm1428_vm3, %v1391_v56  ;;  %v8152_v37 = vmax.f32 %v6432_v31, 0.0 }
 0x24d   : > { %v5247_v49 = vpack.i.bf16 %v8153_v34, %v8152_v37  ;;  %v1024_v17 = vpop.permute.xlu1 %1023 }
 0x24e   : > { %v1022_v55 = vpop.permute.xlu0 %1021  ;;  %1092 = vst.msk [vmem:[#allocation2 + $0xe7] sm:$0xff] %vm1063_vm8, %v1024_v17 }
 0x24f   : > { %1091 = vst.msk [vmem:[#allocation2 + $0xdf] sm:$0xfe] %vm1061_vm9, %v1022_v55  ;;  %5248 = vrot.lane.b32.xlu1 %v5247_v49, %s5281_s17 }
 0x251   : > { %v1154_v58 = vpop.permute.xlu1 %1153  ;;  %v1487_v53 = vld [vmem:[#allocation2 + $0xd8] sm:$0xff] }
 0x252   : > { %v1152_v57 = vpop.permute.xlu0 %1151  ;;  %v1486_v32 = vld [vmem:[#allocation2 + $0xd0] sm:$0xff]  ;;  %1216 = vst.msk [vmem:[#allocation2 + $0xe9] sm:$0x7f] %vm1187_vm12, %v1154_v58  ;;  %vm2573_vm12 = vcmask 523264  }
 0x253   : > { %1215 = vst.msk [vmem:[#allocation2 + $0xe1] sm:$0xff] %vm1185_vm13, %v1152_v57  ;;  %4893 = vmatprep.mubr.msk.f32.mxu0 %vm365_vm0, %v1486_v32  ;;  %vm2960_vm13 = vcmask 64512  }
 0x254   : > { %4894 = vmatmul.mubr.msk.f32.gmra.mrb[26].mxu0 %vm365_vm0, %v1487_v53 }
 0x255   : > { %v1276_v56 = vpop.permute.xlu1 %1275 }
 0x256   : > { %v1274_v37 = vpop.permute.xlu0 %1273  ;;  %1337 = vst.msk [vmem:[#allocation2 + $0xe8] sm:$0xff] %vm1307_vm14, %v1276_v56 }
 0x257   : > { %1336 = vst.msk [vmem:[#allocation2 + $0xe0] sm:$0xff] %vm1307_vm14, %v1274_v37  ;;  %vm3232_vm14 = vcmask 195712  }
 0x259   : > { %v520_v17 = vpop.permute.xlu1 %519 }
 0x25a   : > { %v518_v49 = vpop.permute.xlu0 %517  ;;  %581 = vst.msk [vmem:[#allocation2 + $0xf8] sm:$0xff] %vm551_vm7, %v520_v17 }
 0x25b   : > { %580 = vst.msk [vmem:[#allocation2 + $0xf0] sm:$0xff] %vm551_vm7, %v518_v49  ;;  %vm2251_vm7 = vcmask 326912  }
 0x25d   : > { %v1397_v55 = vpop.permute.xlu1 %1396 }
 0x25e   : > { %v1395_v58 = vpop.permute.xlu0 %1394  ;;  %1459 = vst.msk [vmem:[#allocation2 + $0xe7] sm:$0xff] %vm1430_vm15, %v1397_v55  ;;  %vm3360_vm15 = vcmask 261312  }
 0x25f   : > { %1458 = vst.msk [vmem:[#allocation2 + $0xdf] sm:$0xfe] %vm1428_vm3, %v1395_v58  ;;  %vm3618_vm3 = vcmask 392512  }
 0x261   : > { %v641_v57 = vpop.permute.xlu1 %640 }
 0x262   : > { %v639_v53 = vpop.permute.xlu0 %638  ;;  %703 = vst.msk [vmem:[#allocation2 + $0xf7] sm:$0xff] %vm674_vm10, %v641_v57  ;;  %vm2343_vm10 = vcmask 523712  }
 0x263   : > { %702 = vst.msk [vmem:[#allocation2 + $0xef] sm:$0xfe] %vm672_vm11, %v639_v53  ;;  %vm2372_vm11 = vcmask 589313  }
 0x265   : > { %v769_v32 = vpop.permute.xlu1 %768  ;;  %v1489_v34 = vld [vmem:[#allocation2 + $0xe8] sm:$0xff] }
 0x266   : > { %v767_v37 = vpop.permute.xlu0 %766  ;;  %v1488_v56 = vld [vmem:[#allocation2 + $0xe0] sm:$0xff]  ;;  %835 = vst.msk [vmem:[#allocation2 + $0xf9] sm:$0x7f] %vm804_vm6, %v769_v32  ;;  %vm2218_vm6 = vcmask 260288  }
 0x267   : > { %834 = vst.msk [vmem:[#allocation2 + $0xf1] sm:$0xff] %vm802_vm4, %v767_v37  ;;  %4896 = vmatprep.mubr.msk.f32.mxu0 %vm365_vm0, %v1488_v56  ;;  %v4877_v17 = vpop.f32.mrb[14].mxu0  ;;  %vm2156_vm4 = vcmask 130112  }
 0x268   : > { %4897 = vmatmul.mubr.msk.f32.gmra.mrb[28].mxu0 %vm365_vm0, %v1489_v34  ;;  %v6462_v49 = vadd.f32 %v4877_v17, %v6286_v46  ;;  %v1740_v55 = vpop.f32.mrb[15].mxu0 }
 0x269   : > { %v6465_v58 = vadd.f32 %v6286_v46, %v1740_v55  ;;  %v899_v57 = vpop.permute.xlu1 %898 }
 0x26a   : > { %v897_v53 = vpop.permute.xlu0 %896  ;;  %v8157_v28 = vmax.f32 %v6462_v49, 0.0  ;;  %964 = vst.msk [vmem:[#allocation2 + $0xf8] sm:$0xff] %vm932_vm5, %v899_v57 }
 0x26b   : > { %963 = vst.msk [vmem:[#allocation2 + $0xf0] sm:$0xff] %vm932_vm5, %v897_v53  ;;  %v8156_v32 = vmax.f32 %v6465_v58, 0.0  ;;  %vm2185_vm5 = vcmask 195713  }
 0x26d   : > { %v5257_v34 = vpack.i.bf16 %v8157_v28, %v8156_v32  ;;  %v1028_v37 = vpop.permute.xlu1 %1027 }
 0x26e   : > { %v1026_v56 = vpop.permute.xlu0 %1025  ;;  %1094 = vst.msk [vmem:[#allocation2 + $0xf7] sm:$0xff] %vm1063_vm8, %v1028_v37  ;;  %vm2284_vm8 = vcmask 392513  }
 0x26f   : > { %1093 = vst.msk [vmem:[#allocation2 + $0xef] sm:$0xfe] %vm1061_vm9, %v1026_v56  ;;  %5258 = vrot.lane.b32.xlu1 %v5257_v34, %s5281_s17  ;;  %vm2314_vm9 = vcmask 457088  }
 0x275   : > { %v1491_v55 = vld [vmem:[#allocation2 + $0xf8] sm:$0xff] }
 0x276   : > { %v1490_v17 = vld [vmem:[#allocation2 + $0xf0] sm:$0xff] }
 0x277   : > { %4899 = vmatprep.mubr.msk.f32.mxu0 %vm365_vm0, %v1490_v17 }
 0x278   : > { %4900 = vmatmul.mubr.msk.f32.gmra.mrb[30].mxu0 %vm365_vm0, %v1491_v55  ;;  %vm2110_vm0 = vcmask 588800  }
 0x287   : > { %v4880_v57 = vpop.f32.mrb[16].mxu0 }
 0x288   : > { %v6481_v53 = vadd.f32 %v4880_v57, %v6286_v46  ;;  %v1750_v33 = vpop.f32.mrb[17].mxu0 }
 0x289   : > { %v6484_v32 = vadd.f32 %v6286_v46, %v1750_v33 }
 0x28a   : > { %v8161_v37 = vmax.f32 %v6481_v53, 0.0 }
 0x28b   : > { %v8160_v56 = vmax.f32 %v6484_v32, 0.0 }
 0x28d   : > { %v5182_v34 = vpack.i.bf16 %v8161_v37, %v8160_v56 }
 0x28f   : > { %5183 = vrot.lane.b32.xlu0 %v5182_v34, %s5281_s17 }
 0x2a7   : > { %v4883_v17 = vpop.f32.mrb[18].mxu0 }
 0x2a8   : > { %v6494_v55 = vadd.f32 %v4883_v17, %v6286_v46  ;;  %v1760_v57 = vpop.f32.mrb[19].mxu0 }
 0x2a9   : > { %v6497_v28 = vadd.f32 %v6286_v46, %v1760_v57 }
 0x2aa   : > { %v8165_v33 = vmax.f32 %v6494_v55, 0.0 }
 0x2ab   : > { %v8164_v18 = vmax.f32 %v6497_v28, 0.0 }
 0x2ad   : > { %v5192_v35 = vpack.i.bf16 %v8165_v33, %v8164_v18 }
 0x2af   : > { %5193 = vrot.lane.b32.xlu0 %v5192_v35, %s5281_s17 }
 0x2c7   : > { %v4886_v34 = vpop.f32.mrb[20].mxu0 }
 0x2c8   : > { %v6507_v56 = vadd.f32 %v4886_v34, %v6286_v46  ;;  %v1770_v17 = vpop.f32.mrb[21].mxu0 }
 0x2c9   : > { %v6510_v37 = vadd.f32 %v6286_v46, %v1770_v17 }
 0x2ca   : > { %v8169_v57 = vmax.f32 %v6507_v56, 0.0 }
 0x2cb   : > { %v8168_v59 = vmax.f32 %v6510_v37, 0.0 }
 0x2cd   : > { %v5202_v52 = vpack.i.bf16 %v8169_v57, %v8168_v59 }
 0x2cf   : > { %5203 = vrot.lane.b32.xlu0 %v5202_v52, %s5281_s17  ;;  %v5189_v52 = vpop.permute.xlu1 %5188 }
 0x2d0   : > { %v5191_v57 = vunpack.i.h.bf16 %v5189_v52 }
 0x2e7   : > { %v4889_v35 = vpop.f32.mrb[22].mxu0 }
 0x2e8   : > { %v6520_v18 = vadd.f32 %v4889_v35, %v6286_v46  ;;  %v1780_v34 = vpop.f32.mrb[23].mxu0  ;;  %v5190_v35 = vunpack.i.l.bf16 %v5189_v52 }
 0x2e9   : > { %v6523_v33 = vadd.f32 %v6286_v46, %v1780_v34 }
 0x2ea   : > { %v8179_v17 = vmax.f32 %v6520_v18, 0.0  ;;  %v5072_v34 = vpack.c.bf16 %v5191_v57, %v5190_v35 }
 0x2eb   : > { %v8178_v54 = vmax.f32 %v6523_v33, 0.0 }
 0x2ed   : > { %v5212_v25 = vpack.i.bf16 %v8179_v17, %v8178_v54 }
 0x2ef   : > { %5213 = vrot.lane.b32.xlu0 %v5212_v25, %s5281_s17 }
 0x301   : > { %v5184_v59 = vpop.permute.xlu0 %5183 }
 0x302   : > { %v5186_v0 = vunpack.i.h.bf16 %v5184_v59  ;;  %v5185_v1 = vunpack.i.l.bf16 %v5184_v59 }
 0x304   : > { %v5070_v2 = vpack.c.bf16 %v5186_v0, %v5185_v1  ;;  %v5199_v1 = vpop.permute.xlu1 %5198 }
 0x306   : > { %5071 = vmatprep.subr.bf16.mxu1 %v5070_v2  ;;  %v5201_v2 = vunpack.i.h.bf16 %v5199_v1 }
 0x307   : > { %v4892_v16 = vpop.f32.mrb[24].mxu0  ;;  %5073 = vmatpush3.bf16.msra.mxu1 %v5072_v34 }
 0x308   : > { %v6533_v15 = vadd.f32 %v4892_v16, %v6286_v46  ;;  %v1790_v41 = vpop.f32.mrb[25].mxu0  ;;  %v5200_v16 = vunpack.i.l.bf16 %v5199_v1 }
 0x309   : > { %v6536_v38 = vadd.f32 %v6286_v46, %v1790_v41 }
 0x30a   : > { %v8185_v25 = vmax.f32 %v6533_v15, 0.0  ;;  %v5076_v41 = vpack.c.bf16 %v5201_v2, %v5200_v16 }
 0x30b   : > { %v8182_v54 = vmax.f32 %v6536_v38, 0.0 }
 0x30d   : > { %v5222_v0 = vpack.i.bf16 %v8185_v25, %v8182_v54 }
 0x30f   : > { %5223 = vrot.lane.b32.xlu0 %v5222_v0, %s5281_s17 }
 0x321   : > { %v5194_v59 = vpop.permute.xlu0 %5193 }
 0x322   : > { %v5196_v57 = vunpack.i.h.bf16 %v5194_v59  ;;  %v5195_v52 = vunpack.i.l.bf16 %v5194_v59 }
 0x324   : > { %v5074_v35 = vpack.c.bf16 %v5196_v57, %v5195_v52  ;;  %v5209_v52 = vpop.permute.xlu1 %5208 }
 0x326   : > { %5075 = vmatprep.subr.bf16.mxu1 %v5074_v35 }
 0x327   : > { %v4895_v34 = vpop.f32.mrb[26].mxu0  ;;  %5077 = vmatpush3.bf16.msra.mxu1 %v5076_v41 }
 0x328   : > { %v6546_v17 = vadd.f32 %v4895_v34, %v6286_v46  ;;  %v1800_v62 = vpop.f32.mrb[27].mxu0  ;;  %v5211_v34 = vunpack.i.h.bf16 %v5209_v52 }
 0x329   : > { %v6549_v61 = vadd.f32 %v6286_v46, %v1800_v62 }
 0x32a   : > { %v8184_v0 = vmax.f32 %v6546_v17, 0.0 }
 0x32b   : > { %v8183_v54 = vmax.f32 %v6549_v61, 0.0 }
 0x32d   : > { %v5232_v1 = vpack.i.bf16 %v8184_v0, %v8183_v54 }
 0x32f   : > { %5233 = vrot.lane.b32.xlu0 %v5232_v1, %s5281_s17  ;;  %v5210_v1 = vunpack.i.l.bf16 %v5209_v52 }
 0x33b   : > { %v4898_v2 = vpop.f32.mrb[28].mxu0 }
 0x33c   : > { %v6559_v16 = vadd.f32 %v4898_v2, %v6286_v46  ;;  %v1810_v59 = vpop.f32.mrb[29].mxu0 }
 0x33d   : > { %v6562_v57 = vadd.f32 %v6286_v46, %v1810_v59  ;;  %v5080_v59 = vpack.c.bf16 %v5211_v34, %v5210_v1 }
 0x33e   : > { %v8190_v62 = vmax.f32 %v6559_v16, 0.0 }
 0x33f   : > { %v8189_v35 = vmax.f32 %v6562_v57, 0.0 }
 0x341   : > { %v5242_v41 = vpack.i.bf16 %v8190_v62, %v8189_v35  ;;  %v5204_v54 = vpop.permute.xlu0 %5203 }
 0x342   : > { %v5206_v0 = vunpack.i.h.bf16 %v5204_v54  ;;  %v5205_v2 = vunpack.i.l.bf16 %v5204_v54 }
 0x343   : > { %5243 = vrot.lane.b32.xlu0 %v5242_v41, %s5281_s17  ;;  %v5219_v41 = vpop.permute.xlu1 %5218 }
 0x344   : > { %v5078_v25 = vpack.c.bf16 %v5206_v0, %v5205_v2  ;;  %v5221_v34 = vunpack.i.h.bf16 %v5219_v41 }
 0x346   : > { %5079 = vmatprep.subr.bf16.mxu1 %v5078_v25 }
 0x347   : > { %5081 = vmatpush3.bf16.msra.mxu1 %v5080_v59 }
 0x34b   : > { %v4901_v40 = vpop.f32.mrb[30].mxu0 }
 0x34c   : > { %v6575_v14 = vadd.f32 %v4901_v40, %v6286_v46  ;;  %v1820_v35 = vpop.f32.mrb[31].mxu0  ;;  %v5220_v40 = vunpack.i.l.bf16 %v5219_v41 }
 0x34d   : > { %v6578_v52 = vadd.f32 %v6286_v46, %v1820_v35  ;;  %v5229_v35 = vpop.permute.xlu1 %5228 }
 0x34e   : > { %v8197_v54 = vmax.f32 %v6575_v14, 0.0  ;;  %v5084_v46 = vpack.c.bf16 %v5221_v34, %v5220_v40  ;;  %v5231_v62 = vunpack.i.h.bf16 %v5229_v35  ;;  %v5230_v13 = vunpack.i.l.bf16 %v5229_v35 }
 0x34f   : > { %v8196_v0 = vmax.f32 %v6578_v52, 0.0 }
 0x351   : > { %v5252_v25 = vpack.i.bf16 %v8197_v54, %v8196_v0  ;;  %v5088_v0 = vpack.c.bf16 %v5231_v62, %v5230_v13 }
 0x353   : > { %5253 = vrot.lane.b32.xlu0 %v5252_v25, %s5281_s17  ;;  %v5239_v25 = vpop.permute.xlu1 %5238 }
 0x354   : > { %v5241_v54 = vunpack.i.h.bf16 %v5239_v25  ;;  %v5240_v41 = vunpack.i.l.bf16 %v5239_v25 }
 0x356   : > { %v5092_v34 = vpack.c.bf16 %v5241_v54, %v5240_v41  ;;  %v1861_v41 = vld [vmem:[%s8141_s3] sm:$0xff] }
 0x357   : > { %v5249_v40 = vpop.permute.xlu1 %5248 }
 0x361   : > { %v5214_v1 = vpop.permute.xlu0 %5213 }
 0x362   : > { %v5216_v2 = vunpack.i.h.bf16 %v5214_v1  ;;  %v5215_v39 = vunpack.i.l.bf16 %v5214_v1 }
 0x364   : > { %v5082_v59 = vpack.c.bf16 %v5216_v2, %v5215_v39  ;;  %v5251_v39 = vunpack.i.h.bf16 %v5249_v40 }
 0x366   : > { %5083 = vmatprep.subr.bf16.mxu1 %v5082_v59  ;;  %v5250_v59 = vunpack.i.l.bf16 %v5249_v40  ;;  %v1865_v40 = vld [vmem:[%s8141_s3 + $0x20] sm:$0xff] }
 0x367   : > { %5085 = vmatpush3.bf16.msra.mxu1 %v5084_v46 }
 0x381   : > { %v5224_v45 = vpop.permute.xlu0 %5223 }
 0x382   : > { %v5226_v44 = vunpack.i.h.bf16 %v5224_v45  ;;  %v5225_v27 = vunpack.i.l.bf16 %v5224_v45 }
 0x384   : > { %v5086_v26 = vpack.c.bf16 %v5226_v44, %v5225_v27  ;;  %v5096_v44 = vpack.c.bf16 %v5251_v39, %v5250_v59  ;;  %v1868_v39 = vld [vmem:[%s8141_s3 + $0x38] sm:$0xff]  ;;  %v1867_v59 = vld [vmem:[%s8141_s3 + $0x30] sm:$0xff] }
 0x386   : > { %5087 = vmatprep.subr.bf16.mxu1 %v5086_v26  ;;  %v5259_v26 = vpop.permute.xlu1 %5258 }
 0x387   : > { %5089 = vmatpush3.bf16.msra.mxu1 %v5088_v0  ;;  %v5261_v13 = vunpack.i.h.bf16 %v5259_v26  ;;  %v5260_v62 = vunpack.i.l.bf16 %v5259_v26  ;;  %v1873_v26 = vld [vmem:[%s8141_s3 + $0x60] sm:$0xff] }
 0x389   : > { %v5100_v54 = vpack.c.bf16 %v5261_v13, %v5260_v62  ;;  %v1876_v13 = vld [vmem:[%s8141_s3 + $0x78] sm:$0xff]  ;;  %v1875_v62 = vld [vmem:[%s8141_s3 + $0x70] sm:$0xff] }
 0x3a1   : > { %v5234_v23 = vpop.permute.xlu0 %5233 }
 0x3a2   : > { %v5236_v22 = vunpack.i.h.bf16 %v5234_v23  ;;  %v5235_v1 = vunpack.i.l.bf16 %v5234_v23 }
 0x3a4   : > { %v5090_v2 = vpack.c.bf16 %v5236_v22, %v5235_v1  ;;  %v1864_v1 = vld [vmem:[%s8141_s3 + $0x18] sm:$0xff] }
 0x3a6   : > { %5091 = vmatprep.subr.bf16.mxu1 %v5090_v2  ;;  %v1863_v2 = vld [vmem:[%s8141_s3 + $0x10] sm:$0xff] }
 0x3a7   : > { %5093 = vmatpush3.bf16.msra.mxu1 %v5092_v34  ;;  %v1866_v34 = vld [vmem:[%s8141_s3 + $0x28] sm:$0xff] }
 0x3b5   : > { %v5244_v46 = vpop.permute.xlu0 %5243 }
 0x3b6   : > { %v5246_v35 = vunpack.i.h.bf16 %v5244_v46  ;;  %v5245_v45 = vunpack.i.l.bf16 %v5244_v46  ;;  %v1870_v46 = vld [vmem:[%s8141_s3 + $0x48] sm:$0xff] }
 0x3b8   : > { %v5094_v27 = vpack.c.bf16 %v5246_v35, %v5245_v45  ;;  %v1869_v35 = vld [vmem:[%s8141_s3 + $0x40] sm:$0xff]  ;;  %v1872_v45 = vld [vmem:[%s8141_s3 + $0x58] sm:$0xff] }
 0x3ba   : > { %5095 = vmatprep.subr.bf16.mxu1 %v5094_v27  ;;  %v1871_v27 = vld [vmem:[%s8141_s3 + $0x50] sm:$0xff] }
 0x3bb   : > { %5097 = vmatpush3.bf16.msra.mxu1 %v5096_v44  ;;  %v1874_v44 = vld [vmem:[%s8141_s3 + $0x68] sm:$0xff] }
 0x3c5   : > { %v5254_v0 = vpop.permute.xlu0 %5253 }
 0x3c6   : > { %v5256_v25 = vunpack.i.h.bf16 %v5254_v0  ;;  %v5255_v23 = vunpack.i.l.bf16 %v5254_v0  ;;  %v8219_v0 = vmov 0.0  }
 0x3c7   : > { %2112 = vst.msk [vmem:[#allocation3 + $0x8] sm:$0xff] %vm2110_vm0, %v8219_v0  ;;  %2111 = vst.msk [vmem:[#allocation3] sm:$0xff] %vm2110_vm0, %v8219_v0 }
 0x3c8   : > { %v5098_v22 = vpack.c.bf16 %v5256_v25, %v5255_v23  ;;  %2113 = vst.msk [vmem:[#allocation3 + $0x10] sm:$0xff] %vm2110_vm0, %v8219_v0  ;;  %2114 = vst.msk [vmem:[#allocation3 + $0x18] sm:$0xff] %vm2110_vm0, %v8219_v0 }
 0x3c9   : > { %2115 = vst.msk [vmem:[#allocation3 + $0x20] sm:$0xff] %vm2110_vm0, %v8219_v0  ;;  %2116 = vst.msk [vmem:[#allocation3 + $0x28] sm:$0xff] %vm2110_vm0, %v8219_v0 }
 0x3ca   : > { %5099 = vmatprep.subr.bf16.mxu1 %v5098_v22  ;;  %2117 = vst.msk [vmem:[#allocation3 + $0x30] sm:$0xff] %vm2110_vm0, %v8219_v0  ;;  %2118 = vst.msk [vmem:[#allocation3 + $0x38] sm:$0xff] %vm2110_vm0, %v8219_v0 }
 0x3cb   : > { %5101 = vmatpush3.bf16.msra.mxu1 %v5100_v54  ;;  %2927 = vst.msk [vmem:[#allocation4] sm:$0xff] %vm2110_vm0, %v8219_v0  ;;  %2928 = vst.msk [vmem:[#allocation4 + $0x8] sm:$0xff] %vm2110_vm0, %v8219_v0 }
 0x3cc   : > { %2929 = vst.msk [vmem:[#allocation4 + $0x10] sm:$0xff] %vm2110_vm0, %v8219_v0  ;;  %2930 = vst.msk [vmem:[#allocation4 + $0x18] sm:$0xff] %vm2110_vm0, %v8219_v0 }
 0x3cd   : > { %2931 = vst.msk [vmem:[#allocation4 + $0x20] sm:$0xff] %vm2110_vm0, %v8219_v0  ;;  %2932 = vst.msk [vmem:[#allocation4 + $0x28] sm:$0xff] %vm2110_vm0, %v8219_v0 }
 0x3ce   : > { %2070 = vmatmul.mubr.f32.vlgmr.msra.gmra.mrb[0].mxu1 %v1861_v41  ;;  %2933 = vst.msk [vmem:[#allocation4 + $0x30] sm:$0xff] %vm2110_vm0, %v8219_v0  ;;  %2934 = vst.msk [vmem:[#allocation4 + $0x38] sm:$0xff] %vm2110_vm0, %v8219_v0 }
 0x3cf   : > { %2074 = vmatprep.mubr.f32.mxu1 %v1864_v1  ;;  %2935 = vst.msk [vmem:[#allocation4 + $0x40] sm:$0xff] %vm2110_vm0, %v8219_v0  ;;  %2936 = vst.msk [vmem:[#allocation4 + $0x48] sm:$0xff] %vm2110_vm0, %v8219_v0 }
 0x3d0   : > { %2937 = vst.msk [vmem:[#allocation4 + $0x50] sm:$0xff] %vm2110_vm0, %v8219_v0  ;;  %2938 = vst.msk [vmem:[#allocation4 + $0x58] sm:$0xff] %vm2110_vm0, %v8219_v0 }
 0x3d1   : > { %2939 = vst.msk [vmem:[#allocation4 + $0x60] sm:$0xff] %vm2110_vm0, %v8219_v0  ;;  %2940 = vst.msk [vmem:[#allocation4 + $0x68] sm:$0xff] %vm2110_vm0, %v8219_v0 }
 0x3d2   : > { %2075 = vmatmul.mubr.f32.gmra.mrb[2].mxu1 %v1863_v2  ;;  %2941 = vst.msk [vmem:[#allocation4 + $0x70] sm:$0xff] %vm2110_vm0, %v8219_v0  ;;  %2942 = vst.msk [vmem:[#allocation4 + $0x78] sm:$0xff] %vm2110_vm0, %v8219_v0 }
 0x3d3   : > { %2079 = vmatprep.mubr.f32.mxu1 %v1866_v34  ;;  %2943 = vst.msk [vmem:[#allocation4 + $0x80] sm:$0xff] %vm2110_vm0, %v8219_v0  ;;  %2944 = vst.msk [vmem:[#allocation4 + $0x88] sm:$0xff] %vm2110_vm0, %v8219_v0 }
 0x3d4   : > { %2945 = vst.msk [vmem:[#allocation4 + $0x90] sm:$0xff] %vm2110_vm0, %v8219_v0  ;;  %2946 = vst.msk [vmem:[#allocation4 + $0x98] sm:$0xff] %vm2110_vm0, %v8219_v0 }
 0x3d5   : > { %2947 = vst.msk [vmem:[#allocation4 + $0xa0] sm:$0xff] %vm2110_vm0, %v8219_v0  ;;  %2948 = vst.msk [vmem:[#allocation4 + $0xa8] sm:$0xff] %vm2110_vm0, %v8219_v0 }
 0x3d6   : > { %2080 = vmatmul.mubr.f32.gmra.mrb[4].mxu1 %v1865_v40  ;;  %2949 = vst.msk [vmem:[#allocation4 + $0xb0] sm:$0xff] %vm2110_vm0, %v8219_v0  ;;  %2950 = vst.msk [vmem:[#allocation4 + $0xb8] sm:$0xff] %vm2110_vm0, %v8219_v0 }
 0x3d7   : > { %2084 = vmatprep.mubr.f32.mxu1 %v1868_v39  ;;  %2951 = vst.msk [vmem:[#allocation4 + $0xc0] sm:$0xff] %vm2110_vm0, %v8219_v0  ;;  %2952 = vst.msk [vmem:[#allocation4 + $0xc8] sm:$0xff] %vm2110_vm0, %v8219_v0 }
 0x3d8   : > { %2953 = vst.msk [vmem:[#allocation4 + $0xd0] sm:$0xff] %vm2110_vm0, %v8219_v0  ;;  %2954 = vst.msk [vmem:[#allocation4 + $0xd8] sm:$0xff] %vm2110_vm0, %v8219_v0 }
 0x3d9   : > { %2955 = vst.msk [vmem:[#allocation4 + $0xe0] sm:$0xff] %vm2110_vm0, %v8219_v0  ;;  %2956 = vst.msk [vmem:[#allocation4 + $0xe8] sm:$0xff] %vm2110_vm0, %v8219_v0 }
 0x3da   : > { %2085 = vmatmul.mubr.f32.gmra.mrb[6].mxu1 %v1867_v59  ;;  %2957 = vst.msk [vmem:[#allocation4 + $0xf0] sm:$0xff] %vm2110_vm0, %v8219_v0  ;;  %2958 = vst.msk [vmem:[#allocation4 + $0xf8] sm:$0xff] %vm2110_vm0, %v8219_v0 }
 0x3db   : > { %2089 = vmatprep.mubr.f32.mxu1 %v1870_v46 }
 0x3de   : > { %2090 = vmatmul.mubr.f32.gmra.mrb[8].mxu1 %v1869_v35 }
 0x3df   : > { %2094 = vmatprep.mubr.f32.mxu1 %v1872_v45 }
 0x3e2   : > { %2095 = vmatmul.mubr.f32.gmra.mrb[10].mxu1 %v1871_v27 }
 0x3e3   : > { %2099 = vmatprep.mubr.f32.mxu1 %v1874_v44  ;;  %v2388_v44 = vld [vmem:[%s8142_s4] sm:$0xff] }
 0x3e6   : > { %2100 = vmatmul.mubr.f32.gmra.mrb[12].mxu1 %v1873_v26  ;;  %v2389_v26 = vld [vmem:[%s8142_s4 + $0x8] sm:$0xff] }
 0x3e7   : > { %2104 = vmatprep.mubr.f32.mxu1 %v1876_v13 }
 0x3ea   : > { %2105 = vmatmul.mubr.f32.gmra.mrb[14].mxu1 %v1875_v62  ;;  %v5102_v62 = vpack.c.bf16 %v2389_v26, %v2388_v44 }
 0x3ec   : > { %5103 = vmatprep.subr.bf16.mxu1 %v5102_v62 }
 0x3ed   : > { %5105 = vmatpush3.bf16.msra.mxu1 %v5102_v62  ;;  %v2395_v62 = vld [vmem:[%s8142_s4 + $0x38] sm:$0xff] }
 0x4a1   : > { %v4722_v25 = vpop.f32.mrb[0].mxu1 }
 0x4a2   : > { %v4723_v23 = vpop.f32.mrb[1].mxu1 }
 0x4a3   : > { %v4724_v22 = vadd.f32 %v4723_v23, %v4722_v25  ;;  %v2390_v23 = vld [vmem:[%s8142_s4 + $0x10] sm:$0xff] }
 0x4a5   : > { %2164 = vrot.lane.b32.xlu1 %v4724_v22, %s5273_s16  ;;  %2135 = vrot.lane.b32.xlu0 %v4724_v22, %s5277_s20  ;;  %v4725_v54 = vpop.f32.mrb[2].mxu1  ;;  %2121 = vst.msk [vmem:[#allocation3 + $0x9] sm:$0x7f] %vm2120_vm2, %v4724_v22 }
 0x4a6   : > { %v4726_v41 = vpop.f32.mrb[3].mxu1 }
 0x4a7   : > { %v4727_v1 = vadd.f32 %v4726_v41, %v4725_v54 }
 0x4a9   : > { %2260 = vrot.lane.b32.xlu1 %v4724_v22, %s5282_s29  ;;  %2194 = vrot.lane.b32.xlu0 %v4724_v22, %s5278_s23  ;;  %v4728_v2 = vpop.f32.mrb[4].mxu1  ;;  %2122 = vst.msk [vmem:[#allocation3 + $0x11] sm:$0x7f] %vm2120_vm2, %v4727_v1 }
 0x4aa   : > { %v4729_v34 = vpop.f32.mrb[5].mxu1 }
 0x4ab   : > { %v4730_v40 = vadd.f32 %v4729_v34, %v4728_v2 }
 0x4ad   : > { %2196 = vrot.lane.b32.xlu1 %v4727_v1, %s5278_s23  ;;  %2227 = vrot.lane.b32.xlu0 %v4724_v22, %s5280_s21  ;;  %v4731_v39 = vpop.f32.mrb[6].mxu1  ;;  %2123 = vst.msk [vmem:[#allocation3 + $0x19] sm:$0x7f] %vm2120_vm2, %v4730_v40  ;;  %v2391_v22 = vld [vmem:[%s8142_s4 + $0x18] sm:$0xff] }
 0x4ae   : > { %v4732_v59 = vpop.f32.mrb[7].mxu1  ;;  %v5106_v41 = vpack.c.bf16 %v2391_v22, %v2390_v23  ;;  %v2396_v23 = vld [vmem:[%s8142_s4 + $0x40] sm:$0xff] }
 0x4af   : > { %v6721_v46 = vadd.f32 %v4732_v59, %v4731_v39  ;;  %v2392_v39 = vld [vmem:[%s8142_s4 + $0x20] sm:$0xff]  ;;  %v2393_v59 = vld [vmem:[%s8142_s4 + $0x28] sm:$0xff] }
 0x4b0   : > { %5107 = vmatprep.subr.bf16.mxu1 %v5106_v41 }
 0x4b1   : > { %2137 = vrot.lane.b32.xlu1 %v4727_v1, %s5277_s20  ;;  %2229 = vrot.lane.b32.xlu0 %v4727_v1, %s5280_s21  ;;  %v4734_v35 = vpop.f32.mrb[8].mxu1  ;;  %2124 = vst.msk [vmem:[#allocation3 + $0x21] sm:$0x7f] %vm2120_vm2, %v6721_v46 }
 0x4b2   : > { %v4735_v45 = vpop.f32.mrb[9].mxu1  ;;  %5109 = vmatpush3.bf16.msra.mxu1 %v5106_v41 }
 0x4b3   : > { %v6727_v27 = vadd.f32 %v4735_v45, %v4734_v35  ;;  %v5110_v45 = vpack.c.bf16 %v2393_v59, %v2392_v39 }
 0x4b5   : > { %2166 = vrot.lane.b32.xlu1 %v4727_v1, %s5273_s16  ;;  %2262 = vrot.lane.b32.xlu0 %v4727_v1, %s5282_s29  ;;  %v4737_v13 = vpop.f32.mrb[10].mxu1  ;;  %2125 = vst.msk [vmem:[#allocation3 + $0x29] sm:$0x7f] %vm2120_vm2, %v6727_v27 }
 0x4b6   : > { %v4738_v0 = vpop.f32.mrb[11].mxu1  ;;  %5111 = vmatprep.subr.bf16.mxu1 %v5110_v45 }
 0x4b7   : > { %v6739_v25 = vadd.f32 %v4738_v0, %v4737_v13  ;;  %5113 = vmatpush3.bf16.msra.mxu1 %v5110_v45  ;;  %v2394_v13 = vld [vmem:[%s8142_s4 + $0x30] sm:$0xff] }
 0x4b8   : > { %v5114_v0 = vpack.c.bf16 %v2395_v62, %v2394_v13 }
 0x4b9   : > { %2293 = vrot.lane.b32.xlu1 %v4727_v1, %s5283_s25  ;;  %2139 = vrot.lane.b32.xlu0 %v4730_v40, %s5277_s20  ;;  %v4740_v54 = vpop.f32.mrb[12].mxu1  ;;  %2126 = vst.msk [vmem:[#allocation3 + $0x31] sm:$0x7f] %vm2120_vm2, %v6739_v25 }
 0x4ba   : > { %v4741_v2 = vpop.f32.mrb[13].mxu1  ;;  %5115 = vmatprep.subr.bf16.mxu1 %v5114_v0 }
 0x4bb   : > { %v4742_v34 = vadd.f32 %v4741_v2, %v4740_v54  ;;  %5117 = vmatpush3.bf16.msra.mxu1 %v5114_v0 }
 0x4bc   : > { %4918 = vmatprep.subr.mxu1 %v2396_v23 }
 0x4bd   : > { %2322 = vrot.lane.b32.xlu1 %v4727_v1, %s5284_s13  ;;  %2168 = vrot.lane.b32.xlu0 %v4730_v40, %s5273_s16  ;;  %v4743_v35 = vpop.f32.mrb[14].mxu1  ;;  %2127 = vst.msk [vmem:[#allocation3 + $0x39] sm:$0x7f] %vm2120_vm2, %v4742_v34 }
 0x4be   : > { %v4744_v44 = vpop.f32.mrb[15].mxu1 }
 0x4bf   : > { %v4745_v26 = vadd.f32 %v4744_v44, %v4743_v35  ;;  %4919 = vmatpush3.msra.mxu1 %v2396_v23 }
 0x4c1   : > { %2351 = vrot.lane.b32.xlu1 %v4727_v1, %s5285_s19  ;;  %2295 = vrot.lane.b32.xlu0 %v4730_v40, %s5283_s25 }
 0x4c5   : > { %2198 = vrot.lane.b32.xlu1 %v4730_v40, %s5278_s23  ;;  %2324 = vrot.lane.b32.xlu0 %v4730_v40, %s5284_s13 }
 0x4c9   : > { %2231 = vrot.lane.b32.xlu1 %v4730_v40, %s5280_s21  ;;  %2264 = vrot.lane.b32.xlu0 %v4730_v40, %s5282_s29 }
 0x4cd   : > { %2353 = vrot.lane.b32.xlu1 %v4730_v40, %s5285_s19  ;;  %2200 = vrot.lane.b32.xlu0 %v6721_v46, %s5278_s23 }
 0x4d1   : > { %2233 = vrot.lane.b32.xlu1 %v6721_v46, %s5280_s21  ;;  %2141 = vrot.lane.b32.xlu0 %v6721_v46, %s5277_s20 }
 0x4d5   : > { %2170 = vrot.lane.b32.xlu1 %v6721_v46, %s5273_s16  ;;  %2266 = vrot.lane.b32.xlu0 %v6721_v46, %s5282_s29 }
 0x4d9   : > { %2297 = vrot.lane.b32.xlu1 %v6721_v46, %s5283_s25  ;;  %2143 = vrot.lane.b32.xlu0 %v6727_v27, %s5277_s20 }
 0x4dd   : > { %2326 = vrot.lane.b32.xlu1 %v6721_v46, %s5284_s13  ;;  %2172 = vrot.lane.b32.xlu0 %v6727_v27, %s5273_s16 }
 0x4e1   : > { %2355 = vrot.lane.b32.xlu1 %v6721_v46, %s5285_s19  ;;  %2299 = vrot.lane.b32.xlu0 %v6727_v27, %s5283_s25 }
 0x4e5   : > { %2202 = vrot.lane.b32.xlu1 %v6727_v27, %s5278_s23  ;;  %2328 = vrot.lane.b32.xlu0 %v6727_v27, %s5284_s13 }
 0x4e9   : > { %2235 = vrot.lane.b32.xlu1 %v6727_v27, %s5280_s21  ;;  %2268 = vrot.lane.b32.xlu0 %v6727_v27, %s5282_s29 }
 0x4ed   : > { %2357 = vrot.lane.b32.xlu1 %v6727_v27, %s5285_s19  ;;  %2204 = vrot.lane.b32.xlu0 %v6739_v25, %s5278_s23 }
 0x4f1   : > { %2237 = vrot.lane.b32.xlu1 %v6739_v25, %s5280_s21  ;;  %2145 = vrot.lane.b32.xlu0 %v6739_v25, %s5277_s20 }
 0x4f5   : > { %2270 = vrot.lane.b32.xlu1 %v6739_v25, %s5282_s29  ;;  %2174 = vrot.lane.b32.xlu0 %v6739_v25, %s5273_s16 }
 0x4f9   : > { %2330 = vrot.lane.b32.xlu1 %v6739_v25, %s5284_s13  ;;  %2301 = vrot.lane.b32.xlu0 %v6739_v25, %s5283_s25 }
 0x4fd   : > { %2206 = vrot.lane.b32.xlu1 %v4742_v34, %s5278_s23  ;;  %2359 = vrot.lane.b32.xlu0 %v6739_v25, %s5285_s19 }
 0x501   : > { %2332 = vrot.lane.b32.xlu1 %v4742_v34, %s5284_s13  ;;  %2303 = vrot.lane.b32.xlu0 %v4742_v34, %s5283_s25 }
 0x505   : > { %2147 = vrot.lane.b32.xlu1 %v4742_v34, %s5277_s20  ;;  %2239 = vrot.lane.b32.xlu0 %v4742_v34, %s5280_s21 }
 0x509   : > { %2361 = vrot.lane.b32.xlu1 %v4742_v34, %s5285_s19  ;;  %2272 = vrot.lane.b32.xlu0 %v4742_v34, %s5282_s29 }
 0x50d   : > { %2305 = vrot.lane.b32.xlu1 %v4745_v26, %s5283_s25  ;;  %2176 = vrot.lane.b32.xlu0 %v4742_v34, %s5273_s16 }
 0x511   : > { %2334 = vrot.lane.b32.xlu1 %v4745_v26, %s5284_s13  ;;  %2208 = vrot.lane.b32.xlu0 %v4745_v26, %s5278_s23 }
 0x515   : > { %2363 = vrot.lane.b32.xlu1 %v4745_v26, %s5285_s19  ;;  %2241 = vrot.lane.b32.xlu0 %v4745_v26, %s5280_s21 }
 0x517   : > { %v2165_v1 = vpop.permute.xlu1 %2164  ;;  %v2136_v40 = vpop.permute.xlu0 %2135 }
 0x518   : > { %2157 = vst.msk [vmem:[#allocation3 + $0x8] sm:$0xff] %vm2156_vm4, %v2136_v40 }
 0x519   : > { %2186 = vst.msk [vmem:[#allocation3 + $0x7] sm:$0xfe] %vm2185_vm5, %v2165_v1  ;;  %2274 = vrot.lane.b32.xlu0 %v4745_v26, %s5282_s29 }
 0x51b   : > { %v2261_v46 = vpop.permute.xlu1 %2260  ;;  %v2195_v27 = vpop.permute.xlu0 %2194 }
 0x51c   : > { %2219 = vst.msk [vmem:[#allocation3 + $0x1] sm:$0x7f] %vm2218_vm6, %v2195_v27 }
 0x51f   : > { %v2197_v25 = vpop.permute.xlu1 %2196  ;;  %v2228_v22 = vpop.permute.xlu0 %2227 }
 0x520   : > { %2220 = vst.msk [vmem:[#allocation3 + $0x9] sm:$0x7f] %vm2218_vm6, %v2197_v25 }
 0x521   : > { %2252 = vst.msk [vmem:[#allocation3] sm:$0xff] %vm2251_vm7, %v2228_v22 }
 0x522   : > { %2285 = vst.msk [vmem:[#allocation3 - $0x1] sm:$0xfe] %vm2284_vm8, %v2261_v46 }
 0x523   : > { %v2138_v54 = vpop.permute.xlu1 %2137  ;;  %v2230_v41 = vpop.permute.xlu0 %2229 }
 0x524   : > { %2158 = vst.msk [vmem:[#allocation3 + $0x10] sm:$0xff] %vm2156_vm4, %v2138_v54 }
 0x525   : > { %2253 = vst.msk [vmem:[#allocation3 + $0x8] sm:$0xff] %vm2251_vm7, %v2230_v41 }
 0x527   : > { %v2167_v2 = vpop.permute.xlu1 %2166  ;;  %v2263_v34 = vpop.permute.xlu0 %2262 }
 0x528   : > { %2187 = vst.msk [vmem:[#allocation3 + $0xf] sm:$0xfe] %vm2185_vm5, %v2167_v2 }
 0x529   : > { %2286 = vst.msk [vmem:[#allocation3 + $0x7] sm:$0xfe] %vm2284_vm8, %v2263_v34 }
 0x52b   : > { %v2294_v39 = vpop.permute.xlu1 %2293  ;;  %v2140_v59 = vpop.permute.xlu0 %2139 }
 0x52c   : > { %2315 = vst.msk [vmem:[#allocation3 + $0x1] sm:$0x7f] %vm2314_vm9, %v2294_v39 }
 0x52d   : > { %2159 = vst.msk [vmem:[#allocation3 + $0x18] sm:$0xff] %vm2156_vm4, %v2140_v59 }
 0x52f   : > { %v2323_v35 = vpop.permute.xlu1 %2322  ;;  %v2169_v45 = vpop.permute.xlu0 %2168 }
 0x530   : > { %2344 = vst.msk [vmem:[#allocation3] sm:$0xff] %vm2343_vm10, %v2323_v35 }
 0x531   : > { %2188 = vst.msk [vmem:[#allocation3 + $0x17] sm:$0xfe] %vm2185_vm5, %v2169_v45 }
 0x533   : > { %v2352_v44 = vpop.permute.xlu1 %2351  ;;  %v2296_v26 = vpop.permute.xlu0 %2295 }
 0x534   : > { %2373 = vst.msk [vmem:[#allocation3 - $0x1] sm:$0xfe] %vm2372_vm11, %v2352_v44 }
 0x535   : > { %2316 = vst.msk [vmem:[#allocation3 + $0x9] sm:$0x7f] %vm2314_vm9, %v2296_v26 }
 0x537   : > { %v2199_v13 = vpop.permute.xlu1 %2198  ;;  %v2325_v62 = vpop.permute.xlu0 %2324 }
 0x538   : > { %2221 = vst.msk [vmem:[#allocation3 + $0x11] sm:$0x7f] %vm2218_vm6, %v2199_v13 }
 0x539   : > { %2345 = vst.msk [vmem:[#allocation3 + $0x8] sm:$0xff] %vm2343_vm10, %v2325_v62 }
 0x53b   : > { %v2232_v0 = vpop.permute.xlu1 %2231  ;;  %v2265_v23 = vpop.permute.xlu0 %2264  ;;  %v2380_v1 = vld [vmem:[#allocation3] sm:$0xff] }
 0x53c   : > { %2254 = vst.msk [vmem:[#allocation3 + $0x10] sm:$0xff] %vm2251_vm7, %v2232_v0  ;;  %4920 = vmatprep.mubr.msk.f32.mxu1 %vm2110_vm0, %v2380_v1 }
 0x53d   : > { %2287 = vst.msk [vmem:[#allocation3 + $0xf] sm:$0xfe] %vm2284_vm8, %v2265_v23 }
 0x53f   : > { %v2354_v40 = vpop.permute.xlu1 %2353  ;;  %v2201_v46 = vpop.permute.xlu0 %2200 }
 0x540   : > { %2374 = vst.msk [vmem:[#allocation3 + $0x7] sm:$0xfe] %vm2372_vm11, %v2354_v40 }
 0x541   : > { %2222 = vst.msk [vmem:[#allocation3 + $0x19] sm:$0x7f] %vm2218_vm6, %v2201_v46 }
 0x543   : > { %v2234_v27 = vpop.permute.xlu1 %2233  ;;  %v2142_v25 = vpop.permute.xlu0 %2141 }
 0x544   : > { %2255 = vst.msk [vmem:[#allocation3 + $0x18] sm:$0xff] %vm2251_vm7, %v2234_v27 }
 0x545   : > { %2160 = vst.msk [vmem:[#allocation3 + $0x20] sm:$0xff] %vm2156_vm4, %v2142_v25 }
 0x547   : > { %v2171_v22 = vpop.permute.xlu1 %2170  ;;  %v2267_v54 = vpop.permute.xlu0 %2266  ;;  %v2381_v41 = vld [vmem:[#allocation3 + $0x8] sm:$0xff] }
 0x548   : > { %2189 = vst.msk [vmem:[#allocation3 + $0x1f] sm:$0xfe] %vm2185_vm5, %v2171_v22  ;;  %4921 = vmatmul.mubr.msk.f32.vlgmr.msra.gmra.mrb[16].mxu1 %vm2110_vm0, %v2381_v41 }
 0x549   : > { %2288 = vst.msk [vmem:[#allocation3 + $0x17] sm:$0xfe] %vm2284_vm8, %v2267_v54 }
 0x54b   : > { %v2298_v2 = vpop.permute.xlu1 %2297  ;;  %v2144_v34 = vpop.permute.xlu0 %2143 }
 0x54c   : > { %2317 = vst.msk [vmem:[#allocation3 + $0x11] sm:$0x7f] %vm2314_vm9, %v2298_v2 }
 0x54d   : > { %2161 = vst.msk [vmem:[#allocation3 + $0x28] sm:$0xff] %vm2156_vm4, %v2144_v34 }
 0x54f   : > { %v2327_v39 = vpop.permute.xlu1 %2326  ;;  %v2173_v59 = vpop.permute.xlu0 %2172 }
 0x550   : > { %2346 = vst.msk [vmem:[#allocation3 + $0x10] sm:$0xff] %vm2343_vm10, %v2327_v39 }
 0x551   : > { %2190 = vst.msk [vmem:[#allocation3 + $0x27] sm:$0xfe] %vm2185_vm5, %v2173_v59 }
 0x553   : > { %v2356_v35 = vpop.permute.xlu1 %2355  ;;  %v2300_v45 = vpop.permute.xlu0 %2299 }
 0x554   : > { %2375 = vst.msk [vmem:[#allocation3 + $0xf] sm:$0xfe] %vm2372_vm11, %v2356_v35 }
 0x555   : > { %2318 = vst.msk [vmem:[#allocation3 + $0x19] sm:$0x7f] %vm2314_vm9, %v2300_v45 }
 0x557   : > { %v2203_v44 = vpop.permute.xlu1 %2202  ;;  %v2329_v26 = vpop.permute.xlu0 %2328 }
 0x558   : > { %2223 = vst.msk [vmem:[#allocation3 + $0x21] sm:$0x7f] %vm2218_vm6, %v2203_v44 }
 0x559   : > { %2347 = vst.msk [vmem:[#allocation3 + $0x18] sm:$0xff] %vm2343_vm10, %v2329_v26 }
 0x55b   : > { %v2236_v13 = vpop.permute.xlu1 %2235  ;;  %v2269_v62 = vpop.permute.xlu0 %2268  ;;  %v2382_v0 = vld [vmem:[#allocation3 + $0x10] sm:$0xff] }
 0x55c   : > { %2256 = vst.msk [vmem:[#allocation3 + $0x20] sm:$0xff] %vm2251_vm7, %v2236_v13  ;;  %4923 = vmatprep.mubr.msk.f32.mxu1 %vm2110_vm0, %v2382_v0 }
 0x55d   : > { %2289 = vst.msk [vmem:[#allocation3 + $0x1f] sm:$0xfe] %vm2284_vm8, %v2269_v62 }
 0x55f   : > { %v2358_v23 = vpop.permute.xlu1 %2357  ;;  %v2205_v1 = vpop.permute.xlu0 %2204 }
 0x560   : > { %2376 = vst.msk [vmem:[#allocation3 + $0x17] sm:$0xfe] %vm2372_vm11, %v2358_v23 }
 0x561   : > { %2224 = vst.msk [vmem:[#allocation3 + $0x29] sm:$0x7f] %vm2218_vm6, %v2205_v1 }
 0x563   : > { %v2238_v40 = vpop.permute.xlu1 %2237  ;;  %v2146_v46 = vpop.permute.xlu0 %2145 }
 0x564   : > { %2257 = vst.msk [vmem:[#allocation3 + $0x28] sm:$0xff] %vm2251_vm7, %v2238_v40 }
 0x565   : > { %2162 = vst.msk [vmem:[#allocation3 + $0x30] sm:$0xff] %vm2156_vm4, %v2146_v46 }
 0x567   : > { %v2271_v27 = vpop.permute.xlu1 %2270  ;;  %v2175_v25 = vpop.permute.xlu0 %2174  ;;  %v2383_v22 = vld [vmem:[#allocation3 + $0x18] sm:$0xff] }
 0x568   : > { %2290 = vst.msk [vmem:[#allocation3 + $0x27] sm:$0xfe] %vm2284_vm8, %v2271_v27  ;;  %4924 = vmatmul.mubr.msk.f32.gmra.mrb[18].mxu1 %vm2110_vm0, %v2383_v22 }
 0x569   : > { %2191 = vst.msk [vmem:[#allocation3 + $0x2f] sm:$0xfe] %vm2185_vm5, %v2175_v25 }
 0x56b   : > { %v2331_v54 = vpop.permute.xlu1 %2330  ;;  %v2302_v41 = vpop.permute.xlu0 %2301 }
 0x56c   : > { %2319 = vst.msk [vmem:[#allocation3 + $0x21] sm:$0x7f] %vm2314_vm9, %v2302_v41  ;;  %v2541_v41 = vld [vmem:[%s8144_s6] sm:$0xff] }
 0x56d   : > { %2348 = vst.msk [vmem:[#allocation3 + $0x20] sm:$0xff] %vm2343_vm10, %v2331_v54  ;;  %4948 = vmatprep.mubr.msk.f32.mxu0 %vm2573_vm12, %v2541_v41 }
 0x56f   : > { %v2207_v2 = vpop.permute.xlu1 %2206  ;;  %v2360_v34 = vpop.permute.xlu0 %2359 }
 0x570   : > { %2225 = vst.msk [vmem:[#allocation3 + $0x31] sm:$0x7f] %vm2218_vm6, %v2207_v2  ;;  %v4575_v2 = vld [vmem:[%s8143_s5] ss:$0 sm:$0xff] }
 0x571   : > { %2377 = vst.msk [vmem:[#allocation3 + $0x1f] sm:$0xfe] %vm2372_vm11, %v2360_v34 }
 0x573   : > { %v2333_v39 = vpop.permute.xlu1 %2332  ;;  %v2304_v59 = vpop.permute.xlu0 %2303 }
 0x574   : > { %2320 = vst.msk [vmem:[#allocation3 + $0x29] sm:$0x7f] %vm2314_vm9, %v2304_v59 }
 0x575   : > { %2349 = vst.msk [vmem:[#allocation3 + $0x28] sm:$0xff] %vm2343_vm10, %v2333_v39 }
 0x577   : > { %v2148_v35 = vpop.permute.xlu1 %2147  ;;  %v2240_v45 = vpop.permute.xlu0 %2239 }
 0x578   : > { %v2384_v44 = vld [vmem:[#allocation3 + $0x20] sm:$0xff]  ;;  %2163 = vst.msk [vmem:[#allocation3 + $0x38] sm:$0xff] %vm2156_vm4, %v2148_v35 }
 0x579   : > { %2258 = vst.msk [vmem:[#allocation3 + $0x30] sm:$0xff] %vm2251_vm7, %v2240_v45  ;;  %4926 = vmatprep.mubr.msk.f32.mxu1 %vm2110_vm0, %v2384_v44 }
 0x57b   : > { %v2362_v26 = vpop.permute.xlu1 %2361  ;;  %v2273_v13 = vpop.permute.xlu0 %2272 }
 0x57c   : > { %2378 = vst.msk [vmem:[#allocation3 + $0x27] sm:$0xfe] %vm2372_vm11, %v2362_v26 }
 0x57d   : > { %2291 = vst.msk [vmem:[#allocation3 + $0x2f] sm:$0xfe] %vm2284_vm8, %v2273_v13 }
 0x57f   : > { %v2306_v62 = vpop.permute.xlu1 %2305  ;;  %v2177_v0 = vpop.permute.xlu0 %2176 }
 0x580   : > { %2321 = vst.msk [vmem:[#allocation3 + $0x31] sm:$0x7f] %vm2314_vm9, %v2306_v62 }
 0x581   : > { %2192 = vst.msk [vmem:[#allocation3 + $0x37] sm:$0xfe] %vm2185_vm5, %v2177_v0 }
 0x583   : > { %v2335_v23 = vpop.permute.xlu1 %2334  ;;  %v2209_v1 = vpop.permute.xlu0 %2208  ;;  %v2385_v40 = vld [vmem:[#allocation3 + $0x28] sm:$0xff] }
 0x584   : > { %2350 = vst.msk [vmem:[#allocation3 + $0x30] sm:$0xff] %vm2343_vm10, %v2335_v23  ;;  %4927 = vmatmul.mubr.msk.f32.gmra.mrb[20].mxu1 %vm2110_vm0, %v2385_v40 }
 0x585   : > { %2226 = vst.msk [vmem:[#allocation3 + $0x39] sm:$0x7f] %vm2218_vm6, %v2209_v1 }
 0x587   : > { %v2364_v46 = vpop.permute.xlu1 %2363  ;;  %v2242_v27 = vpop.permute.xlu0 %2241 }
 0x588   : > { %2379 = vst.msk [vmem:[#allocation3 + $0x2f] sm:$0xfe] %vm2372_vm11, %v2364_v46 }
 0x589   : > { %2259 = vst.msk [vmem:[#allocation3 + $0x38] sm:$0xff] %vm2251_vm7, %v2242_v27 }
 0x58b   : > { %v2275_v25 = vpop.permute.xlu0 %2274 }
 0x58c   : > { %2292 = vst.msk [vmem:[#allocation3 + $0x37] sm:$0xfe] %vm2284_vm8, %v2275_v25 }
 0x58f   : > { %v2386_v22 = vld [vmem:[#allocation3 + $0x30] sm:$0xff] }
 0x590   : > { %4929 = vmatprep.mubr.msk.f32.mxu1 %vm2110_vm0, %v2386_v22 }
 0x593   : > { %v2387_v54 = vld [vmem:[#allocation3 + $0x38] sm:$0xff] }
 0x594   : > { %4930 = vmatmul.mubr.msk.f32.gmra.mrb[22].mxu1 %vm2110_vm0, %v2387_v54 }
 0x61b   : > { %v4922_v34 = vpop.f32.mrb[16].mxu1 }
 0x61c   : > { %v2500_v39 = vadd.f32 %v4922_v34, %v4575_v2  ;;  %v2494_v59 = vpop.f32.mrb[17].mxu1 }
 0x61d   : > { %v2495_v35 = vadd.f32 %v4575_v2, %v2494_v59 }
 0x61e   : > { %v2534_v45 = vmax.f32 %v2500_v39, 0.0 }
 0x61f   : > { %v2533_v44 = vmax.f32 %v2495_v35, 0.0 }
 0x621   : > { %v5118_v26 = vpack.c.bf16 %v2534_v45, %v2533_v44 }
 0x623   : > { %5119 = vmatprep.subr.bf16.mxu0 %v5118_v26 }
 0x624   : > { %5121 = vmatpush3.bf16.msra.mxu0 %v5118_v26 }
 0x63b   : > { %v4925_v13 = vpop.f32.mrb[18].mxu1 }
 0x63c   : > { %v2510_v62 = vadd.f32 %v4925_v13, %v4575_v2  ;;  %v2504_v0 = vpop.f32.mrb[19].mxu1 }
 0x63d   : > { %v2505_v23 = vadd.f32 %v4575_v2, %v2504_v0  ;;  %v2542_v0 = vld [vmem:[%s8144_s6 + $0x8] sm:$0xff] }
 0x63e   : > { %v2536_v1 = vmax.f32 %v2510_v62, 0.0 }
 0x63f   : > { %v2535_v40 = vmax.f32 %v2505_v23, 0.0  ;;  %v2543_v23 = vld [vmem:[%s8144_s6 + $0x10] sm:$0xff] }
 0x641   : > { %v5122_v46 = vpack.c.bf16 %v2536_v1, %v2535_v40  ;;  %v2545_v1 = vld [vmem:[%s8144_s6 + $0x20] sm:$0xff]  ;;  %v2546_v40 = vld [vmem:[%s8144_s6 + $0x28] sm:$0xff] }
 0x643   : > { %5123 = vmatprep.subr.bf16.mxu0 %v5122_v46 }
 0x644   : > { %5125 = vmatpush3.bf16.msra.mxu0 %v5122_v46  ;;  %v2547_v46 = vld [vmem:[%s8144_s6 + $0x30] sm:$0xff] }
 0x657   : > { %v4928_v27 = vpop.f32.mrb[20].mxu1 }
 0x658   : > { %v2520_v25 = vadd.f32 %v4928_v27, %v4575_v2  ;;  %v2514_v22 = vpop.f32.mrb[21].mxu1  ;;  %v2548_v27 = vld [vmem:[%s8144_s6 + $0x38] sm:$0xff] }
 0x659   : > { %v2515_v54 = vadd.f32 %v4575_v2, %v2514_v22  ;;  %v2550_v22 = vld [vmem:[%s8144_s6 + $0x48] sm:$0xff] }
 0x65a   : > { %v2538_v41 = vmax.f32 %v2520_v25, 0.0  ;;  %v2549_v25 = vld [vmem:[%s8144_s6 + $0x40] sm:$0xff] }
 0x65b   : > { %v2537_v34 = vmax.f32 %v2515_v54, 0.0  ;;  %v2551_v54 = vld [vmem:[%s8144_s6 + $0x50] sm:$0xff] }
 0x65d   : > { %v5126_v39 = vpack.c.bf16 %v2538_v41, %v2537_v34  ;;  %v2552_v41 = vld [vmem:[%s8144_s6 + $0x58] sm:$0xff]  ;;  %v2553_v34 = vld [vmem:[%s8144_s6 + $0x60] sm:$0xff] }
 0x65f   : > { %5127 = vmatprep.subr.bf16.mxu0 %v5126_v39 }
 0x660   : > { %5129 = vmatpush3.bf16.msra.mxu0 %v5126_v39  ;;  %v2554_v39 = vld [vmem:[%s8144_s6 + $0x68] sm:$0xff] }
 0x667   : > { %v4931_v59 = vpop.f32.mrb[22].mxu1 }
 0x668   : > { %v2530_v35 = vadd.f32 %v4931_v59, %v4575_v2  ;;  %v2524_v45 = vpop.f32.mrb[23].mxu1  ;;  %v2555_v59 = vld [vmem:[%s8144_s6 + $0x70] sm:$0xff] }
 0x669   : > { %v2525_v44 = vadd.f32 %v4575_v2, %v2524_v45  ;;  %v2544_v2 = vld [vmem:[%s8144_s6 + $0x18] sm:$0xff]  ;;  %v2557_v45 = vld [vmem:[%s8144_s6 + $0x80] sm:$0xff] }
 0x66a   : > { %v2540_v26 = vmax.f32 %v2530_v35, 0.0  ;;  %v2556_v35 = vld [vmem:[%s8144_s6 + $0x78] sm:$0xff] }
 0x66b   : > { %v2539_v13 = vmax.f32 %v2525_v44, 0.0  ;;  %v2558_v44 = vld [vmem:[%s8144_s6 + $0x88] sm:$0xff] }
 0x66d   : > { %v5130_v62 = vpack.c.bf16 %v2540_v26, %v2539_v13  ;;  %v2559_v26 = vld [vmem:[%s8144_s6 + $0x90] sm:$0xff]  ;;  %v2560_v13 = vld [vmem:[%s8144_s6 + $0x98] sm:$0xff] }
 0x66f   : > { %5131 = vmatprep.subr.bf16.mxu0 %v5130_v62 }
 0x670   : > { %5133 = vmatpush3.bf16.msra.mxu0 %v5130_v62  ;;  %v2561_v62 = vld [vmem:[%s8144_s6 + $0xa0] sm:$0xff] }
 0x673   : > { %4949 = vmatmul.mubr.msk.f32.vlgmr.msra.gmra.mrb[32].mxu0 %vm2573_vm12, %v2542_v0  ;;  %v2562_v0 = vld [vmem:[%s8144_s6 + $0xa8] sm:$0xff] }
 0x674   : > { %4951 = vmatprep.mubr.msk.f32.mxu0 %vm2573_vm12, %v2543_v23  ;;  %v2563_v23 = vld [vmem:[%s8144_s6 + $0xb0] sm:$0xff] }
 0x677   : > { %4952 = vmatmul.mubr.msk.f32.gmra.mrb[34].mxu0 %vm2573_vm12, %v2544_v2  ;;  %v2564_v2 = vld [vmem:[%s8144_s6 + $0xb8] sm:$0xff] }
 0x678   : > { %4954 = vmatprep.mubr.msk.f32.mxu0 %vm2573_vm12, %v2545_v1  ;;  %v2565_v1 = vld [vmem:[%s8144_s6 + $0xc0] sm:$0xff] }
 0x67b   : > { %4955 = vmatmul.mubr.msk.f32.gmra.mrb[36].mxu0 %vm2573_vm12, %v2546_v40  ;;  %v2566_v40 = vld [vmem:[%s8144_s6 + $0xc8] sm:$0xff] }
 0x67c   : > { %4957 = vmatprep.mubr.msk.f32.mxu0 %vm2573_vm12, %v2547_v46  ;;  %v2567_v46 = vld [vmem:[%s8144_s6 + $0xd0] sm:$0xff] }
 0x67f   : > { %4958 = vmatmul.mubr.msk.f32.gmra.mrb[38].mxu0 %vm2573_vm12, %v2548_v27  ;;  %v2568_v27 = vld [vmem:[%s8144_s6 + $0xd8] sm:$0xff] }
 0x680   : > { %4960 = vmatprep.mubr.msk.f32.mxu0 %vm2573_vm12, %v2549_v25  ;;  %v2569_v25 = vld [vmem:[%s8144_s6 + $0xe0] sm:$0xff] }
 0x683   : > { %4961 = vmatmul.mubr.msk.f32.gmra.mrb[40].mxu0 %vm2573_vm12, %v2550_v22  ;;  %v2570_v22 = vld [vmem:[%s8144_s6 + $0xe8] sm:$0xff] }
 0x684   : > { %4963 = vmatprep.mubr.msk.f32.mxu0 %vm2573_vm12, %v2551_v54  ;;  %v2571_v54 = vld [vmem:[%s8144_s6 + $0xf0] sm:$0xff] }
 0x687   : > { %4964 = vmatmul.mubr.msk.f32.gmra.mrb[42].mxu0 %vm2573_vm12, %v2552_v41  ;;  %v2572_v41 = vld [vmem:[%s8144_s6 + $0xf8] sm:$0xff] }
 0x688   : > { %4966 = vmatprep.mubr.msk.f32.mxu0 %vm2573_vm12, %v2553_v34 }
 0x68b   : > { %4967 = vmatmul.mubr.msk.f32.gmra.mrb[44].mxu0 %vm2573_vm12, %v2554_v39  ;;  %v8220_v39 = vmax.f32 %v6296_v47, 0.0 }
 0x68c   : > { %4969 = vmatprep.mubr.msk.f32.mxu0 %vm2573_vm12, %v2555_v59 }
 0x68f   : > { %4970 = vmatmul.mubr.msk.f32.gmra.mrb[46].mxu0 %vm2573_vm12, %v2556_v35 }
 0x690   : > { %4972 = vmatprep.mubr.msk.f32.mxu0 %vm2573_vm12, %v2557_v45  ;;  %v8221_v45 = vmax.f32 %v6300_v48, 0.0 }
 0x693   : > { %4973 = vmatmul.mubr.msk.f32.gmra.mrb[48].mxu0 %vm2573_vm12, %v2558_v44 }
 0x694   : > { %4975 = vmatprep.mubr.msk.f32.mxu0 %vm2573_vm12, %v2559_v26 }
 0x697   : > { %4976 = vmatmul.mubr.msk.f32.gmra.mrb[50].mxu0 %vm2573_vm12, %v2560_v13  ;;  %v8222_v13 = vmax.f32 %v6308_v51, 0.0  ;;  %v8224_v51 = vmax.f32 %v6328_v60, 0.0  ;;  %v8226_v60 = vmax.f32 %v6344_v36, 0.0  ;;  %v8228_v36 = vmax.f32 %v6362_v42, 0.0 }
 0x698   : > { %4978 = vmatprep.mubr.msk.f32.mxu0 %vm2573_vm12, %v2561_v62  ;;  %v8230_v42 = vmax.f32 %v6398_v29, 0.0  ;;  %v8232_v29 = vmax.f32 %v6429_v30, 0.0  ;;  %v8234_v30 = vmax.f32 %v6462_v49, 0.0  ;;  %v8236_v49 = vmax.f32 %v6481_v53, 0.0 }
 0x699   : > { %v8238_v53 = vmax.f32 %v6494_v55, 0.0  ;;  %v8240_v55 = vmax.f32 %v6507_v56, 0.0  ;;  %v8242_v56 = vmax.f32 %v6520_v18, 0.0  ;;  %v8244_v18 = vmax.f32 %v6533_v15, 0.0  ;;  %v4045_v15 = vld [vmem:[%s8145_s7 + $0x8] sm:$0xff] }
 0x69b   : > { %4979 = vmatmul.mubr.msk.f32.gmra.mrb[52].mxu0 %vm2573_vm12, %v2562_v0  ;;  %v8223_v0 = vmax.f32 %v6312_v24, 0.0  ;;  %v8225_v24 = vmax.f32 %v6332_v63, 0.0  ;;  %v8227_v63 = vmax.f32 %v6347_v19, 0.0  ;;  %v8229_v19 = vmax.f32 %v6369_v50, 0.0 }
 0x69c   : > { %4981 = vmatprep.mubr.msk.f32.mxu0 %vm2573_vm12, %v2563_v23  ;;  %v8231_v50 = vmax.f32 %v6401_v43, 0.0 }
 0x69f   : > { %4982 = vmatmul.mubr.msk.f32.gmra.mrb[54].mxu0 %vm2573_vm12, %v2564_v2 }
 0x6a0   : > { %4984 = vmatprep.mubr.msk.f32.mxu0 %vm2573_vm12, %v2565_v1 }
 0x6a3   : > { %4985 = vmatmul.mubr.msk.f32.gmra.mrb[56].mxu0 %vm2573_vm12, %v2566_v40 }
 0x6a4   : > { %4987 = vmatprep.mubr.msk.f32.mxu0 %vm2573_vm12, %v2567_v46 }
 0x6a7   : > { %4988 = vmatmul.mubr.msk.f32.gmra.mrb[58].mxu0 %vm2573_vm12, %v2568_v27 }
 0x6a8   : > { %4990 = vmatprep.mubr.msk.f32.mxu0 %vm2573_vm12, %v2569_v25 }
 0x6ab   : > { %4991 = vmatmul.mubr.msk.f32.gmra.mrb[60].mxu0 %vm2573_vm12, %v2570_v22 }
 0x6ac   : > { %4993 = vmatprep.mubr.msk.f32.mxu0 %vm2573_vm12, %v2571_v54 }
 0x6af   : > { %4994 = vmatmul.mubr.msk.f32.gmra.mrb[62].mxu0 %vm2573_vm12, %v2572_v41  ;;  %vm3982_vm12 = vcmask 589312  }
 0x746   : > { %v4950_v34 = vpop.f32.mrb[32].mxu0 }
 0x747   : > { %v2896_v59 = vadd.f32 %v4950_v34, %v8220_v39  ;;  %v2736_v35 = vpop.f32.mrb[33].mxu0 }
 0x748   : > { %v2895_v44 = vadd.f32 %v2736_v35, %v8221_v45 }
 0x749   : > { %2962 = vst.msk [vmem:[#allocation4 + $0x19] sm:$0x7f] %vm2120_vm2, %v2896_v59  ;;  %3023 = vrot.lane.b32.xlu0 %v2896_v59, %s5277_s20 }
 0x74a   : > { %3021 = vrot.lane.b32.xlu1 %v2895_v44, %s5277_s20  ;;  %v4953_v26 = vpop.f32.mrb[34].mxu0  ;;  %2961 = vst.msk [vmem:[#allocation4 + $0x11] sm:$0xff] %vm2960_vm13, %v2895_v44 }
 0x74b   : > { %v7046_v62 = vadd.f32 %v4953_v26, %v8222_v13  ;;  %v2746_v47 = vpop.f32.mrb[35].mxu0 }
 0x74c   : > { %v7050_v23 = vadd.f32 %v2746_v47, %v8223_v0  ;;  %v8233_v47 = vmax.f32 %v6432_v31, 0.0 }
 0x74d   : > { %2964 = vst.msk [vmem:[#allocation4 + $0x29] sm:$0x7f] %vm2120_vm2, %v7046_v62  ;;  %3143 = vrot.lane.b32.xlu0 %v2896_v59, %s5273_s16 }
 0x74e   : > { %3141 = vrot.lane.b32.xlu1 %v2895_v44, %s5273_s16  ;;  %v4956_v48 = vpop.f32.mrb[36].mxu0  ;;  %2963 = vst.msk [vmem:[#allocation4 + $0x21] sm:$0xff] %vm2960_vm13, %v7050_v23 }
 0x74f   : > { %v7060_v2 = vadd.f32 %v4956_v48, %v8224_v51  ;;  %v2756_v1 = vpop.f32.mrb[37].mxu0 }
 0x750   : > { %v7064_v40 = vadd.f32 %v2756_v1, %v8225_v24  ;;  %v8235_v1 = vmax.f32 %v6465_v58, 0.0 }
 0x751   : > { %2966 = vst.msk [vmem:[#allocation4 + $0x39] sm:$0x7f] %vm2120_vm2, %v7060_v2  ;;  %3266 = vrot.lane.b32.xlu0 %v2896_v59, %s5278_s23 }
 0x752   : > { %3264 = vrot.lane.b32.xlu1 %v2895_v44, %s5278_s23  ;;  %v4959_v46 = vpop.f32.mrb[38].mxu0  ;;  %2965 = vst.msk [vmem:[#allocation4 + $0x31] sm:$0xff] %vm2960_vm13, %v7064_v40 }
 0x753   : > { %v7074_v27 = vadd.f32 %v4959_v46, %v8226_v60  ;;  %v2766_v25 = vpop.f32.mrb[39].mxu0 }
 0x754   : > { %v7078_v22 = vadd.f32 %v2766_v25, %v8227_v63  ;;  %v8237_v25 = vmax.f32 %v6484_v32, 0.0 }
 0x755   : > { %2968 = vst.msk [vmem:[#allocation4 + $0x49] sm:$0x7f] %vm2120_vm2, %v7074_v27  ;;  %3395 = vrot.lane.b32.xlu0 %v2896_v59, %s5280_s21 }
 0x756   : > { %3393 = vrot.lane.b32.xlu1 %v2895_v44, %s5280_s21  ;;  %v4962_v54 = vpop.f32.mrb[40].mxu0  ;;  %2967 = vst.msk [vmem:[#allocation4 + $0x41] sm:$0xff] %vm2960_vm13, %v7078_v22 }
 0x757   : > { %v7088_v41 = vadd.f32 %v4962_v54, %v8228_v36  ;;  %v2776_v34 = vpop.f32.mrb[41].mxu0 }
 0x758   : > { %v7092_v39 = vadd.f32 %v2776_v34, %v8229_v19  ;;  %v8239_v34 = vmax.f32 %v6497_v28, 0.0 }
 0x759   : > { %2970 = vst.msk [vmem:[#allocation4 + $0x59] sm:$0x7f] %vm2120_vm2, %v7088_v41  ;;  %3523 = vrot.lane.b32.xlu0 %v2896_v59, %s5282_s29 }
 0x75a   : > { %3521 = vrot.lane.b32.xlu1 %v2895_v44, %s5282_s29  ;;  %v4965_v35 = vpop.f32.mrb[42].mxu0  ;;  %2969 = vst.msk [vmem:[#allocation4 + $0x51] sm:$0xff] %vm2960_vm13, %v7092_v39 }
 0x75b   : > { %v7102_v45 = vadd.f32 %v4965_v35, %v8230_v42  ;;  %v2786_v26 = vpop.f32.mrb[43].mxu0 }
 0x75c   : > { %v7106_v13 = vadd.f32 %v2786_v26, %v8231_v50  ;;  %v8241_v26 = vmax.f32 %v6510_v37, 0.0 }
 0x75d   : > { %2972 = vst.msk [vmem:[#allocation4 + $0x69] sm:$0x7f] %vm2120_vm2, %v7102_v45  ;;  %3027 = vrot.lane.b32.xlu0 %v7046_v62, %s5277_s20 }
 0x75e   : > { %3399 = vrot.lane.b32.xlu1 %v7046_v62, %s5280_s21  ;;  %v4968_v59 = vpop.f32.mrb[44].mxu0  ;;  %2971 = vst.msk [vmem:[#allocation4 + $0x61] sm:$0xff] %vm2960_vm13, %v7106_v13 }
 0x75f   : > { %v7118_v44 = vadd.f32 %v4968_v59, %v8232_v29  ;;  %v2796_v43 = vpop.f32.mrb[45].mxu0 }
 0x760   : > { %v7122_v0 = vadd.f32 %v2796_v43, %v8233_v47  ;;  %v8243_v43 = vmax.f32 %v6523_v33, 0.0 }
 0x761   : > { %2974 = vst.msk [vmem:[#allocation4 + $0x79] sm:$0x7f] %vm2120_vm2, %v7118_v44  ;;  %3147 = vrot.lane.b32.xlu0 %v7046_v62, %s5273_s16 }
 0x762   : > { %3527 = vrot.lane.b32.xlu1 %v7046_v62, %s5282_s29  ;;  %v4971_v48 = vpop.f32.mrb[46].mxu0  ;;  %2973 = vst.msk [vmem:[#allocation4 + $0x71] sm:$0xff] %vm2960_vm13, %v7122_v0 }
 0x763   : > { %v7134_v51 = vadd.f32 %v4971_v48, %v8234_v30  ;;  %v2806_v31 = vpop.f32.mrb[47].mxu0 }
 0x764   : > { %v7138_v24 = vadd.f32 %v2806_v31, %v8235_v1  ;;  %v8245_v31 = vmax.f32 %v6536_v38, 0.0 }
 0x765   : > { %2976 = vst.msk [vmem:[#allocation4 + $0x89] sm:$0x7f] %vm2120_vm2, %v7134_v51  ;;  %3270 = vrot.lane.b32.xlu0 %v7046_v62, %s5278_s23 }
 0x766   : > { %3025 = vrot.lane.b32.xlu1 %v7050_v23, %s5277_s20  ;;  %v4974_v46 = vpop.f32.mrb[48].mxu0  ;;  %2975 = vst.msk [vmem:[#allocation4 + $0x81] sm:$0xff] %vm2960_vm13, %v7138_v24 }
 0x767   : > { %v7150_v60 = vadd.f32 %v4974_v46, %v8236_v49  ;;  %v2816_v58 = vpop.f32.mrb[49].mxu0  ;;  %v4044_v46 = vld [vmem:[%s8145_s7] sm:$0xff] }
 0x768   : > { %v7154_v63 = vadd.f32 %v2816_v58, %v8237_v25  ;;  %v5134_v49 = vpack.c.bf16 %v4045_v15, %v4044_v46  ;;  %v8246_v58 = vmax.f32 %v6546_v17, 0.0  ;;  %v4046_v17 = vld [vmem:[%s8145_s7 + $0x10] sm:$0xff]  ;;  %v4052_v46 = vld [vmem:[%s8145_s7 + $0x40] sm:$0xff] }
 0x769   : > { %2978 = vst.msk [vmem:[#allocation4 + $0x99] sm:$0x7f] %vm2120_vm2, %v7150_v60  ;;  %3652 = vrot.lane.b32.xlu0 %v7046_v62, %s5283_s25 }
 0x76a   : > { %3145 = vrot.lane.b32.xlu1 %v7050_v23, %s5273_s16  ;;  %v4977_v54 = vpop.f32.mrb[50].mxu0  ;;  %2977 = vst.msk [vmem:[#allocation4 + $0x91] sm:$0xff] %vm2960_vm13, %v7154_v63  ;;  %5150 = vmatprep.subr.bf16.mxu1 %v5134_v49 }
 0x76b   : > { %v7166_v36 = vadd.f32 %v4977_v54, %v8238_v53  ;;  %v2826_v32 = vpop.f32.mrb[51].mxu0  ;;  %v8247_v53 = vmax.f32 %v6549_v61, 0.0  ;;  %5135 = vmatprep.subr.bf16.mxu0 %v5134_v49  ;;  %5155 = vmatpush3.bf16.msra.mxu1 %v5134_v49 }
 0x76c   : > { %v7170_v19 = vadd.f32 %v2826_v32, %v8239_v34  ;;  %v4047_v34 = vld [vmem:[%s8145_s7 + $0x18] sm:$0xff]  ;;  %5137 = vmatpush3.bf16.msra.mxu0 %v5134_v49 }
 0x76d   : > { %2980 = vst.msk [vmem:[#allocation4 + $0xa9] sm:$0x7f] %vm2120_vm2, %v7166_v36  ;;  %3773 = vrot.lane.b32.xlu0 %v7046_v62, %s5284_s13 }
 0x76e   : > { %3268 = vrot.lane.b32.xlu1 %v7050_v23, %s5278_s23  ;;  %v4980_v35 = vpop.f32.mrb[52].mxu0  ;;  %2979 = vst.msk [vmem:[#allocation4 + $0xa1] sm:$0xff] %vm2960_vm13, %v7170_v19 }
 0x76f   : > { %v7182_v42 = vadd.f32 %v4980_v35, %v8240_v55  ;;  %v2836_v28 = vpop.f32.mrb[53].mxu0  ;;  %v5138_v35 = vpack.c.bf16 %v4047_v34, %v4046_v17  ;;  %v8248_v55 = vmax.f32 %v6559_v16, 0.0  ;;  %v4048_v16 = vld [vmem:[%s8145_s7 + $0x20] sm:$0xff] }
 0x770   : > { %v7186_v50 = vadd.f32 %v2836_v28, %v8241_v26 }
 0x771   : > { %2982 = vst.msk [vmem:[#allocation4 + $0xb9] sm:$0x7f] %vm2120_vm2, %v7182_v42  ;;  %3397 = vrot.lane.b32.xlu0 %v7050_v23, %s5280_s21  ;;  %5151 = vmatprep.subr.bf16.mxu1 %v5138_v35 }
 0x772   : > { %3650 = vrot.lane.b32.xlu1 %v7050_v23, %s5283_s25  ;;  %v4983_v59 = vpop.f32.mrb[54].mxu0  ;;  %2981 = vst.msk [vmem:[#allocation4 + $0xb1] sm:$0xff] %vm2960_vm13, %v7186_v50  ;;  %5139 = vmatprep.subr.bf16.mxu0 %v5138_v35 }
 0x773   : > { %v7198_v29 = vadd.f32 %v4983_v59, %v8242_v56  ;;  %v2846_v37 = vpop.f32.mrb[55].mxu0  ;;  %v8249_v59 = vmax.f32 %v6562_v57, 0.0  ;;  %5156 = vmatpush3.bf16.msra.mxu1 %v5138_v35  ;;  %5141 = vmatpush3.bf16.msra.mxu0 %v5138_v35 }
 0x774   : > { %v7202_v47 = vadd.f32 %v2846_v37, %v8243_v43  ;;  %v4049_v37 = vld [vmem:[%s8145_s7 + $0x28] sm:$0xff] }
 0x775   : > { %2984 = vst.msk [vmem:[#allocation4 + $0xc9] sm:$0x7f] %vm2120_vm2, %v7198_v29  ;;  %3525 = vrot.lane.b32.xlu0 %v7050_v23, %s5282_s29  ;;  %v5142_v43 = vpack.c.bf16 %v4049_v37, %v4048_v16 }
 0x776   : > { %3771 = vrot.lane.b32.xlu1 %v7050_v23, %s5284_s13  ;;  %v4986_v48 = vpop.f32.mrb[56].mxu0  ;;  %2983 = vst.msk [vmem:[#allocation4 + $0xc1] sm:$0xff] %vm2960_vm13, %v7202_v47 }
 0x777   : > { %v7214_v30 = vadd.f32 %v4986_v48, %v8244_v18  ;;  %v2856_v33 = vpop.f32.mrb[57].mxu0  ;;  %5152 = vmatprep.subr.bf16.mxu1 %v5142_v43  ;;  %5143 = vmatprep.subr.bf16.mxu0 %v5142_v43  ;;  %v4050_v18 = vld [vmem:[%s8145_s7 + $0x30] sm:$0xff] }
 0x778   : > { %v7218_v1 = vadd.f32 %v2856_v33, %v8245_v31  ;;  %5157 = vmatpush3.bf16.msra.mxu1 %v5142_v43  ;;  %v4051_v33 = vld [vmem:[%s8145_s7 + $0x38] sm:$0xff]  ;;  %5145 = vmatpush3.bf16.msra.mxu0 %v5142_v43 }
 0x779   : > { %2986 = vst.msk [vmem:[#allocation4 + $0xd9] sm:$0x7f] %vm2120_vm2, %v7214_v30  ;;  %3031 = vrot.lane.b32.xlu0 %v7060_v2, %s5277_s20  ;;  %v5146_v31 = vpack.c.bf16 %v4051_v33, %v4050_v18 }
 0x77a   : > { %3656 = vrot.lane.b32.xlu1 %v7060_v2, %s5283_s25  ;;  %v4989_v38 = vpop.f32.mrb[58].mxu0  ;;  %2985 = vst.msk [vmem:[#allocation4 + $0xd1] sm:$0xff] %vm2960_vm13, %v7218_v1 }
 0x77b   : > { %v7236_v25 = vadd.f32 %v4989_v38, %v8246_v58  ;;  %v2866_v54 = vpop.f32.mrb[59].mxu0  ;;  %5153 = vmatprep.subr.bf16.mxu1 %v5146_v31  ;;  %5147 = vmatprep.subr.bf16.mxu0 %v5146_v31 }
 0x77c   : > { %v7240_v32 = vadd.f32 %v2866_v54, %v8247_v53  ;;  %5158 = vmatpush3.bf16.msra.mxu1 %v5146_v31  ;;  %5149 = vmatpush3.bf16.msra.mxu0 %v5146_v31 }
 0x77d   : > { %2988 = vst.msk [vmem:[#allocation4 + $0xe9] sm:$0x7f] %vm2120_vm2, %v7236_v25  ;;  %3151 = vrot.lane.b32.xlu0 %v7060_v2, %s5273_s16  ;;  %5154 = vmatprep.subr.mxu1 %v4052_v46 }
 0x77e   : > { %3777 = vrot.lane.b32.xlu1 %v7060_v2, %s5284_s13  ;;  %v4992_v61 = vpop.f32.mrb[60].mxu0  ;;  %2987 = vst.msk [vmem:[#allocation4 + $0xe1] sm:$0xff] %vm2960_vm13, %v7240_v32  ;;  %5012 = vmatprep.subr.mxu0 %v4052_v46 }
 0x77f   : > { %v7258_v28 = vadd.f32 %v4992_v61, %v8248_v55  ;;  %v2876_v26 = vpop.f32.mrb[61].mxu0 }
 0x780   : > { %v7262_v56 = vadd.f32 %v2876_v26, %v8249_v59  ;;  %5159 = vmatpush3.msra.mxu1 %v4052_v46  ;;  %5013 = vmatpush3.msra.mxu0 %v4052_v46 }
 0x781   : > { %2990 = vst.msk [vmem:[#allocation4 + $0xf9] sm:$0x7f] %vm2120_vm2, %v7258_v28  ;;  %3274 = vrot.lane.b32.xlu0 %v7060_v2, %s5278_s23  ;;  %vm3740_vm2 = vcmask 458112  }
 0x782   : > { %3403 = vrot.lane.b32.xlu1 %v7060_v2, %s5280_s21  ;;  %v7276_v57 = vpop.f32.mrb[62].mxu0  ;;  %2989 = vst.msk [vmem:[#allocation4 + $0xf1] sm:$0xff] %vm2960_vm13, %v7262_v56 }
 0x783   : > { %v7280_v48 = vpop.f32.mrb[63].mxu0 }
 0x785   : > { %3654 = vrot.lane.b32.xlu0 %v7064_v40, %s5283_s25 }
 0x786   : > { %3897 = vrot.lane.b32.xlu1 %v7060_v2, %s5285_s19 }
 0x789   : > { %3775 = vrot.lane.b32.xlu0 %v7064_v40, %s5284_s13 }
 0x78a   : > { %3531 = vrot.lane.b32.xlu1 %v7060_v2, %s5282_s29 }
 0x78d   : > { %3401 = vrot.lane.b32.xlu0 %v7064_v40, %s5280_s21 }
 0x78e   : > { %3029 = vrot.lane.b32.xlu1 %v7064_v40, %s5277_s20 }
 0x791   : > { %3895 = vrot.lane.b32.xlu0 %v7064_v40, %s5285_s19 }
 0x792   : > { %3149 = vrot.lane.b32.xlu1 %v7064_v40, %s5273_s16 }
 0x795   : > { %3529 = vrot.lane.b32.xlu0 %v7064_v40, %s5282_s29 }
 0x796   : > { %3272 = vrot.lane.b32.xlu1 %v7064_v40, %s5278_s23 }
 0x799   : > { %3035 = vrot.lane.b32.xlu0 %v7074_v27, %s5277_s20 }
 0x79a   : > { %3660 = vrot.lane.b32.xlu1 %v7074_v27, %s5283_s25 }
 0x79d   : > { %3155 = vrot.lane.b32.xlu0 %v7074_v27, %s5273_s16 }
 0x79e   : > { %3781 = vrot.lane.b32.xlu1 %v7074_v27, %s5284_s13 }
 0x7a1   : > { %3278 = vrot.lane.b32.xlu0 %v7074_v27, %s5278_s23 }
 0x7a2   : > { %3407 = vrot.lane.b32.xlu1 %v7074_v27, %s5280_s21 }
 0x7a5   : > { %3658 = vrot.lane.b32.xlu0 %v7078_v22, %s5283_s25 }
 0x7a6   : > { %3901 = vrot.lane.b32.xlu1 %v7074_v27, %s5285_s19 }
 0x7a9   : > { %3779 = vrot.lane.b32.xlu0 %v7078_v22, %s5284_s13 }
 0x7aa   : > { %3535 = vrot.lane.b32.xlu1 %v7074_v27, %s5282_s29 }
 0x7ad   : > { %3405 = vrot.lane.b32.xlu0 %v7078_v22, %s5280_s21 }
 0x7ae   : > { %3033 = vrot.lane.b32.xlu1 %v7078_v22, %s5277_s20 }
 0x7b1   : > { %3899 = vrot.lane.b32.xlu0 %v7078_v22, %s5285_s19 }
 0x7b2   : > { %3153 = vrot.lane.b32.xlu1 %v7078_v22, %s5273_s16 }
 0x7b5   : > { %3533 = vrot.lane.b32.xlu0 %v7078_v22, %s5282_s29 }
 0x7b6   : > { %3276 = vrot.lane.b32.xlu1 %v7078_v22, %s5278_s23 }
 0x7b9   : > { %3039 = vrot.lane.b32.xlu0 %v7088_v41, %s5277_s20 }
 0x7ba   : > { %3664 = vrot.lane.b32.xlu1 %v7088_v41, %s5283_s25 }
 0x7bb   : > { %v3024_v2 = vpop.permute.xlu0 %3023 }
 0x7bc   : > { %3112 = vst.msk [vmem:[#allocation4 + $0x18] sm:$0xff] %vm2156_vm4, %v3024_v2  ;;  %v3022_v40 = vpop.permute.xlu1 %3021 }
 0x7bd   : > { %3111 = vst.msk [vmem:[#allocation4 + $0x10] sm:$0xff] %vm2156_vm4, %v3022_v40  ;;  %3159 = vrot.lane.b32.xlu0 %v7088_v41, %s5273_s16 }
 0x7be   : > { %3785 = vrot.lane.b32.xlu1 %v7088_v41, %s5284_s13 }
 0x7bf   : > { %v3144_v27 = vpop.permute.xlu0 %3143 }
 0x7c0   : > { %3233 = vst.msk [vmem:[#allocation4 + $0x17] sm:$0xff] %vm3232_vm14, %v3144_v27  ;;  %v3142_v22 = vpop.permute.xlu1 %3141 }
 0x7c1   : > { %3231 = vst.msk [vmem:[#allocation4 + $0xf] sm:$0xfe] %vm2185_vm5, %v3142_v22  ;;  %3282 = vrot.lane.b32.xlu0 %v7088_v41, %s5278_s23 }
 0x7c2   : > { %3411 = vrot.lane.b32.xlu1 %v7088_v41, %s5280_s21 }
 0x7c3   : > { %v3267_v15 = vpop.permute.xlu0 %3266 }
 0x7c4   : > { %3362 = vst.msk [vmem:[#allocation4 + $0x9] sm:$0x7f] %vm2218_vm6, %v3267_v15  ;;  %v3265_v38 = vpop.permute.xlu1 %3264 }
 0x7c5   : > { %3361 = vst.msk [vmem:[#allocation4 + $0x1] sm:$0xff] %vm3360_vm15, %v3265_v38  ;;  %3662 = vrot.lane.b32.xlu0 %v7092_v39, %s5283_s25 }
 0x7c6   : > { %3905 = vrot.lane.b32.xlu1 %v7088_v41, %s5285_s19 }
 0x7c7   : > { %v3396_v49 = vpop.permute.xlu0 %3395 }
 0x7c8   : > { %3490 = vst.msk [vmem:[#allocation4 + $0x8] sm:$0xff] %vm2251_vm7, %v3396_v49  ;;  %v3394_v58 = vpop.permute.xlu1 %3393 }
 0x7c9   : > { %3489 = vst.msk [vmem:[#allocation4] sm:$0xff] %vm2251_vm7, %v3394_v58  ;;  %3783 = vrot.lane.b32.xlu0 %v7092_v39, %s5284_s13 }
 0x7ca   : > { %3539 = vrot.lane.b32.xlu1 %v7088_v41, %s5282_s29 }
 0x7cb   : > { %v3524_v54 = vpop.permute.xlu0 %3523 }
 0x7cc   : > { %3619 = vst.msk [vmem:[#allocation4 + $0x7] sm:$0xff] %vm3618_vm3, %v3524_v54  ;;  %v3522_v53 = vpop.permute.xlu1 %3521 }
 0x7cd   : > { %3617 = vst.msk [vmem:[#allocation4 - $0x1] sm:$0xfe] %vm2284_vm8, %v3522_v53  ;;  %3409 = vrot.lane.b32.xlu0 %v7092_v39, %s5280_s21 }
 0x7ce   : > { %3037 = vrot.lane.b32.xlu1 %v7092_v39, %s5277_s20 }
 0x7cf   : > { %v3028_v17 = vpop.permute.xlu0 %3027 }
 0x7d0   : > { %3114 = vst.msk [vmem:[#allocation4 + $0x28] sm:$0xff] %vm2156_vm4, %v3028_v17  ;;  %v3400_v34 = vpop.permute.xlu1 %3399 }
 0x7d1   : > { %3903 = vrot.lane.b32.xlu0 %v7092_v39, %s5285_s19 }
 0x7d2   : > { %3157 = vrot.lane.b32.xlu1 %v7092_v39, %s5273_s16 }
 0x7d3   : > { %v3148_v41 = vpop.permute.xlu0 %3147 }
 0x7d4   : > { %v3528_v61 = vpop.permute.xlu1 %3527 }
 0x7d5   : > { %3537 = vrot.lane.b32.xlu0 %v7092_v39, %s5282_s29 }
 0x7d6   : > { %3280 = vrot.lane.b32.xlu1 %v7092_v39, %s5278_s23 }
 0x7d7   : > { %v3271_v35 = vpop.permute.xlu0 %3270 }
 0x7d8   : > { %3364 = vst.msk [vmem:[#allocation4 + $0x19] sm:$0x7f] %vm2218_vm6, %v3271_v35  ;;  %v3026_v55 = vpop.permute.xlu1 %3025 }
 0x7d9   : > { %3113 = vst.msk [vmem:[#allocation4 + $0x20] sm:$0xff] %vm2156_vm4, %v3026_v55  ;;  %3043 = vrot.lane.b32.xlu0 %v7102_v45, %s5277_s20 }
 0x7da   : > { %3235 = vst.msk [vmem:[#allocation4 + $0x27] sm:$0xff] %vm3232_vm14, %v3148_v41  ;;  %3668 = vrot.lane.b32.xlu1 %v7102_v45, %s5283_s25 }
 0x7db   : > { %v3653_v26 = vpop.permute.xlu0 %3652 }
 0x7dc   : > { %3742 = vst.msk [vmem:[#allocation4 + $0x9] sm:$0x7f] %vm2314_vm9, %v3653_v26  ;;  %v3146_v59 = vpop.permute.xlu1 %3145 }
 0x7dd   : > { %3234 = vst.msk [vmem:[#allocation4 + $0x1f] sm:$0xfe] %vm2185_vm5, %v3146_v59  ;;  %3163 = vrot.lane.b32.xlu0 %v7102_v45, %s5273_s16 }
 0x7de   : > { %3789 = vrot.lane.b32.xlu1 %v7102_v45, %s5284_s13 }
 0x7df   : > { %v3774_v39 = vpop.permute.xlu0 %3773 }
 0x7e0   : > { %v3269_v16 = vpop.permute.xlu1 %3268 }
 0x7e1   : > { %3363 = vst.msk [vmem:[#allocation4 + $0x11] sm:$0xff] %vm3360_vm15, %v3269_v16  ;;  %3286 = vrot.lane.b32.xlu0 %v7102_v45, %s5278_s23 }
 0x7e2   : > { %3492 = vst.msk [vmem:[#allocation4 + $0x18] sm:$0xff] %vm2251_vm7, %v3400_v34  ;;  %3415 = vrot.lane.b32.xlu1 %v7102_v45, %s5280_s21 }
 0x7e3   : > { %v3398_v37 = vpop.permute.xlu0 %3397 }
 0x7e4   : > { %3491 = vst.msk [vmem:[#allocation4 + $0x10] sm:$0xff] %vm2251_vm7, %v3398_v37  ;;  %v3651_v43 = vpop.permute.xlu1 %3650 }
 0x7e5   : > { %3621 = vst.msk [vmem:[#allocation4 + $0x17] sm:$0xff] %vm3618_vm3, %v3528_v61  ;;  %3666 = vrot.lane.b32.xlu0 %v7106_v13, %s5283_s25 }
 0x7e6   : > { %3741 = vst.msk [vmem:[#allocation4 + $0x1] sm:$0xff] %vm3740_vm2, %v3651_v43  ;;  %3909 = vrot.lane.b32.xlu1 %v7102_v45, %s5285_s19 }
 0x7e7   : > { %3862 = vst.msk [vmem:[#allocation4 + $0x8] sm:$0xff] %vm2343_vm10, %v3774_v39  ;;  %v3526_v18 = vpop.permute.xlu0 %3525 }
 0x7e8   : > { %3620 = vst.msk [vmem:[#allocation4 + $0xf] sm:$0xfe] %vm2284_vm8, %v3526_v18  ;;  %v3772_v33 = vpop.permute.xlu1 %3771 }
 0x7e9   : > { %3861 = vst.msk [vmem:[#allocation4] sm:$0xff] %vm2343_vm10, %v3772_v33  ;;  %3787 = vrot.lane.b32.xlu0 %v7106_v13, %s5284_s13 }
 0x7ea   : > { %3543 = vrot.lane.b32.xlu1 %v7102_v45, %s5282_s29 }
 0x7eb   : > { %v3032_v31 = vpop.permute.xlu0 %3031 }
 0x7ec   : > { %3116 = vst.msk [vmem:[#allocation4 + $0x38] sm:$0xff] %vm2156_vm4, %v3032_v31  ;;  %v3657_v46 = vpop.permute.xlu1 %3656 }
 0x7ed   : > { %3744 = vst.msk [vmem:[#allocation4 + $0x19] sm:$0x7f] %vm2314_vm9, %v3657_v46  ;;  %3413 = vrot.lane.b32.xlu0 %v7106_v13, %s5280_s21 }
 0x7ee   : > { %3041 = vrot.lane.b32.xlu1 %v7106_v13, %s5277_s20 }
 0x7ef   : > { %v3152_v2 = vpop.permute.xlu0 %3151 }
 0x7f0   : > { %v3778_v40 = vpop.permute.xlu1 %3777 }
 0x7f1   : > { %3907 = vrot.lane.b32.xlu0 %v7106_v13, %s5285_s19 }
 0x7f2   : > { %3161 = vrot.lane.b32.xlu1 %v7106_v13, %s5273_s16 }
 0x7f3   : > { %v3275_v45 = vpop.permute.xlu0 %3274 }
 0x7f4   : > { %3366 = vst.msk [vmem:[#allocation4 + $0x29] sm:$0x7f] %vm2218_vm6, %v3275_v45  ;;  %v3404_v27 = vpop.permute.xlu1 %3403 }
 0x7f5   : > { %3541 = vrot.lane.b32.xlu0 %v7106_v13, %s5282_s29 }
 0x7f6   : > { %3284 = vrot.lane.b32.xlu1 %v7106_v13, %s5278_s23 }
 0x7f7   : > { %v3655_v22 = vpop.permute.xlu0 %3654 }
 0x7f8   : > { %3743 = vst.msk [vmem:[#allocation4 + $0x11] sm:$0xff] %vm3740_vm2, %v3655_v22  ;;  %v3898_v15 = vpop.permute.xlu1 %3897 }
 0x7f9   : > { %3864 = vst.msk [vmem:[#allocation4 + $0x18] sm:$0xff] %vm2343_vm10, %v3778_v40  ;;  %3047 = vrot.lane.b32.xlu0 %v7118_v44, %s5277_s20 }
 0x7fa   : > { %3672 = vrot.lane.b32.xlu1 %v7118_v44, %s5283_s25 }
 0x7fb   : > { %v3776_v38 = vpop.permute.xlu0 %3775 }
 0x7fc   : > { %3863 = vst.msk [vmem:[#allocation4 + $0x10] sm:$0xff] %vm2343_vm10, %v3776_v38  ;;  %v3532_v49 = vpop.permute.xlu1 %3531 }
 0x7fd   : > { %3985 = vst.msk [vmem:[#allocation4 + $0x17] sm:$0xff] %vm3982_vm12, %v3898_v15  ;;  %3167 = vrot.lane.b32.xlu0 %v7118_v44, %s5273_s16 }
 0x7fe   : > { %3045 = vrot.lane.b32.xlu1 %v7122_v0, %s5277_s20 }
 0x7ff   : > { %v3402_v13 = vpop.permute.xlu0 %3401 }
 0x800   : > { %v3030_v58 = vpop.permute.xlu1 %3029 }
 0x801   : > { %3115 = vst.msk [vmem:[#allocation4 + $0x30] sm:$0xff] %vm2156_vm4, %v3030_v58  ;;  %3290 = vrot.lane.b32.xlu0 %v7118_v44, %s5278_s23 }
 0x802   : > { %3237 = vst.msk [vmem:[#allocation4 + $0x37] sm:$0xff] %vm3232_vm14, %v3152_v2  ;;  %3165 = vrot.lane.b32.xlu1 %v7122_v0, %s5273_s16 }
 0x803   : > { %v3896_v54 = vpop.permute.xlu0 %3895 }
 0x804   : > { %3984 = vst.msk [vmem:[#allocation4 + $0xf] sm:$0xfe] %vm2372_vm11, %v3896_v54  ;;  %v3150_v53 = vpop.permute.xlu1 %3149  ;;  %v4015_v55 = vld [vmem:[#allocation4 + $0x18] sm:$0xff] }
 0x805   : > { %3236 = vst.msk [vmem:[#allocation4 + $0x2f] sm:$0xfe] %vm2185_vm5, %v3150_v53  ;;  %3793 = vrot.lane.b32.xlu0 %v7118_v44, %s5284_s13 }
 0x806   : > { %3288 = vrot.lane.b32.xlu1 %v7122_v0, %s5278_s23 }
 0x807   : > { %v3530_v17 = vpop.permute.xlu0 %3529 }
 0x808   : > { %v3273_v34 = vpop.permute.xlu1 %3272 }
 0x809   : > { %3365 = vst.msk [vmem:[#allocation4 + $0x21] sm:$0xff] %vm3360_vm15, %v3273_v34  ;;  %3419 = vrot.lane.b32.xlu0 %v7118_v44, %s5280_s21 }
 0x80a   : > { %3493 = vst.msk [vmem:[#allocation4 + $0x20] sm:$0xff] %vm2251_vm7, %v3402_v13  ;;  %3494 = vst.msk [vmem:[#allocation4 + $0x28] sm:$0xff] %vm2251_vm7, %v3404_v27  ;;  %3791 = vrot.lane.b32.xlu1 %v7122_v0, %s5284_s13 }
 0x80b   : > { %3622 = vst.msk [vmem:[#allocation4 + $0x1f] sm:$0xfe] %vm2284_vm8, %v3530_v17  ;;  %v3036_v41 = vpop.permute.xlu0 %3035  ;;  %v4014_v61 = vld [vmem:[#allocation4 + $0x10] sm:$0xff] }
 0x80c   : > { %3623 = vst.msk [vmem:[#allocation4 + $0x27] sm:$0xff] %vm3618_vm3, %v3532_v49  ;;  %5017 = vmatprep.mubr.msk.f32.mxu1 %vm2110_vm0, %v4014_v61  ;;  %v3661_v35 = vpop.permute.xlu1 %3660 }
 0x80d   : > { %3118 = vst.msk [vmem:[#allocation4 + $0x48] sm:$0xff] %vm2156_vm4, %v3036_v41  ;;  %5018 = vmatmul.mubr.msk.f32.vlgmr.msra.gmra.mrb[24].mxu1 %vm2110_vm0, %v4015_v55  ;;  %3913 = vrot.lane.b32.xlu0 %v7118_v44, %s5285_s19 }
 0x80e   : > { %3746 = vst.msk [vmem:[#allocation4 + $0x29] sm:$0x7f] %vm2314_vm9, %v3661_v35  ;;  %3417 = vrot.lane.b32.xlu1 %v7122_v0, %s5280_s21 }
 0x80f   : > { %v3156_v26 = vpop.permute.xlu0 %3155 }
 0x810   : > { %v3782_v59 = vpop.permute.xlu1 %3781 }
 0x811   : > { %3547 = vrot.lane.b32.xlu0 %v7118_v44, %s5282_s29 }
 0x812   : > { %3911 = vrot.lane.b32.xlu1 %v7122_v0, %s5285_s19 }
 0x813   : > { %v3279_v39 = vpop.permute.xlu0 %3278 }
 0x814   : > { %3368 = vst.msk [vmem:[#allocation4 + $0x39] sm:$0x7f] %vm2218_vm6, %v3279_v39  ;;  %v3408_v16 = vpop.permute.xlu1 %3407 }
 0x815   : > { %3670 = vrot.lane.b32.xlu0 %v7122_v0, %s5283_s25 }
 0x816   : > { %3545 = vrot.lane.b32.xlu1 %v7122_v0, %s5282_s29 }
 0x817   : > { %v3659_v37 = vpop.permute.xlu0 %3658 }
 0x818   : > { %3745 = vst.msk [vmem:[#allocation4 + $0x21] sm:$0xff] %vm3740_vm2, %v3659_v37  ;;  %v3902_v43 = vpop.permute.xlu1 %3901 }
 0x819   : > { %3866 = vst.msk [vmem:[#allocation4 + $0x28] sm:$0xff] %vm2343_vm10, %v3782_v59  ;;  %3051 = vrot.lane.b32.xlu0 %v7134_v51, %s5277_s20 }
 0x81a   : > { %3049 = vrot.lane.b32.xlu1 %v7138_v24, %s5277_s20 }
 0x81b   : > { %v3780_v44 = vpop.permute.xlu0 %3779 }
 0x81c   : > { %3865 = vst.msk [vmem:[#allocation4 + $0x20] sm:$0xff] %vm2343_vm10, %v3780_v44  ;;  %v3536_v18 = vpop.permute.xlu1 %3535 }
 0x81d   : > { %3987 = vst.msk [vmem:[#allocation4 + $0x27] sm:$0xff] %vm3982_vm12, %v3902_v43  ;;  %3171 = vrot.lane.b32.xlu0 %v7134_v51, %s5273_s16 }
 0x81e   : > { %3169 = vrot.lane.b32.xlu1 %v7138_v24, %s5273_s16 }
 0x81f   : > { %v3406_v0 = vpop.permute.xlu0 %3405 }
 0x820   : > { %v3034_v33 = vpop.permute.xlu1 %3033 }
 0x821   : > { %3117 = vst.msk [vmem:[#allocation4 + $0x40] sm:$0xff] %vm2156_vm4, %v3034_v33  ;;  %3676 = vrot.lane.b32.xlu0 %v7134_v51, %s5283_s25 }
 0x822   : > { %3239 = vst.msk [vmem:[#allocation4 + $0x47] sm:$0xff] %vm3232_vm14, %v3156_v26  ;;  %3674 = vrot.lane.b32.xlu1 %v7138_v24, %s5283_s25 }
 0x823   : > { %v3900_v31 = vpop.permute.xlu0 %3899 }
 0x824   : > { %3986 = vst.msk [vmem:[#allocation4 + $0x1f] sm:$0xfe] %vm2372_vm11, %v3900_v31  ;;  %v3154_v46 = vpop.permute.xlu1 %3153  ;;  %v4017_v15 = vld [vmem:[#allocation4 + $0x28] sm:$0xff] }
 0x825   : > { %3238 = vst.msk [vmem:[#allocation4 + $0x3f] sm:$0xfe] %vm2185_vm5, %v3154_v46  ;;  %3294 = vrot.lane.b32.xlu0 %v7134_v51, %s5278_s23 }
 0x826   : > { %3292 = vrot.lane.b32.xlu1 %v7138_v24, %s5278_s23 }
 0x827   : > { %v3534_v2 = vpop.permute.xlu0 %3533 }
 0x828   : > { %v3277_v40 = vpop.permute.xlu1 %3276 }
 0x829   : > { %3367 = vst.msk [vmem:[#allocation4 + $0x31] sm:$0xff] %vm3360_vm15, %v3277_v40  ;;  %3797 = vrot.lane.b32.xlu0 %v7134_v51, %s5284_s13 }
 0x82a   : > { %3495 = vst.msk [vmem:[#allocation4 + $0x30] sm:$0xff] %vm2251_vm7, %v3406_v0  ;;  %3496 = vst.msk [vmem:[#allocation4 + $0x38] sm:$0xff] %vm2251_vm7, %v3408_v16  ;;  %3795 = vrot.lane.b32.xlu1 %v7138_v24, %s5284_s13 }
 0x82b   : > { %3624 = vst.msk [vmem:[#allocation4 + $0x2f] sm:$0xfe] %vm2284_vm8, %v3534_v2  ;;  %v3040_v45 = vpop.permute.xlu0 %3039  ;;  %v4016_v27 = vld [vmem:[#allocation4 + $0x20] sm:$0xff] }
 0x82c   : > { %3625 = vst.msk [vmem:[#allocation4 + $0x37] sm:$0xff] %vm3618_vm3, %v3536_v18  ;;  %5020 = vmatprep.mubr.msk.f32.mxu1 %vm2110_vm0, %v4016_v27  ;;  %v3665_v22 = vpop.permute.xlu1 %3664 }
 0x82d   : > { %3120 = vst.msk [vmem:[#allocation4 + $0x58] sm:$0xff] %vm2156_vm4, %v3040_v45  ;;  %5021 = vmatmul.mubr.msk.f32.gmra.mrb[26].mxu1 %vm2110_vm0, %v4017_v15  ;;  %3423 = vrot.lane.b32.xlu0 %v7134_v51, %s5280_s21 }
 0x82e   : > { %3748 = vst.msk [vmem:[#allocation4 + $0x39] sm:$0x7f] %vm2314_vm9, %v3665_v22  ;;  %3421 = vrot.lane.b32.xlu1 %v7138_v24, %s5280_s21 }
 0x82f   : > { %v3160_v38 = vpop.permute.xlu0 %3159 }
 0x830   : > { %v3786_v49 = vpop.permute.xlu1 %3785 }
 0x831   : > { %3917 = vrot.lane.b32.xlu0 %v7134_v51, %s5285_s19 }
 0x832   : > { %3915 = vrot.lane.b32.xlu1 %v7138_v24, %s5285_s19 }
 0x833   : > { %v3283_v13 = vpop.permute.xlu0 %3282 }
 0x834   : > { %3370 = vst.msk [vmem:[#allocation4 + $0x49] sm:$0x7f] %vm2218_vm6, %v3283_v13  ;;  %v3412_v58 = vpop.permute.xlu1 %3411 }
 0x835   : > { %3551 = vrot.lane.b32.xlu0 %v7134_v51, %s5282_s29 }
 0x836   : > { %3549 = vrot.lane.b32.xlu1 %v7138_v24, %s5282_s29 }
 0x837   : > { %v3663_v54 = vpop.permute.xlu0 %3662 }
 0x838   : > { %3747 = vst.msk [vmem:[#allocation4 + $0x31] sm:$0xff] %vm3740_vm2, %v3663_v54  ;;  %v3906_v53 = vpop.permute.xlu1 %3905 }
 0x839   : > { %3868 = vst.msk [vmem:[#allocation4 + $0x38] sm:$0xff] %vm2343_vm10, %v3786_v49  ;;  %3055 = vrot.lane.b32.xlu0 %v7150_v60, %s5277_s20 }
 0x83a   : > { %3053 = vrot.lane.b32.xlu1 %v7154_v63, %s5277_s20 }
 0x83b   : > { %v3784_v17 = vpop.permute.xlu0 %3783 }
 0x83c   : > { %3867 = vst.msk [vmem:[#allocation4 + $0x30] sm:$0xff] %vm2343_vm10, %v3784_v17  ;;  %v3540_v34 = vpop.permute.xlu1 %3539 }
 0x83d   : > { %3989 = vst.msk [vmem:[#allocation4 + $0x37] sm:$0xff] %vm3982_vm12, %v3906_v53  ;;  %3175 = vrot.lane.b32.xlu0 %v7150_v60, %s5273_s16 }
 0x83e   : > { %3173 = vrot.lane.b32.xlu1 %v7154_v63, %s5273_s16 }
 0x83f   : > { %v3410_v51 = vpop.permute.xlu0 %3409 }
 0x840   : > { %v3038_v24 = vpop.permute.xlu1 %3037 }
 0x841   : > { %3119 = vst.msk [vmem:[#allocation4 + $0x50] sm:$0xff] %vm2156_vm4, %v3038_v24  ;;  %3680 = vrot.lane.b32.xlu0 %v7150_v60, %s5283_s25 }
 0x842   : > { %3241 = vst.msk [vmem:[#allocation4 + $0x57] sm:$0xff] %vm3232_vm14, %v3160_v38  ;;  %3678 = vrot.lane.b32.xlu1 %v7154_v63, %s5283_s25 }
 0x843   : > { %v3904_v41 = vpop.permute.xlu0 %3903 }
 0x844   : > { %3988 = vst.msk [vmem:[#allocation4 + $0x2f] sm:$0xfe] %vm2372_vm11, %v3904_v41  ;;  %v3158_v61 = vpop.permute.xlu1 %3157  ;;  %v4019_v16 = vld [vmem:[#allocation4 + $0x38] sm:$0xff] }
 0x845   : > { %3240 = vst.msk [vmem:[#allocation4 + $0x4f] sm:$0xfe] %vm2185_vm5, %v3158_v61  ;;  %3298 = vrot.lane.b32.xlu0 %v7150_v60, %s5278_s23 }
 0x846   : > { %3296 = vrot.lane.b32.xlu1 %v7154_v63, %s5278_s23 }
 0x847   : > { %v3538_v35 = vpop.permute.xlu0 %3537 }
 0x848   : > { %v3281_v55 = vpop.permute.xlu1 %3280 }
 0x849   : > { %3369 = vst.msk [vmem:[#allocation4 + $0x41] sm:$0xff] %vm3360_vm15, %v3281_v55  ;;  %3801 = vrot.lane.b32.xlu0 %v7150_v60, %s5284_s13 }
 0x84a   : > { %3497 = vst.msk [vmem:[#allocation4 + $0x40] sm:$0xff] %vm2251_vm7, %v3410_v51  ;;  %3498 = vst.msk [vmem:[#allocation4 + $0x48] sm:$0xff] %vm2251_vm7, %v3412_v58  ;;  %3799 = vrot.lane.b32.xlu1 %v7154_v63, %s5284_s13 }
 0x84b   : > { %3626 = vst.msk [vmem:[#allocation4 + $0x3f] sm:$0xfe] %vm2284_vm8, %v3538_v35  ;;  %v3044_v26 = vpop.permute.xlu0 %3043  ;;  %v4018_v59 = vld [vmem:[#allocation4 + $0x30] sm:$0xff] }
 0x84c   : > { %3627 = vst.msk [vmem:[#allocation4 + $0x47] sm:$0xff] %vm3618_vm3, %v3540_v34  ;;  %5023 = vmatprep.mubr.msk.f32.mxu1 %vm2110_vm0, %v4018_v59  ;;  %v3669_v39 = vpop.permute.xlu1 %3668 }
 0x84d   : > { %3122 = vst.msk [vmem:[#allocation4 + $0x68] sm:$0xff] %vm2156_vm4, %v3044_v26  ;;  %5024 = vmatmul.mubr.msk.f32.gmra.mrb[28].mxu1 %vm2110_vm0, %v4019_v16  ;;  %3427 = vrot.lane.b32.xlu0 %v7150_v60, %s5280_s21 }
 0x84e   : > { %3750 = vst.msk [vmem:[#allocation4 + $0x49] sm:$0x7f] %vm2314_vm9, %v3669_v39  ;;  %3425 = vrot.lane.b32.xlu1 %v7154_v63, %s5280_s21 }
 0x84f   : > { %v3164_v37 = vpop.permute.xlu0 %3163 }
 0x850   : > { %v3790_v43 = vpop.permute.xlu1 %3789 }
 0x851   : > { %3921 = vrot.lane.b32.xlu0 %v7150_v60, %s5285_s19 }
 0x852   : > { %3919 = vrot.lane.b32.xlu1 %v7154_v63, %s5285_s19 }
 0x853   : > { %v3287_v44 = vpop.permute.xlu0 %3286 }
 0x854   : > { %3372 = vst.msk [vmem:[#allocation4 + $0x59] sm:$0x7f] %vm2218_vm6, %v3287_v44  ;;  %v3416_v18 = vpop.permute.xlu1 %3415 }
 0x855   : > { %3555 = vrot.lane.b32.xlu0 %v7150_v60, %s5282_s29 }
 0x856   : > { %3553 = vrot.lane.b32.xlu1 %v7154_v63, %s5282_s29 }
 0x857   : > { %v3667_v0 = vpop.permute.xlu0 %3666 }
 0x858   : > { %3749 = vst.msk [vmem:[#allocation4 + $0x41] sm:$0xff] %vm3740_vm2, %v3667_v0  ;;  %v3910_v33 = vpop.permute.xlu1 %3909 }
 0x859   : > { %3870 = vst.msk [vmem:[#allocation4 + $0x48] sm:$0xff] %vm2343_vm10, %v3790_v43  ;;  %3059 = vrot.lane.b32.xlu0 %v7166_v36, %s5277_s20 }
 0x85a   : > { %3057 = vrot.lane.b32.xlu1 %v7170_v19, %s5277_s20 }
 0x85b   : > { %v3788_v31 = vpop.permute.xlu0 %3787 }
 0x85c   : > { %3869 = vst.msk [vmem:[#allocation4 + $0x40] sm:$0xff] %vm2343_vm10, %v3788_v31  ;;  %v3544_v46 = vpop.permute.xlu1 %3543 }
 0x85d   : > { %3991 = vst.msk [vmem:[#allocation4 + $0x47] sm:$0xff] %vm3982_vm12, %v3910_v33  ;;  %3179 = vrot.lane.b32.xlu0 %v7166_v36, %s5273_s16 }
 0x85e   : > { %3177 = vrot.lane.b32.xlu1 %v7170_v19, %s5273_s16 }
 0x85f   : > { %v3414_v60 = vpop.permute.xlu0 %3413 }
 0x860   : > { %v3042_v63 = vpop.permute.xlu1 %3041 }
 0x861   : > { %3121 = vst.msk [vmem:[#allocation4 + $0x60] sm:$0xff] %vm2156_vm4, %v3042_v63  ;;  %3684 = vrot.lane.b32.xlu0 %v7166_v36, %s5283_s25 }
 0x862   : > { %3243 = vst.msk [vmem:[#allocation4 + $0x67] sm:$0xff] %vm3232_vm14, %v3164_v37  ;;  %3682 = vrot.lane.b32.xlu1 %v7170_v19, %s5283_s25 }
 0x863   : > { %v3908_v2 = vpop.permute.xlu0 %3907 }
 0x864   : > { %3990 = vst.msk [vmem:[#allocation4 + $0x3f] sm:$0xfe] %vm2372_vm11, %v3908_v2  ;;  %v3162_v40 = vpop.permute.xlu1 %3161  ;;  %v4021_v49 = vld [vmem:[#allocation4 + $0x48] sm:$0xff] }
 0x865   : > { %3242 = vst.msk [vmem:[#allocation4 + $0x5f] sm:$0xfe] %vm2185_vm5, %v3162_v40  ;;  %3302 = vrot.lane.b32.xlu0 %v7166_v36, %s5278_s23 }
 0x866   : > { %3300 = vrot.lane.b32.xlu1 %v7170_v19, %s5278_s23 }
 0x867   : > { %v3542_v45 = vpop.permute.xlu0 %3541 }
 0x868   : > { %v3285_v27 = vpop.permute.xlu1 %3284 }
 0x869   : > { %3371 = vst.msk [vmem:[#allocation4 + $0x51] sm:$0xff] %vm3360_vm15, %v3285_v27  ;;  %3805 = vrot.lane.b32.xlu0 %v7166_v36, %s5284_s13 }
 0x86a   : > { %3499 = vst.msk [vmem:[#allocation4 + $0x50] sm:$0xff] %vm2251_vm7, %v3414_v60  ;;  %3500 = vst.msk [vmem:[#allocation4 + $0x58] sm:$0xff] %vm2251_vm7, %v3416_v18  ;;  %3803 = vrot.lane.b32.xlu1 %v7170_v19, %s5284_s13 }
 0x86b   : > { %3628 = vst.msk [vmem:[#allocation4 + $0x4f] sm:$0xfe] %vm2284_vm8, %v3542_v45  ;;  %v3048_v22 = vpop.permute.xlu0 %3047  ;;  %v4020_v15 = vld [vmem:[#allocation4 + $0x40] sm:$0xff] }
 0x86c   : > { %3629 = vst.msk [vmem:[#allocation4 + $0x57] sm:$0xff] %vm3618_vm3, %v3544_v46  ;;  %5026 = vmatprep.mubr.msk.f32.mxu1 %vm2110_vm0, %v4020_v15  ;;  %v3673_v38 = vpop.permute.xlu1 %3672 }
 0x86d   : > { %3124 = vst.msk [vmem:[#allocation4 + $0x78] sm:$0xff] %vm2156_vm4, %v3048_v22  ;;  %5027 = vmatmul.mubr.msk.f32.gmra.mrb[30].mxu1 %vm2110_vm0, %v4021_v49  ;;  %3431 = vrot.lane.b32.xlu0 %v7166_v36, %s5280_s21 }
 0x86e   : > { %3752 = vst.msk [vmem:[#allocation4 + $0x59] sm:$0x7f] %vm2314_vm9, %v3673_v38  ;;  %3429 = vrot.lane.b32.xlu1 %v7170_v19, %s5280_s21 }
 0x86f   : > { %v3168_v13 = vpop.permute.xlu0 %3167 }
 0x870   : > { %v3046_v58 = vpop.permute.xlu1 %3045 }
 0x871   : > { %3123 = vst.msk [vmem:[#allocation4 + $0x70] sm:$0xff] %vm2156_vm4, %v3046_v58  ;;  %3925 = vrot.lane.b32.xlu0 %v7166_v36, %s5285_s19 }
 0x872   : > { %3245 = vst.msk [vmem:[#allocation4 + $0x77] sm:$0xff] %vm3232_vm14, %v3168_v13  ;;  %3923 = vrot.lane.b32.xlu1 %v7170_v19, %s5285_s19 }
 0x873   : > { %v3291_v54 = vpop.permute.xlu0 %3290 }
 0x874   : > { %3374 = vst.msk [vmem:[#allocation4 + $0x69] sm:$0x7f] %vm2218_vm6, %v3291_v54  ;;  %v3166_v53 = vpop.permute.xlu1 %3165 }
 0x875   : > { %3244 = vst.msk [vmem:[#allocation4 + $0x6f] sm:$0xfe] %vm2185_vm5, %v3166_v53  ;;  %3559 = vrot.lane.b32.xlu0 %v7166_v36, %s5282_s29 }
 0x876   : > { %3557 = vrot.lane.b32.xlu1 %v7170_v19, %s5282_s29 }
 0x877   : > { %v3794_v17 = vpop.permute.xlu0 %3793 }
 0x878   : > { %v3289_v34 = vpop.permute.xlu1 %3288 }
 0x879   : > { %3373 = vst.msk [vmem:[#allocation4 + $0x61] sm:$0xff] %vm3360_vm15, %v3289_v34  ;;  %3063 = vrot.lane.b32.xlu0 %v7182_v42, %s5277_s20 }
 0x87a   : > { %3061 = vrot.lane.b32.xlu1 %v7186_v50, %s5277_s20 }
 0x87b   : > { %v3420_v51 = vpop.permute.xlu0 %3419 }
 0x87c   : > { %3502 = vst.msk [vmem:[#allocation4 + $0x68] sm:$0xff] %vm2251_vm7, %v3420_v51  ;;  %v3792_v24 = vpop.permute.xlu1 %3791 }
 0x87d   : > { %3183 = vrot.lane.b32.xlu0 %v7182_v42, %s5273_s16 }
 0x87e   : > { %3181 = vrot.lane.b32.xlu1 %v7186_v50, %s5273_s16 }
 0x87f   : > { %v3914_v36 = vpop.permute.xlu0 %3913 }
 0x880   : > { %v3418_v19 = vpop.permute.xlu1 %3417 }
 0x881   : > { %3501 = vst.msk [vmem:[#allocation4 + $0x60] sm:$0xff] %vm2251_vm7, %v3418_v19  ;;  %3688 = vrot.lane.b32.xlu0 %v7182_v42, %s5283_s25 }
 0x882   : > { %3686 = vrot.lane.b32.xlu1 %v7186_v50, %s5283_s25 }
 0x883   : > { %v3548_v41 = vpop.permute.xlu0 %3547 }
 0x884   : > { %3631 = vst.msk [vmem:[#allocation4 + $0x67] sm:$0xff] %vm3618_vm3, %v3548_v41  ;;  %v3912_v61 = vpop.permute.xlu1 %3911 }
 0x885   : > { %3306 = vrot.lane.b32.xlu0 %v7182_v42, %s5278_s23 }
 0x886   : > { %3304 = vrot.lane.b32.xlu1 %v7186_v50, %s5278_s23 }
 0x887   : > { %v3671_v35 = vpop.permute.xlu0 %3670 }
 0x888   : > { %3751 = vst.msk [vmem:[#allocation4 + $0x51] sm:$0xff] %vm3740_vm2, %v3671_v35  ;;  %v3546_v55 = vpop.permute.xlu1 %3545 }
 0x889   : > { %3871 = vst.msk [vmem:[#allocation4 + $0x50] sm:$0xff] %vm2343_vm10, %v3792_v24  ;;  %3872 = vst.msk [vmem:[#allocation4 + $0x58] sm:$0xff] %vm2343_vm10, %v3794_v17  ;;  %3809 = vrot.lane.b32.xlu0 %v7182_v42, %s5284_s13 }
 0x88a   : > { %3630 = vst.msk [vmem:[#allocation4 + $0x5f] sm:$0xfe] %vm2284_vm8, %v3546_v55  ;;  %3807 = vrot.lane.b32.xlu1 %v7186_v50, %s5284_s13 }
 0x88b   : > { %3992 = vst.msk [vmem:[#allocation4 + $0x4f] sm:$0xfe] %vm2372_vm11, %v3912_v61  ;;  %v3052_v26 = vpop.permute.xlu0 %3051 }
 0x88c   : > { %3993 = vst.msk [vmem:[#allocation4 + $0x57] sm:$0xff] %vm3982_vm12, %v3914_v36  ;;  %v3050_v59 = vpop.permute.xlu1 %3049 }
 0x88d   : > { %3126 = vst.msk [vmem:[#allocation4 + $0x88] sm:$0xff] %vm2156_vm4, %v3052_v26  ;;  %3125 = vst.msk [vmem:[#allocation4 + $0x80] sm:$0xff] %vm2156_vm4, %v3050_v59  ;;  %3435 = vrot.lane.b32.xlu0 %v7182_v42, %s5280_s21 }
 0x88e   : > { %3433 = vrot.lane.b32.xlu1 %v7186_v50, %s5280_s21 }
 0x88f   : > { %v3172_v39 = vpop.permute.xlu0 %3171 }
 0x890   : > { %3247 = vst.msk [vmem:[#allocation4 + $0x87] sm:$0xff] %vm3232_vm14, %v3172_v39  ;;  %v3170_v16 = vpop.permute.xlu1 %3169 }
 0x891   : > { %3246 = vst.msk [vmem:[#allocation4 + $0x7f] sm:$0xfe] %vm2185_vm5, %v3170_v16  ;;  %3929 = vrot.lane.b32.xlu0 %v7182_v42, %s5285_s19 }
 0x892   : > { %3927 = vrot.lane.b32.xlu1 %v7186_v50, %s5285_s19 }
 0x893   : > { %v4022_v37 = vld [vmem:[#allocation4 + $0x50] sm:$0xff]  ;;  %v4023_v43 = vld [vmem:[#allocation4 + $0x58] sm:$0xff]  ;;  %v3677_v44 = vpop.permute.xlu0 %3676 }
 0x894   : > { %5029 = vmatprep.mubr.msk.f32.mxu1 %vm2110_vm0, %v4022_v37  ;;  %3754 = vst.msk [vmem:[#allocation4 + $0x69] sm:$0x7f] %vm2314_vm9, %v3677_v44  ;;  %v3675_v18 = vpop.permute.xlu1 %3674 }
 0x895   : > { %5030 = vmatmul.mubr.msk.f32.gmra.mrb[32].mxu1 %vm2110_vm0, %v4023_v43  ;;  %3753 = vst.msk [vmem:[#allocation4 + $0x61] sm:$0xff] %vm3740_vm2, %v3675_v18  ;;  %3563 = vrot.lane.b32.xlu0 %v7182_v42, %s5282_s29 }
 0x896   : > { %3561 = vrot.lane.b32.xlu1 %v7186_v50, %s5282_s29 }
 0x897   : > { %v3295_v0 = vpop.permute.xlu0 %3294 }
 0x898   : > { %3376 = vst.msk [vmem:[#allocation4 + $0x79] sm:$0x7f] %vm2218_vm6, %v3295_v0  ;;  %v3293_v33 = vpop.permute.xlu1 %3292 }
 0x899   : > { %3375 = vst.msk [vmem:[#allocation4 + $0x71] sm:$0xff] %vm3360_vm15, %v3293_v33  ;;  %3067 = vrot.lane.b32.xlu0 %v7198_v29, %s5277_s20 }
 0x89a   : > { %3065 = vrot.lane.b32.xlu1 %v7202_v47, %s5277_s20 }
 0x89b   : > { %v3798_v31 = vpop.permute.xlu0 %3797 }
 0x89c   : > { %3874 = vst.msk [vmem:[#allocation4 + $0x68] sm:$0xff] %vm2343_vm10, %v3798_v31  ;;  %v3796_v46 = vpop.permute.xlu1 %3795 }
 0x89d   : > { %3873 = vst.msk [vmem:[#allocation4 + $0x60] sm:$0xff] %vm2343_vm10, %v3796_v46  ;;  %3187 = vrot.lane.b32.xlu0 %v7198_v29, %s5273_s16 }
 0x89e   : > { %3185 = vrot.lane.b32.xlu1 %v7202_v47, %s5273_s16 }
 0x89f   : > { %v3424_v42 = vpop.permute.xlu0 %3423 }
 0x8a0   : > { %3504 = vst.msk [vmem:[#allocation4 + $0x78] sm:$0xff] %vm2251_vm7, %v3424_v42  ;;  %v3422_v50 = vpop.permute.xlu1 %3421 }
 0x8a1   : > { %3503 = vst.msk [vmem:[#allocation4 + $0x70] sm:$0xff] %vm2251_vm7, %v3422_v50  ;;  %3692 = vrot.lane.b32.xlu0 %v7198_v29, %s5283_s25 }
 0x8a2   : > { %3690 = vrot.lane.b32.xlu1 %v7202_v47, %s5283_s25 }
 0x8a3   : > { %v3918_v60 = vpop.permute.xlu0 %3917 }
 0x8a4   : > { %3995 = vst.msk [vmem:[#allocation4 + $0x67] sm:$0xff] %vm3982_vm12, %v3918_v60  ;;  %v3916_v63 = vpop.permute.xlu1 %3915 }
 0x8a5   : > { %3994 = vst.msk [vmem:[#allocation4 + $0x5f] sm:$0xfe] %vm2372_vm11, %v3916_v63  ;;  %3310 = vrot.lane.b32.xlu0 %v7198_v29, %s5278_s23 }
 0x8a6   : > { %3308 = vrot.lane.b32.xlu1 %v7202_v47, %s5278_s23 }
 0x8a7   : > { %v3552_v2 = vpop.permute.xlu0 %3551 }
 0x8a8   : > { %3633 = vst.msk [vmem:[#allocation4 + $0x77] sm:$0xff] %vm3618_vm3, %v3552_v2  ;;  %v3550_v40 = vpop.permute.xlu1 %3549 }
 0x8a9   : > { %3632 = vst.msk [vmem:[#allocation4 + $0x6f] sm:$0xfe] %vm2284_vm8, %v3550_v40  ;;  %3813 = vrot.lane.b32.xlu0 %v7198_v29, %s5284_s13 }
 0x8aa   : > { %3811 = vrot.lane.b32.xlu1 %v7202_v47, %s5284_s13 }
 0x8ab   : > { %v3056_v45 = vpop.permute.xlu0 %3055  ;;  %v4025_v15 = vld [vmem:[#allocation4 + $0x68] sm:$0xff] }
 0x8ac   : > { %3128 = vst.msk [vmem:[#allocation4 + $0x98] sm:$0xff] %vm2156_vm4, %v3056_v45  ;;  %v3054_v27 = vpop.permute.xlu1 %3053  ;;  %v4024_v22 = vld [vmem:[#allocation4 + $0x60] sm:$0xff] }
 0x8ad   : > { %3127 = vst.msk [vmem:[#allocation4 + $0x90] sm:$0xff] %vm2156_vm4, %v3054_v27  ;;  %5032 = vmatprep.mubr.msk.f32.mxu1 %vm2110_vm0, %v4024_v22  ;;  %3439 = vrot.lane.b32.xlu0 %v7198_v29, %s5280_s21 }
 0x8ae   : > { %5033 = vmatmul.mubr.msk.f32.gmra.mrb[34].mxu1 %vm2110_vm0, %v4025_v15  ;;  %3437 = vrot.lane.b32.xlu1 %v7202_v47, %s5280_s21 }
 0x8af   : > { %v3176_v38 = vpop.permute.xlu0 %3175 }
 0x8b0   : > { %3249 = vst.msk [vmem:[#allocation4 + $0x97] sm:$0xff] %vm3232_vm14, %v3176_v38  ;;  %v3174_v49 = vpop.permute.xlu1 %3173 }
 0x8b1   : > { %3248 = vst.msk [vmem:[#allocation4 + $0x8f] sm:$0xfe] %vm2185_vm5, %v3174_v49  ;;  %3933 = vrot.lane.b32.xlu0 %v7198_v29, %s5285_s19 }
 0x8b2   : > { %3931 = vrot.lane.b32.xlu1 %v7202_v47, %s5285_s19 }
 0x8b3   : > { %v3681_v13 = vpop.permute.xlu0 %3680 }
 0x8b4   : > { %3756 = vst.msk [vmem:[#allocation4 + $0x79] sm:$0x7f] %vm2314_vm9, %v3681_v13  ;;  %v3679_v58 = vpop.permute.xlu1 %3678 }
 0x8b5   : > { %3755 = vst.msk [vmem:[#allocation4 + $0x71] sm:$0xff] %vm3740_vm2, %v3679_v58  ;;  %3567 = vrot.lane.b32.xlu0 %v7198_v29, %s5282_s29 }
 0x8b6   : > { %3565 = vrot.lane.b32.xlu1 %v7202_v47, %s5282_s29 }
 0x8b7   : > { %v3299_v54 = vpop.permute.xlu0 %3298 }
 0x8b8   : > { %3378 = vst.msk [vmem:[#allocation4 + $0x89] sm:$0x7f] %vm2218_vm6, %v3299_v54  ;;  %v3297_v53 = vpop.permute.xlu1 %3296 }
 0x8b9   : > { %3377 = vst.msk [vmem:[#allocation4 + $0x81] sm:$0xff] %vm3360_vm15, %v3297_v53  ;;  %3071 = vrot.lane.b32.xlu0 %v7214_v30, %s5277_s20 }
 0x8ba   : > { %3069 = vrot.lane.b32.xlu1 %v7218_v1, %s5277_s20 }
 0x8bb   : > { %v3802_v17 = vpop.permute.xlu0 %3801 }
 0x8bc   : > { %3876 = vst.msk [vmem:[#allocation4 + $0x78] sm:$0xff] %vm2343_vm10, %v3802_v17  ;;  %v3800_v34 = vpop.permute.xlu1 %3799 }
 0x8bd   : > { %3875 = vst.msk [vmem:[#allocation4 + $0x70] sm:$0xff] %vm2343_vm10, %v3800_v34  ;;  %3191 = vrot.lane.b32.xlu0 %v7214_v30, %s5273_s16 }
 0x8be   : > { %3189 = vrot.lane.b32.xlu1 %v7218_v1, %s5273_s16 }
 0x8bf   : > { %v3428_v29 = vpop.permute.xlu0 %3427 }
 0x8c0   : > { %3506 = vst.msk [vmem:[#allocation4 + $0x88] sm:$0xff] %vm2251_vm7, %v3428_v29  ;;  %v3426_v47 = vpop.permute.xlu1 %3425 }
 0x8c1   : > { %3505 = vst.msk [vmem:[#allocation4 + $0x80] sm:$0xff] %vm2251_vm7, %v3426_v47  ;;  %3696 = vrot.lane.b32.xlu0 %v7214_v30, %s5283_s25 }
 0x8c2   : > { %3694 = vrot.lane.b32.xlu1 %v7218_v1, %s5283_s25 }
 0x8c3   : > { %v3922_v51 = vpop.permute.xlu0 %3921 }
 0x8c4   : > { %3997 = vst.msk [vmem:[#allocation4 + $0x77] sm:$0xff] %vm3982_vm12, %v3922_v51  ;;  %v3920_v24 = vpop.permute.xlu1 %3919 }
 0x8c5   : > { %3996 = vst.msk [vmem:[#allocation4 + $0x6f] sm:$0xfe] %vm2372_vm11, %v3920_v24  ;;  %3314 = vrot.lane.b32.xlu0 %v7214_v30, %s5278_s23 }
 0x8c6   : > { %3312 = vrot.lane.b32.xlu1 %v7218_v1, %s5278_s23 }
 0x8c7   : > { %v3556_v36 = vpop.permute.xlu0 %3555 }
 0x8c8   : > { %3635 = vst.msk [vmem:[#allocation4 + $0x87] sm:$0xff] %vm3618_vm3, %v3556_v36  ;;  %v3554_v19 = vpop.permute.xlu1 %3553 }
 0x8c9   : > { %3634 = vst.msk [vmem:[#allocation4 + $0x7f] sm:$0xfe] %vm2284_vm8, %v3554_v19  ;;  %3817 = vrot.lane.b32.xlu0 %v7214_v30, %s5284_s13 }
 0x8ca   : > { %3815 = vrot.lane.b32.xlu1 %v7218_v1, %s5284_s13 }
 0x8cb   : > { %v3060_v41 = vpop.permute.xlu0 %3059  ;;  %v4027_v55 = vld [vmem:[#allocation4 + $0x78] sm:$0xff] }
 0x8cc   : > { %3130 = vst.msk [vmem:[#allocation4 + $0xa8] sm:$0xff] %vm2156_vm4, %v3060_v41  ;;  %v3058_v61 = vpop.permute.xlu1 %3057  ;;  %v4026_v35 = vld [vmem:[#allocation4 + $0x70] sm:$0xff] }
 0x8cd   : > { %3129 = vst.msk [vmem:[#allocation4 + $0xa0] sm:$0xff] %vm2156_vm4, %v3058_v61  ;;  %5035 = vmatprep.mubr.msk.f32.mxu1 %vm2110_vm0, %v4026_v35  ;;  %3443 = vrot.lane.b32.xlu0 %v7214_v30, %s5280_s21 }
 0x8ce   : > { %5036 = vmatmul.mubr.msk.f32.gmra.mrb[36].mxu1 %vm2110_vm0, %v4027_v55  ;;  %3441 = vrot.lane.b32.xlu1 %v7218_v1, %s5280_s21 }
 0x8cf   : > { %v3180_v26 = vpop.permute.xlu0 %3179 }
 0x8d0   : > { %3251 = vst.msk [vmem:[#allocation4 + $0xa7] sm:$0xff] %vm3232_vm14, %v3180_v26  ;;  %v3178_v59 = vpop.permute.xlu1 %3177 }
 0x8d1   : > { %3250 = vst.msk [vmem:[#allocation4 + $0x9f] sm:$0xfe] %vm2185_vm5, %v3178_v59  ;;  %3937 = vrot.lane.b32.xlu0 %v7214_v30, %s5285_s19 }
 0x8d2   : > { %3935 = vrot.lane.b32.xlu1 %v7218_v1, %s5285_s19 }
 0x8d3   : > { %v3685_v39 = vpop.permute.xlu0 %3684 }
 0x8d4   : > { %3758 = vst.msk [vmem:[#allocation4 + $0x89] sm:$0x7f] %vm2314_vm9, %v3685_v39  ;;  %v3683_v16 = vpop.permute.xlu1 %3682 }
 0x8d5   : > { %3757 = vst.msk [vmem:[#allocation4 + $0x81] sm:$0xff] %vm3740_vm2, %v3683_v16  ;;  %3571 = vrot.lane.b32.xlu0 %v7214_v30, %s5282_s29  ;;  %v7802_v30 = vld [vmem:[%s8146_s8] ss:$0 sm:$0xff] }
 0x8d6   : > { %3569 = vrot.lane.b32.xlu1 %v7218_v1, %s5282_s29 }
 0x8d7   : > { %v3303_v37 = vpop.permute.xlu0 %3302 }
 0x8d8   : > { %3380 = vst.msk [vmem:[#allocation4 + $0x99] sm:$0x7f] %vm2218_vm6, %v3303_v37  ;;  %v3301_v43 = vpop.permute.xlu1 %3300 }
 0x8d9   : > { %3379 = vst.msk [vmem:[#allocation4 + $0x91] sm:$0xff] %vm3360_vm15, %v3301_v43  ;;  %3075 = vrot.lane.b32.xlu0 %v7236_v25, %s5277_s20 }
 0x8da   : > { %3073 = vrot.lane.b32.xlu1 %v7240_v32, %s5277_s20 }
 0x8db   : > { %v3806_v44 = vpop.permute.xlu0 %3805 }
 0x8dc   : > { %3878 = vst.msk [vmem:[#allocation4 + $0x88] sm:$0xff] %vm2343_vm10, %v3806_v44  ;;  %v3804_v18 = vpop.permute.xlu1 %3803 }
 0x8dd   : > { %3877 = vst.msk [vmem:[#allocation4 + $0x80] sm:$0xff] %vm2343_vm10, %v3804_v18  ;;  %3195 = vrot.lane.b32.xlu0 %v7236_v25, %s5273_s16 }
 0x8de   : > { %3193 = vrot.lane.b32.xlu1 %v7240_v32, %s5273_s16 }
 0x8df   : > { %v3432_v1 = vpop.permute.xlu0 %3431 }
 0x8e0   : > { %3508 = vst.msk [vmem:[#allocation4 + $0x98] sm:$0xff] %vm2251_vm7, %v3432_v1  ;;  %v5019_v0 = vpop.f32.mrb[24].mxu1  ;;  %v3430_v33 = vpop.permute.xlu1 %3429 }
 0x8e1   : > { %v4238_v31 = vadd.f32 %v5019_v0, %v7802_v30  ;;  %3507 = vst.msk [vmem:[#allocation4 + $0x90] sm:$0xff] %vm2251_vm7, %v3430_v33  ;;  %v4232_v46 = vpop.f32.mrb[25].mxu1  ;;  %3700 = vrot.lane.b32.xlu0 %v7236_v25, %s5283_s25  ;;  %v8250_v0 = vmax.f32 %v6575_v14, 0.0 }
 0x8e2   : > { %v4233_v42 = vadd.f32 %v7802_v30, %v4232_v46  ;;  %3698 = vrot.lane.b32.xlu1 %v7240_v32, %s5283_s25  ;;  %v8251_v46 = vmax.f32 %v6578_v52, 0.0 }
 0x8e3   : > { %v4384_v50 = vmax.f32 %v4238_v31, 0.0  ;;  %v3926_v60 = vpop.permute.xlu0 %3925  ;;  %v2926_v33 = vadd.f32 %v7276_v57, %v8250_v0 }
 0x8e4   : > { %v4383_v63 = vmax.f32 %v4233_v42, 0.0  ;;  %3999 = vst.msk [vmem:[#allocation4 + $0x87] sm:$0xff] %vm3982_vm12, %v3926_v60  ;;  %v3924_v2 = vpop.permute.xlu1 %3923  ;;  %v2925_v42 = vadd.f32 %v7280_v48, %v8251_v46 }
 0x8e5   : > { %v4416_v40 = vadd.f32 %v4384_v50, %v5435_v3  ;;  %3998 = vst.msk [vmem:[#allocation4 + $0x7f] sm:$0xfe] %vm2372_vm11, %v3924_v2  ;;  %3318 = vrot.lane.b32.xlu0 %v7236_v25, %s5278_s23 }
 0x8e6   : > { %v4415_v45 = vadd.f32 %v4383_v63, %v5442_v4  ;;  %3316 = vrot.lane.b32.xlu1 %v7240_v32, %s5278_s23 }
 0x8e7   : > { %4448 = vst.msk [vmem:[%s7817_s24 + $0x18] sm:$0xff] %vm399_vm1, %v4416_v40  ;;  %v3560_v27 = vpop.permute.xlu0 %3559 }
 0x8e8   : > { %4447 = vst.msk [vmem:[%s7817_s24 + $0x10] sm:$0xff] %vm399_vm1, %v4415_v45  ;;  %v3558_v22 = vpop.permute.xlu1 %3557 }
 0x8e9   : > { %3637 = vst.msk [vmem:[#allocation4 + $0x97] sm:$0xff] %vm3618_vm3, %v3560_v27  ;;  %3821 = vrot.lane.b32.xlu0 %v7236_v25, %s5284_s13 }
 0x8ea   : > { %3636 = vst.msk [vmem:[#allocation4 + $0x8f] sm:$0xfe] %vm2284_vm8, %v3558_v22  ;;  %3819 = vrot.lane.b32.xlu1 %v7240_v32, %s5284_s13 }
 0x8eb   : > { %v3064_v3 = vpop.permute.xlu0 %3063  ;;  %v4029_v38 = vld [vmem:[#allocation4 + $0x88] sm:$0xff] }
 0x8ec   : > { %3132 = vst.msk [vmem:[#allocation4 + $0xb8] sm:$0xff] %vm2156_vm4, %v3064_v3  ;;  %v3062_v4 = vpop.permute.xlu1 %3061  ;;  %v4028_v15 = vld [vmem:[#allocation4 + $0x80] sm:$0xff] }
 0x8ed   : > { %3131 = vst.msk [vmem:[#allocation4 + $0xb0] sm:$0xff] %vm2156_vm4, %v3062_v4  ;;  %5038 = vmatprep.mubr.msk.f32.mxu1 %vm2110_vm0, %v4028_v15  ;;  %3447 = vrot.lane.b32.xlu0 %v7236_v25, %s5280_s21 }
 0x8ee   : > { %5039 = vmatmul.mubr.msk.f32.gmra.mrb[38].mxu1 %vm2110_vm0, %v4029_v38  ;;  %3445 = vrot.lane.b32.xlu1 %v7240_v32, %s5280_s21 }
 0x8ef   : > { %v3184_v49 = vpop.permute.xlu0 %3183 }
 0x8f0   : > { %3253 = vst.msk [vmem:[#allocation4 + $0xb7] sm:$0xff] %vm3232_vm14, %v3184_v49  ;;  %v3182_v13 = vpop.permute.xlu1 %3181 }
 0x8f1   : > { %3252 = vst.msk [vmem:[#allocation4 + $0xaf] sm:$0xfe] %vm2185_vm5, %v3182_v13  ;;  %3941 = vrot.lane.b32.xlu0 %v7236_v25, %s5285_s19 }
 0x8f2   : > { %3939 = vrot.lane.b32.xlu1 %v7240_v32, %s5285_s19 }
 0x8f3   : > { %v3689_v58 = vpop.permute.xlu0 %3688 }
 0x8f4   : > { %3760 = vst.msk [vmem:[#allocation4 + $0x99] sm:$0x7f] %vm2314_vm9, %v3689_v58  ;;  %v3687_v54 = vpop.permute.xlu1 %3686 }
 0x8f5   : > { %3759 = vst.msk [vmem:[#allocation4 + $0x91] sm:$0xff] %vm3740_vm2, %v3687_v54  ;;  %3575 = vrot.lane.b32.xlu0 %v7236_v25, %s5282_s29 }
 0x8f6   : > { %3573 = vrot.lane.b32.xlu1 %v7240_v32, %s5282_s29 }
 0x8f7   : > { %v3307_v53 = vpop.permute.xlu0 %3306 }
 0x8f8   : > { %3382 = vst.msk [vmem:[#allocation4 + $0xa9] sm:$0x7f] %vm2218_vm6, %v3307_v53  ;;  %v3305_v17 = vpop.permute.xlu1 %3304 }
 0x8f9   : > { %3381 = vst.msk [vmem:[#allocation4 + $0xa1] sm:$0xff] %vm3360_vm15, %v3305_v17  ;;  %3079 = vrot.lane.b32.xlu0 %v7258_v28, %s5277_s20 }
 0x8fa   : > { %3077 = vrot.lane.b32.xlu1 %v7262_v56, %s5277_s20 }
 0x8fb   : > { %v3810_v34 = vpop.permute.xlu0 %3809 }
 0x8fc   : > { %3880 = vst.msk [vmem:[#allocation4 + $0x98] sm:$0xff] %vm2343_vm10, %v3810_v34  ;;  %v3808_v29 = vpop.permute.xlu1 %3807 }
 0x8fd   : > { %3879 = vst.msk [vmem:[#allocation4 + $0x90] sm:$0xff] %vm2343_vm10, %v3808_v29  ;;  %3199 = vrot.lane.b32.xlu0 %v7258_v28, %s5273_s16 }
 0x8fe   : > { %3197 = vrot.lane.b32.xlu1 %v7262_v56, %s5273_s16 }
 0x8ff   : > { %v3436_v25 = vpop.permute.xlu0 %3435 }
 0x900   : > { %3510 = vst.msk [vmem:[#allocation4 + $0xa8] sm:$0xff] %vm2251_vm7, %v3436_v25  ;;  %v5022_v32 = vpop.f32.mrb[26].mxu1  ;;  %v3434_v47 = vpop.permute.xlu1 %3433 }
 0x901   : > { %v4248_v51 = vadd.f32 %v5022_v32, %v7802_v30  ;;  %3509 = vst.msk [vmem:[#allocation4 + $0xa0] sm:$0xff] %vm2251_vm7, %v3434_v47  ;;  %v4242_v24 = vpop.f32.mrb[27].mxu1  ;;  %3704 = vrot.lane.b32.xlu0 %v7258_v28, %s5283_s25 }
 0x902   : > { %v4243_v36 = vadd.f32 %v7802_v30, %v4242_v24  ;;  %3702 = vrot.lane.b32.xlu1 %v7262_v56, %s5283_s25 }
 0x903   : > { %v4386_v19 = vmax.f32 %v4248_v51, 0.0  ;;  %v3930_v41 = vpop.permute.xlu0 %3929 }
 0x904   : > { %v4385_v61 = vmax.f32 %v4243_v36, 0.0  ;;  %4001 = vst.msk [vmem:[#allocation4 + $0x97] sm:$0xff] %vm3982_vm12, %v3930_v41  ;;  %v3928_v35 = vpop.permute.xlu1 %3927 }
 0x905   : > { %v4418_v55 = vadd.f32 %v4386_v19, %v5445_v5  ;;  %4000 = vst.msk [vmem:[#allocation4 + $0x8f] sm:$0xfe] %vm2372_vm11, %v3928_v35  ;;  %3322 = vrot.lane.b32.xlu0 %v7258_v28, %s5278_s23 }
 0x906   : > { %v4417_v26 = vadd.f32 %v4385_v61, %v5454_v6  ;;  %3320 = vrot.lane.b32.xlu1 %v7262_v56, %s5278_s23 }
 0x907   : > { %4450 = vst.msk [vmem:[%s7817_s24 + $0x28] sm:$0xff] %vm399_vm1, %v4418_v55  ;;  %v3564_v59 = vpop.permute.xlu0 %3563 }
 0x908   : > { %4449 = vst.msk [vmem:[%s7817_s24 + $0x20] sm:$0xff] %vm399_vm1, %v4417_v26  ;;  %v3562_v39 = vpop.permute.xlu1 %3561 }
 0x909   : > { %3639 = vst.msk [vmem:[#allocation4 + $0xa7] sm:$0xff] %vm3618_vm3, %v3564_v59  ;;  %3825 = vrot.lane.b32.xlu0 %v7258_v28, %s5284_s13 }
 0x90a   : > { %3638 = vst.msk [vmem:[#allocation4 + $0x9f] sm:$0xfe] %vm2284_vm8, %v3562_v39  ;;  %3823 = vrot.lane.b32.xlu1 %v7262_v56, %s5284_s13 }
 0x90b   : > { %v3068_v5 = vpop.permute.xlu0 %3067  ;;  %v4031_v37 = vld [vmem:[#allocation4 + $0x98] sm:$0xff] }
 0x90c   : > { %3134 = vst.msk [vmem:[#allocation4 + $0xc8] sm:$0xff] %vm2156_vm4, %v3068_v5  ;;  %v3066_v6 = vpop.permute.xlu1 %3065  ;;  %v4030_v16 = vld [vmem:[#allocation4 + $0x90] sm:$0xff] }
 0x90d   : > { %3133 = vst.msk [vmem:[#allocation4 + $0xc0] sm:$0xff] %vm2156_vm4, %v3066_v6  ;;  %5041 = vmatprep.mubr.msk.f32.mxu1 %vm2110_vm0, %v4030_v16  ;;  %3451 = vrot.lane.b32.xlu0 %v7258_v28, %s5280_s21 }
 0x90e   : > { %5042 = vmatmul.mubr.msk.f32.gmra.mrb[40].mxu1 %vm2110_vm0, %v4031_v37  ;;  %3449 = vrot.lane.b32.xlu1 %v7262_v56, %s5280_s21 }
 0x90f   : > { %v3188_v43 = vpop.permute.xlu0 %3187 }
 0x910   : > { %3255 = vst.msk [vmem:[#allocation4 + $0xc7] sm:$0xff] %vm3232_vm14, %v3188_v43  ;;  %v3186_v44 = vpop.permute.xlu1 %3185 }
 0x911   : > { %3254 = vst.msk [vmem:[#allocation4 + $0xbf] sm:$0xfe] %vm2185_vm5, %v3186_v44  ;;  %3945 = vrot.lane.b32.xlu0 %v7258_v28, %s5285_s19 }
 0x912   : > { %3943 = vrot.lane.b32.xlu1 %v7262_v56, %s5285_s19 }
 0x913   : > { %v3693_v18 = vpop.permute.xlu0 %3692 }
 0x914   : > { %3762 = vst.msk [vmem:[#allocation4 + $0xa9] sm:$0x7f] %vm2314_vm9, %v3693_v18  ;;  %v3691_v1 = vpop.permute.xlu1 %3690 }
 0x915   : > { %3761 = vst.msk [vmem:[#allocation4 + $0xa1] sm:$0xff] %vm3740_vm2, %v3691_v1  ;;  %3579 = vrot.lane.b32.xlu0 %v7258_v28, %s5282_s29 }
 0x916   : > { %3577 = vrot.lane.b32.xlu1 %v7262_v56, %s5282_s29 }
 0x917   : > { %v3311_v31 = vpop.permute.xlu0 %3310 }
 0x918   : > { %3384 = vst.msk [vmem:[#allocation4 + $0xb9] sm:$0x7f] %vm2218_vm6, %v3311_v31  ;;  %v3309_v50 = vpop.permute.xlu1 %3308 }
 0x919   : > { %3383 = vst.msk [vmem:[#allocation4 + $0xb1] sm:$0xff] %vm3360_vm15, %v3309_v50  ;;  %3708 = vrot.lane.b32.xlu0 %v2926_v33, %s5283_s25 }
 0x91a   : > { %3706 = vrot.lane.b32.xlu1 %v2925_v42, %s5283_s25 }
 0x91b   : > { %v3814_v28 = vpop.permute.xlu0 %3813 }
 0x91c   : > { %3882 = vst.msk [vmem:[#allocation4 + $0xa8] sm:$0xff] %vm2343_vm10, %v3814_v28  ;;  %v3812_v14 = vpop.permute.xlu1 %3811 }
 0x91d   : > { %3881 = vst.msk [vmem:[#allocation4 + $0xa0] sm:$0xff] %vm2343_vm10, %v3812_v14  ;;  %3829 = vrot.lane.b32.xlu0 %v2926_v33, %s5284_s13 }
 0x91e   : > { %3827 = vrot.lane.b32.xlu1 %v2925_v42, %s5284_s13 }
 0x91f   : > { %v3440_v52 = vpop.permute.xlu0 %3439 }
 0x920   : > { %3512 = vst.msk [vmem:[#allocation4 + $0xb8] sm:$0xff] %vm2251_vm7, %v3440_v52  ;;  %v5025_v56 = vpop.f32.mrb[28].mxu1  ;;  %v3438_v57 = vpop.permute.xlu1 %3437 }
 0x921   : > { %v4258_v48 = vadd.f32 %v5025_v56, %v7802_v30  ;;  %3511 = vst.msk [vmem:[#allocation4 + $0xb0] sm:$0xff] %vm2251_vm7, %v3438_v57  ;;  %v4252_v60 = vpop.f32.mrb[29].mxu1  ;;  %3949 = vrot.lane.b32.xlu0 %v2926_v33, %s5285_s19 }
 0x922   : > { %v4253_v63 = vadd.f32 %v7802_v30, %v4252_v60  ;;  %3947 = vrot.lane.b32.xlu1 %v2925_v42, %s5285_s19 }
 0x923   : > { %v4388_v2 = vmax.f32 %v4258_v48, 0.0  ;;  %v3934_v40 = vpop.permute.xlu0 %3933 }
 0x924   : > { %v4387_v45 = vmax.f32 %v4253_v63, 0.0  ;;  %4003 = vst.msk [vmem:[#allocation4 + $0xa7] sm:$0xff] %vm3982_vm12, %v3934_v40  ;;  %v3932_v27 = vpop.permute.xlu1 %3931 }
 0x925   : > { %v4420_v22 = vadd.f32 %v4388_v2, %v5457_v7  ;;  %4002 = vst.msk [vmem:[#allocation4 + $0x9f] sm:$0xfe] %vm2372_vm11, %v3932_v27  ;;  %3326 = vrot.lane.b32.xlu0 %v2926_v33, %s5278_s23 }
 0x926   : > { %v4419_v3 = vadd.f32 %v4387_v45, %v5460_v8  ;;  %3324 = vrot.lane.b32.xlu1 %v2925_v42, %s5278_s23 }
 0x927   : > { %4452 = vst.msk [vmem:[%s7817_s24 + $0x38] sm:$0xff] %vm399_vm1, %v4420_v22  ;;  %v3568_v4 = vpop.permute.xlu0 %3567 }
 0x928   : > { %4451 = vst.msk [vmem:[%s7817_s24 + $0x30] sm:$0xff] %vm399_vm1, %v4419_v3  ;;  %v3566_v15 = vpop.permute.xlu1 %3565 }
 0x929   : > { %3641 = vst.msk [vmem:[#allocation4 + $0xb7] sm:$0xff] %vm3618_vm3, %v3568_v4  ;;  %3455 = vrot.lane.b32.xlu0 %v2926_v33, %s5280_s21 }
 0x92a   : > { %3640 = vst.msk [vmem:[#allocation4 + $0xaf] sm:$0xfe] %vm2284_vm8, %v3566_v15  ;;  %3453 = vrot.lane.b32.xlu1 %v2925_v42, %s5280_s21 }
 0x92b   : > { %v3072_v7 = vpop.permute.xlu0 %3071  ;;  %v4033_v49 = vld [vmem:[#allocation4 + $0xa8] sm:$0xff] }
 0x92c   : > { %3136 = vst.msk [vmem:[#allocation4 + $0xd8] sm:$0xff] %vm2156_vm4, %v3072_v7  ;;  %v3070_v8 = vpop.permute.xlu1 %3069  ;;  %v4032_v38 = vld [vmem:[#allocation4 + $0xa0] sm:$0xff] }
 0x92d   : > { %3135 = vst.msk [vmem:[#allocation4 + $0xd0] sm:$0xff] %vm2156_vm4, %v3070_v8  ;;  %5044 = vmatprep.mubr.msk.f32.mxu1 %vm2110_vm0, %v4032_v38  ;;  %3583 = vrot.lane.b32.xlu0 %v2926_v33, %s5282_s29 }
 0x92e   : > { %5045 = vmatmul.mubr.msk.f32.gmra.mrb[42].mxu1 %vm2110_vm0, %v4033_v49  ;;  %3581 = vrot.lane.b32.xlu1 %v2925_v42, %s5282_s29 }
 0x92f   : > { %v3192_v13 = vpop.permute.xlu0 %3191 }
 0x930   : > { %3257 = vst.msk [vmem:[#allocation4 + $0xd7] sm:$0xff] %vm3232_vm14, %v3192_v13  ;;  %v3190_v58 = vpop.permute.xlu1 %3189 }
 0x931   : > { %3256 = vst.msk [vmem:[#allocation4 + $0xcf] sm:$0xfe] %vm2185_vm5, %v3190_v58  ;;  %3893 = vrot.lane.b32.xlu0 %v7046_v62, %s5285_s19 }
 0x932   : > { %3891 = vrot.lane.b32.xlu1 %v7050_v23, %s5285_s19 }
 0x933   : > { %v3697_v54 = vpop.permute.xlu0 %3696 }
 0x934   : > { %3764 = vst.msk [vmem:[#allocation4 + $0xb9] sm:$0x7f] %vm2314_vm9, %v3697_v54  ;;  %v3695_v53 = vpop.permute.xlu1 %3694 }
 0x935   : > { %3763 = vst.msk [vmem:[#allocation4 + $0xb1] sm:$0xff] %vm3740_vm2, %v3695_v53 }
 0x937   : > { %v3315_v17 = vpop.permute.xlu0 %3314 }
 0x938   : > { %3386 = vst.msk [vmem:[#allocation4 + $0xc9] sm:$0x7f] %vm2218_vm6, %v3315_v17  ;;  %v3313_v34 = vpop.permute.xlu1 %3312 }
 0x939   : > { %3385 = vst.msk [vmem:[#allocation4 + $0xc1] sm:$0xff] %vm3360_vm15, %v3313_v34 }
 0x93b   : > { %v3818_v29 = vpop.permute.xlu0 %3817 }
 0x93c   : > { %3884 = vst.msk [vmem:[#allocation4 + $0xb8] sm:$0xff] %vm2343_vm10, %v3818_v29  ;;  %v3816_v25 = vpop.permute.xlu1 %3815 }
 0x93d   : > { %3883 = vst.msk [vmem:[#allocation4 + $0xb0] sm:$0xff] %vm2343_vm10, %v3816_v25 }
 0x93f   : > { %v3444_v62 = vpop.permute.xlu0 %3443 }
 0x940   : > { %3514 = vst.msk [vmem:[#allocation4 + $0xc8] sm:$0xff] %vm2251_vm7, %v3444_v62  ;;  %v5028_v23 = vpop.f32.mrb[30].mxu1  ;;  %v3442_v32 = vpop.permute.xlu1 %3441 }
 0x941   : > { %v4268_v47 = vadd.f32 %v5028_v23, %v7802_v30  ;;  %3513 = vst.msk [vmem:[#allocation4 + $0xc0] sm:$0xff] %vm2251_vm7, %v3442_v32  ;;  %v4262_v51 = vpop.f32.mrb[31].mxu1 }
 0x942   : > { %v4263_v24 = vadd.f32 %v7802_v30, %v4262_v51 }
 0x943   : > { %v4390_v36 = vmax.f32 %v4268_v47, 0.0  ;;  %v3938_v19 = vpop.permute.xlu0 %3937 }
 0x944   : > { %v4389_v41 = vmax.f32 %v4263_v24, 0.0  ;;  %4005 = vst.msk [vmem:[#allocation4 + $0xb7] sm:$0xff] %vm3982_vm12, %v3938_v19  ;;  %v3936_v61 = vpop.permute.xlu1 %3935 }
 0x945   : > { %v4422_v35 = vadd.f32 %v4390_v36, %v5467_v9  ;;  %4004 = vst.msk [vmem:[#allocation4 + $0xaf] sm:$0xfe] %vm2372_vm11, %v3936_v61 }
 0x946   : > { %v4421_v55 = vadd.f32 %v4389_v41, %v5470_v10 }
 0x947   : > { %4454 = vst.msk [vmem:[%s7817_s24 + $0x48] sm:$0xff] %vm399_vm1, %v4422_v35  ;;  %v3572_v26 = vpop.permute.xlu0 %3571 }
 0x948   : > { %4453 = vst.msk [vmem:[%s7817_s24 + $0x40] sm:$0xff] %vm399_vm1, %v4421_v55  ;;  %v3570_v59 = vpop.permute.xlu1 %3569 }
 0x949   : > { %3643 = vst.msk [vmem:[#allocation4 + $0xc7] sm:$0xff] %vm3618_vm3, %v3572_v26 }
 0x94a   : > { %3642 = vst.msk [vmem:[#allocation4 + $0xbf] sm:$0xfe] %vm2284_vm8, %v3570_v59 }
 0x94b   : > { %v3076_v39 = vpop.permute.xlu0 %3075  ;;  %v4035_v9 = vld [vmem:[#allocation4 + $0xb8] sm:$0xff] }
 0x94c   : > { %3138 = vst.msk [vmem:[#allocation4 + $0xe8] sm:$0xff] %vm2156_vm4, %v3076_v39  ;;  %v3074_v5 = vpop.permute.xlu1 %3073  ;;  %v4034_v6 = vld [vmem:[#allocation4 + $0xb0] sm:$0xff] }
 0x94d   : > { %3137 = vst.msk [vmem:[#allocation4 + $0xe0] sm:$0xff] %vm2156_vm4, %v3074_v5  ;;  %5047 = vmatprep.mubr.msk.f32.mxu1 %vm2110_vm0, %v4034_v6 }
 0x94e   : > { %5048 = vmatmul.mubr.msk.f32.gmra.mrb[44].mxu1 %vm2110_vm0, %v4035_v9 }
 0x94f   : > { %v3196_v10 = vpop.permute.xlu0 %3195 }
 0x950   : > { %3259 = vst.msk [vmem:[#allocation4 + $0xe7] sm:$0xff] %vm3232_vm14, %v3196_v10  ;;  %v3194_v16 = vpop.permute.xlu1 %3193 }
 0x951   : > { %3258 = vst.msk [vmem:[#allocation4 + $0xdf] sm:$0xfe] %vm2185_vm5, %v3194_v16 }
 0x953   : > { %v3701_v37 = vpop.permute.xlu0 %3700 }
 0x954   : > { %3766 = vst.msk [vmem:[#allocation4 + $0xc9] sm:$0x7f] %vm2314_vm9, %v3701_v37  ;;  %v3699_v43 = vpop.permute.xlu1 %3698 }
 0x955   : > { %3765 = vst.msk [vmem:[#allocation4 + $0xc1] sm:$0xff] %vm3740_vm2, %v3699_v43 }
 0x957   : > { %v3319_v44 = vpop.permute.xlu0 %3318 }
 0x958   : > { %3388 = vst.msk [vmem:[#allocation4 + $0xd9] sm:$0x7f] %vm2218_vm6, %v3319_v44  ;;  %v3317_v18 = vpop.permute.xlu1 %3316 }
 0x959   : > { %3387 = vst.msk [vmem:[#allocation4 + $0xd1] sm:$0xff] %vm3360_vm15, %v3317_v18 }
 0x95b   : > { %v3822_v1 = vpop.permute.xlu0 %3821 }
 0x95c   : > { %3886 = vst.msk [vmem:[#allocation4 + $0xc8] sm:$0xff] %vm2343_vm10, %v3822_v1  ;;  %v3820_v0 = vpop.permute.xlu1 %3819 }
 0x95d   : > { %3885 = vst.msk [vmem:[#allocation4 + $0xc0] sm:$0xff] %vm2343_vm10, %v3820_v0 }
 0x95f   : > { %v3448_v33 = vpop.permute.xlu0 %3447 }
 0x960   : > { %3516 = vst.msk [vmem:[#allocation4 + $0xd8] sm:$0xff] %vm2251_vm7, %v3448_v33  ;;  %v3446_v31 = vpop.permute.xlu1 %3445 }
 0x961   : > { %3515 = vst.msk [vmem:[#allocation4 + $0xd0] sm:$0xff] %vm2251_vm7, %v3446_v31  ;;  %v8252_v31 = vld [vmem:[#allocation7_spill] sm:$0xff] }
 0x963   : > { %v3942_v46 = vpop.permute.xlu0 %3941 }
 0x964   : > { %4007 = vst.msk [vmem:[#allocation4 + $0xc7] sm:$0xff] %vm3982_vm12, %v3942_v46  ;;  %v3940_v42 = vpop.permute.xlu1 %3939 }
 0x965   : > { %4006 = vst.msk [vmem:[#allocation4 + $0xbf] sm:$0xfe] %vm2372_vm11, %v3940_v42  ;;  %v8253_v42 = vld [vmem:[#allocation8_spill] sm:$0xff] }
 0x967   : > { %v3576_v52 = vpop.permute.xlu0 %3575 }
 0x968   : > { %v5031_v50 = vpop.f32.mrb[32].mxu1  ;;  %3645 = vst.msk [vmem:[#allocation4 + $0xd7] sm:$0xff] %vm3618_vm3, %v3576_v52  ;;  %v3574_v57 = vpop.permute.xlu1 %3573 }
 0x969   : > { %v4278_v28 = vadd.f32 %v5031_v50, %v7802_v30  ;;  %v4272_v14 = vpop.f32.mrb[33].mxu1  ;;  %3644 = vst.msk [vmem:[#allocation4 + $0xcf] sm:$0xfe] %vm2284_vm8, %v3574_v57 }
 0x96a   : > { %v4273_v56 = vadd.f32 %v7802_v30, %v4272_v14 }
 0x96b   : > { %v4392_v48 = vmax.f32 %v4278_v28, 0.0  ;;  %v3080_v2 = vpop.permute.xlu0 %3079  ;;  %v4037_v22 = vld [vmem:[#allocation4 + $0xc8] sm:$0xff] }
 0x96c   : > { %v4391_v60 = vmax.f32 %v4273_v56, 0.0  ;;  %3140 = vst.msk [vmem:[#allocation4 + $0xf8] sm:$0xff] %vm2156_vm4, %v3080_v2  ;;  %v3078_v45 = vpop.permute.xlu1 %3077  ;;  %v4036_v27 = vld [vmem:[#allocation4 + $0xc0] sm:$0xff] }
 0x96d   : > { %v4424_v63 = vadd.f32 %v4392_v48, %v5499_v11  ;;  %3139 = vst.msk [vmem:[#allocation4 + $0xf0] sm:$0xff] %vm2156_vm4, %v3078_v45  ;;  %5050 = vmatprep.mubr.msk.f32.mxu1 %vm2110_vm0, %v4036_v27  ;;  %v8254_v45 = vld [vmem:[#allocation9_spill] sm:$0xff] }
 0x96e   : > { %v4423_v40 = vadd.f32 %v4391_v60, %v5502_v12  ;;  %5051 = vmatmul.mubr.msk.f32.gmra.mrb[46].mxu1 %vm2110_vm0, %v4037_v22  ;;  %v8255_v22 = vld [vmem:[#allocation10_spill] sm:$0xff] }
 0x96f   : > { %4456 = vst.msk [vmem:[%s7817_s24 + $0x58] sm:$0xff] %vm399_vm1, %v4424_v63  ;;  %v3200_v3 = vpop.permute.xlu0 %3199 }
 0x970   : > { %4455 = vst.msk [vmem:[%s7817_s24 + $0x50] sm:$0xff] %vm399_vm1, %v4423_v40  ;;  %v3198_v11 = vpop.permute.xlu1 %3197 }
 0x971   : > { %3261 = vst.msk [vmem:[#allocation4 + $0xf7] sm:$0xff] %vm3232_vm14, %v3200_v3 }
 0x972   : > { %3260 = vst.msk [vmem:[#allocation4 + $0xef] sm:$0xfe] %vm2185_vm5, %v3198_v11 }
 0x973   : > { %v3705_v12 = vpop.permute.xlu0 %3704 }
 0x974   : > { %3768 = vst.msk [vmem:[#allocation4 + $0xd9] sm:$0x7f] %vm2314_vm9, %v3705_v12  ;;  %v3703_v4 = vpop.permute.xlu1 %3702 }
 0x975   : > { %3767 = vst.msk [vmem:[#allocation4 + $0xd1] sm:$0xff] %vm3740_vm2, %v3703_v4 }
 0x977   : > { %v3323_v15 = vpop.permute.xlu0 %3322 }
 0x978   : > { %3390 = vst.msk [vmem:[#allocation4 + $0xe9] sm:$0x7f] %vm2218_vm6, %v3323_v15  ;;  %v3321_v7 = vpop.permute.xlu1 %3320 }
 0x979   : > { %3389 = vst.msk [vmem:[#allocation4 + $0xe1] sm:$0xff] %vm3360_vm15, %v3321_v7 }
 0x97b   : > { %v3826_v8 = vpop.permute.xlu0 %3825 }
 0x97c   : > { %3888 = vst.msk [vmem:[#allocation4 + $0xd8] sm:$0xff] %vm2343_vm10, %v3826_v8  ;;  %v3824_v38 = vpop.permute.xlu1 %3823 }
 0x97d   : > { %3887 = vst.msk [vmem:[#allocation4 + $0xd0] sm:$0xff] %vm2343_vm10, %v3824_v38  ;;  %v8256_v38 = vld [vmem:[#allocation11_spill] sm:$0xff] }
 0x97f   : > { %v3452_v49 = vpop.permute.xlu0 %3451 }
 0x980   : > { %3518 = vst.msk [vmem:[#allocation4 + $0xe8] sm:$0xff] %vm2251_vm7, %v3452_v49  ;;  %v3450_v13 = vpop.permute.xlu1 %3449 }
 0x981   : > { %3517 = vst.msk [vmem:[#allocation4 + $0xe0] sm:$0xff] %vm2251_vm7, %v3450_v13  ;;  %v5034_v58 = vpop.f32.mrb[34].mxu1  ;;  %v8257_v13 = vld [vmem:[#allocation12_spill] sm:$0xff] }
 0x982   : > { %v4288_v54 = vadd.f32 %v5034_v58, %v7802_v30  ;;  %v4282_v53 = vpop.f32.mrb[35].mxu1 }
 0x983   : > { %v4283_v17 = vadd.f32 %v7802_v30, %v4282_v53  ;;  %v3946_v34 = vpop.permute.xlu0 %3945 }
 0x984   : > { %v4394_v29 = vmax.f32 %v4288_v54, 0.0  ;;  %4009 = vst.msk [vmem:[#allocation4 + $0xd7] sm:$0xff] %vm3982_vm12, %v3946_v34  ;;  %v3944_v25 = vpop.permute.xlu1 %3943 }
 0x985   : > { %v4393_v62 = vmax.f32 %v4283_v17, 0.0  ;;  %4008 = vst.msk [vmem:[#allocation4 + $0xcf] sm:$0xfe] %vm2372_vm11, %v3944_v25 }
 0x986   : > { %v4426_v23 = vadd.f32 %v4394_v29, %v5556_v20 }
 0x987   : > { %v4425_v32 = vadd.f32 %v4393_v62, %v5565_v21  ;;  %v3580_v47 = vpop.permute.xlu0 %3579  ;;  %v8258_v62 = vld [vmem:[#allocation13_spill] sm:$0xff] }
 0x988   : > { %4458 = vst.msk [vmem:[%s7817_s24 + $0x68] sm:$0xff] %vm399_vm1, %v4426_v23  ;;  %v3578_v51 = vpop.permute.xlu1 %3577 }
 0x989   : > { %3647 = vst.msk [vmem:[#allocation4 + $0xe7] sm:$0xff] %vm3618_vm3, %v3580_v47 }
 0x98a   : > { %4457 = vst.msk [vmem:[%s7817_s24 + $0x60] sm:$0xff] %vm399_vm1, %v4425_v32  ;;  %v8259_v32 = vld [vmem:[#allocation14_spill] sm:$0xff] }
 0x98b   : > { %3646 = vst.msk [vmem:[#allocation4 + $0xdf] sm:$0xfe] %vm2284_vm8, %v3578_v51  ;;  %v3709_v24 = vpop.permute.xlu0 %3708  ;;  %v4039_v20 = vld [vmem:[#allocation4 + $0xd8] sm:$0xff] }
 0x98c   : > { %3770 = vst.msk [vmem:[#allocation4 + $0xe9] sm:$0x7f] %vm2314_vm9, %v3709_v24  ;;  %v3707_v36 = vpop.permute.xlu1 %3706  ;;  %v4038_v19 = vld [vmem:[#allocation4 + $0xd0] sm:$0xff] }
 0x98d   : > { %3769 = vst.msk [vmem:[#allocation4 + $0xe1] sm:$0xff] %vm3740_vm2, %v3707_v36  ;;  %5053 = vmatprep.mubr.msk.f32.mxu1 %vm2110_vm0, %v4038_v19 }
 0x98e   : > { %5054 = vmatmul.mubr.msk.f32.gmra.mrb[48].mxu1 %vm2110_vm0, %v4039_v20 }
 0x98f   : > { %v3830_v21 = vpop.permute.xlu0 %3829 }
 0x990   : > { %3890 = vst.msk [vmem:[#allocation4 + $0xe8] sm:$0xff] %vm2343_vm10, %v3830_v21  ;;  %v3828_v41 = vpop.permute.xlu1 %3827 }
 0x991   : > { %3889 = vst.msk [vmem:[#allocation4 + $0xe0] sm:$0xff] %vm2343_vm10, %v3828_v41  ;;  %v8260_v41 = vld [vmem:[#allocation15_spill] sm:$0xff] }
 0x993   : > { %v3950_v61 = vpop.permute.xlu0 %3949 }
 0x994   : > { %4011 = vst.msk [vmem:[#allocation4 + $0xe7] sm:$0xff] %vm3982_vm12, %v3950_v61  ;;  %v3948_v35 = vpop.permute.xlu1 %3947 }
 0x995   : > { %4010 = vst.msk [vmem:[#allocation4 + $0xdf] sm:$0xfe] %vm2372_vm11, %v3948_v35  ;;  %v8261_v35 = vld [vmem:[#allocation16_spill] sm:$0xff] }
 0x997   : > { %v3327_v55 = vpop.permute.xlu0 %3326 }
 0x998   : > { %3392 = vst.msk [vmem:[#allocation4 + $0xf9] sm:$0x7f] %vm2218_vm6, %v3327_v55  ;;  %v3325_v26 = vpop.permute.xlu1 %3324 }
 0x999   : > { %3391 = vst.msk [vmem:[#allocation4 + $0xf1] sm:$0xff] %vm3360_vm15, %v3325_v26 }
 0x99b   : > { %v3456_v59 = vpop.permute.xlu0 %3455  ;;  %v4041_v6 = vld [vmem:[#allocation4 + $0xe8] sm:$0xff] }
 0x99c   : > { %3520 = vst.msk [vmem:[#allocation4 + $0xf8] sm:$0xff] %vm2251_vm7, %v3456_v59  ;;  %v3454_v39 = vpop.permute.xlu1 %3453  ;;  %v4040_v5 = vld [vmem:[#allocation4 + $0xe0] sm:$0xff] }
 0x99d   : > { %3519 = vst.msk [vmem:[#allocation4 + $0xf0] sm:$0xff] %vm2251_vm7, %v3454_v39  ;;  %5056 = vmatprep.mubr.msk.f32.mxu1 %vm2110_vm0, %v4040_v5 }
 0x99e   : > { %5057 = vmatmul.mubr.msk.f32.gmra.mrb[50].mxu1 %vm2110_vm0, %v4041_v6 }
 0x99f   : > { %v3584_v9 = vpop.permute.xlu0 %3583 }
 0x9a0   : > { %3649 = vst.msk [vmem:[#allocation4 + $0xf7] sm:$0xff] %vm3618_vm3, %v3584_v9  ;;  %v3582_v10 = vpop.permute.xlu1 %3581 }
 0x9a1   : > { %3648 = vst.msk [vmem:[#allocation4 + $0xef] sm:$0xfe] %vm2284_vm8, %v3582_v10  ;;  %v5037_v16 = vpop.f32.mrb[36].mxu1  ;;  %v8262_v10 = vld [vmem:[#allocation17_spill] sm:$0xff] }
 0x9a2   : > { %v4298_v37 = vadd.f32 %v5037_v16, %v7802_v30  ;;  %v4292_v43 = vpop.f32.mrb[37].mxu1 }
 0x9a3   : > { %v4293_v44 = vadd.f32 %v7802_v30, %v4292_v43  ;;  %v3894_v18 = vpop.permute.xlu0 %3893 }
 0x9a4   : > { %v4396_v1 = vmax.f32 %v4298_v37, 0.0  ;;  %3983 = vst.msk [vmem:[#allocation4 + $0x7] sm:$0xff] %vm3982_vm12, %v3894_v18  ;;  %v3892_v0 = vpop.permute.xlu1 %3891  ;;  %v8263_v37 = vld [vmem:[#allocation18_spill] sm:$0xff] }
 0x9a5   : > { %v4395_v33 = vmax.f32 %v4293_v44, 0.0  ;;  %3981 = vst.msk [vmem:[#allocation4 - $0x1] sm:$0xfe] %vm2372_vm11, %v3892_v0 }
 0x9a6   : > { %v4428_v46 = vadd.f32 %v4396_v1, %v8252_v31 }
 0x9a7   : > { %v4427_v50 = vadd.f32 %v4395_v33, %v8253_v42  ;;  %v4043_v14 = vld [vmem:[#allocation4 + $0xf8] sm:$0xff] }
 0x9a8   : > { %4460 = vst.msk [vmem:[%s7817_s24 + $0x78] sm:$0xff] %vm399_vm1, %v4428_v46  ;;  %v4042_v28 = vld [vmem:[#allocation4 + $0xf0] sm:$0xff] }
 0x9a9   : > { %4459 = vst.msk [vmem:[%s7817_s24 + $0x70] sm:$0xff] %vm399_vm1, %v4427_v50  ;;  %5059 = vmatprep.mubr.msk.f32.mxu1 %vm2110_vm0, %v4042_v28  ;;  %v8264_v46 = vld [vmem:[#allocation19_spill] sm:$0xff]  ;;  %v8265_v50 = vld [vmem:[#allocation20_spill] sm:$0xff] }
 0x9aa   : > { %5060 = vmatmul.mubr.msk.f32.gmra.mrb[52].mxu1 %vm2110_vm0, %v4043_v14 }
 0x9ab   : > { %v4013_v56 = vld [vmem:[#allocation4 + $0x8] sm:$0xff] }
 0x9ac   : > { %v4012_v52 = vld [vmem:[#allocation4] sm:$0xff] }
 0x9ad   : > { %5014 = vmatprep.mubr.msk.f32.mxu0 %vm2110_vm0, %v4012_v52 }
 0x9ae   : > { %5015 = vmatmul.mubr.msk.f32.vlgmr.msra.gmra.mrb[64].mxu0 %vm2110_vm0, %v4013_v56 }
 0x9c1   : > { %v5040_v57 = vpop.f32.mrb[38].mxu1 }
 0x9c2   : > { %v4308_v48 = vadd.f32 %v5040_v57, %v7802_v30  ;;  %v4302_v60 = vpop.f32.mrb[39].mxu1 }
 0x9c3   : > { %v4303_v63 = vadd.f32 %v7802_v30, %v4302_v60 }
 0x9c4   : > { %v4398_v2 = vmax.f32 %v4308_v48, 0.0 }
 0x9c5   : > { %v4397_v40 = vmax.f32 %v4303_v63, 0.0  ;;  %v8266_v63 = vld [vmem:[#allocation21_spill] sm:$0xff] }
 0x9c6   : > { %v4430_v27 = vadd.f32 %v4398_v2, %v8254_v45 }
 0x9c7   : > { %v4429_v3 = vadd.f32 %v4397_v40, %v8255_v22  ;;  %v8267_v40 = vld [vmem:[#allocation22_spill] sm:$0xff] }
 0x9c8   : > { %4462 = vst.msk [vmem:[%s7817_s24 + $0x88] sm:$0xff] %vm399_vm1, %v4430_v27 }
 0x9c9   : > { %4461 = vst.msk [vmem:[%s7817_s24 + $0x80] sm:$0xff] %vm399_vm1, %v4429_v3 }
 0x9e1   : > { %v5043_v11 = vpop.f32.mrb[40].mxu1 }
 0x9e2   : > { %v4318_v12 = vadd.f32 %v5043_v11, %v7802_v30  ;;  %v4312_v4 = vpop.f32.mrb[41].mxu1 }
 0x9e3   : > { %v4313_v15 = vadd.f32 %v7802_v30, %v4312_v4 }
 0x9e4   : > { %v4400_v7 = vmax.f32 %v4318_v12, 0.0 }
 0x9e5   : > { %v4399_v8 = vmax.f32 %v4313_v15, 0.0 }
 0x9e6   : > { %v4432_v49 = vadd.f32 %v4400_v7, %v8256_v38  ;;  %v5262_v7 = vld [vmem:[%s5426_s15 + $0xf8] sm:$0xff] }
 0x9e7   : > { %v4431_v58 = vadd.f32 %v4399_v8, %v8257_v13  ;;  %v5263_v13 = vld [vmem:[%s5426_s15 + $0xf0] sm:$0xff] }
 0x9e8   : > { %4464 = vst.msk [vmem:[%s7817_s24 + $0x98] sm:$0xff] %vm399_vm1, %v4432_v49 }
 0x9e9   : > { %4463 = vst.msk [vmem:[%s7817_s24 + $0x90] sm:$0xff] %vm399_vm1, %v4431_v58 }
 0xa01   : > { %v5046_v54 = vpop.f32.mrb[42].mxu1 }
 0xa02   : > { %v4328_v53 = vadd.f32 %v5046_v54, %v7802_v30  ;;  %v4322_v17 = vpop.f32.mrb[43].mxu1 }
 0xa03   : > { %v4323_v34 = vadd.f32 %v7802_v30, %v4322_v17 }
 0xa04   : > { %v4402_v29 = vmax.f32 %v4328_v53, 0.0 }
 0xa05   : > { %v4401_v25 = vmax.f32 %v4323_v34, 0.0  ;;  %v8268_v34 = vld [vmem:[#allocation6_spill] sm:$0xff] }
 0xa06   : > { %v4434_v23 = vadd.f32 %v4402_v29, %v8258_v62 }
 0xa07   : > { %v4433_v47 = vadd.f32 %v4401_v25, %v8259_v32  ;;  %v8269_v25 = vld [vmem:[#allocation5_spill] sm:$0xff] }
 0xa08   : > { %4466 = vst.msk [vmem:[%s7817_s24 + $0xa8] sm:$0xff] %vm399_vm1, %v4434_v23 }
 0xa09   : > { %4465 = vst.msk [vmem:[%s7817_s24 + $0xa0] sm:$0xff] %vm399_vm1, %v4433_v47 }
 0xa21   : > { %v5049_v51 = vpop.f32.mrb[44].mxu1 }
 0xa22   : > { %v4338_v24 = vadd.f32 %v5049_v51, %v7802_v30  ;;  %v4332_v36 = vpop.f32.mrb[45].mxu1 }
 0xa23   : > { %v4333_v19 = vadd.f32 %v7802_v30, %v4332_v36 }
 0xa24   : > { %v4404_v20 = vmax.f32 %v4338_v24, 0.0 }
 0xa25   : > { %v4403_v21 = vmax.f32 %v4333_v19, 0.0 }
 0xa26   : > { %v4436_v61 = vadd.f32 %v4404_v20, %v8260_v41 }
 0xa27   : > { %v4435_v55 = vadd.f32 %v4403_v21, %v8261_v35 }
 0xa28   : > { %4468 = vst.msk [vmem:[%s7817_s24 + $0xb8] sm:$0xff] %vm399_vm1, %v4436_v61 }
 0xa29   : > { %4467 = vst.msk [vmem:[%s7817_s24 + $0xb0] sm:$0xff] %vm399_vm1, %v4435_v55 }
 0xa41   : > { %v5052_v26 = vpop.f32.mrb[46].mxu1 }
 0xa42   : > { %v4348_v59 = vadd.f32 %v5052_v26, %v7802_v30  ;;  %v4342_v39 = vpop.f32.mrb[47].mxu1 }
 0xa43   : > { %v4343_v5 = vadd.f32 %v7802_v30, %v4342_v39 }
 0xa44   : > { %v4406_v6 = vmax.f32 %v4348_v59, 0.0 }
 0xa45   : > { %v4405_v9 = vmax.f32 %v4343_v5, 0.0 }
 0xa46   : > { %v4438_v16 = vadd.f32 %v4406_v6, %v8262_v10 }
 0xa47   : > { %v4437_v43 = vadd.f32 %v4405_v9, %v8263_v37 }
 0xa48   : > { %4470 = vst.msk [vmem:[%s7817_s24 + $0xc8] sm:$0xff] %vm399_vm1, %v4438_v16 }
 0xa49   : > { %4469 = vst.msk [vmem:[%s7817_s24 + $0xc0] sm:$0xff] %vm399_vm1, %v4437_v43 }
 0xa61   : > { %v5055_v44 = vpop.f32.mrb[48].mxu1 }
 0xa62   : > { %v4358_v18 = vadd.f32 %v5055_v44, %v7802_v30  ;;  %v4352_v1 = vpop.f32.mrb[49].mxu1 }
 0xa63   : > { %v4353_v0 = vadd.f32 %v7802_v30, %v4352_v1 }
 0xa64   : > { %v4408_v33 = vmax.f32 %v4358_v18, 0.0 }
 0xa65   : > { %v4407_v31 = vmax.f32 %v4353_v0, 0.0 }
 0xa66   : > { %v4440_v42 = vadd.f32 %v4408_v33, %v8264_v46 }
 0xa67   : > { %v4439_v28 = vadd.f32 %v4407_v31, %v8265_v50 }
 0xa68   : > { %4472 = vst.msk [vmem:[%s7817_s24 + $0xd8] sm:$0xff] %vm399_vm1, %v4440_v42 }
 0xa69   : > { %4471 = vst.msk [vmem:[%s7817_s24 + $0xd0] sm:$0xff] %vm399_vm1, %v4439_v28 }
 0xa71   : > { %v5058_v14 = vpop.f32.mrb[50].mxu1 }
 0xa72   : > { %v4368_v52 = vadd.f32 %v5058_v14, %v7802_v30  ;;  %v4362_v56 = vpop.f32.mrb[51].mxu1 }
 0xa73   : > { %v4363_v57 = vadd.f32 %v7802_v30, %v4362_v56 }
 0xa74   : > { %v4410_v48 = vmax.f32 %v4368_v52, 0.0 }
 0xa75   : > { %v4409_v60 = vmax.f32 %v4363_v57, 0.0 }
 0xa76   : > { %v4442_v2 = vadd.f32 %v4410_v48, %v8266_v63 }
 0xa77   : > { %v4441_v45 = vadd.f32 %v4409_v60, %v8267_v40 }
 0xa78   : > { %4474 = vst.msk [vmem:[%s7817_s24 + $0xe8] sm:$0xff] %vm399_vm1, %v4442_v2 }
 0xa79   : > { %4473 = vst.msk [vmem:[%s7817_s24 + $0xe0] sm:$0xff] %vm399_vm1, %v4441_v45 }
 0xa7d   : > { %v5061_v27 = vpop.f32.mrb[52].mxu1 }
 0xa7e   : > { %v4378_v22 = vadd.f32 %v5061_v27, %v7802_v30  ;;  %v4372_v3 = vpop.f32.mrb[53].mxu1 }
 0xa7f   : > { %v4373_v11 = vadd.f32 %v7802_v30, %v4372_v3 }
 0xa80   : > { %v4412_v12 = vmax.f32 %v4378_v22, 0.0 }
 0xa81   : > { %v4411_v4 = vmax.f32 %v4373_v11, 0.0  ;;  %v5016_v15 = vpop.f32.mrb[64].mxu0 }
 0xa82   : > { %v4444_v8 = vadd.f32 %v5262_v7, %v4412_v12  ;;  %v4228_v38 = vadd.f32 %v5016_v15, %v7802_v30  ;;  %v4222_v49 = vpop.f32.mrb[65].mxu0 }
 0xa83   : > { %v4443_v58 = vadd.f32 %v5263_v13, %v4411_v4  ;;  %v4223_v54 = vadd.f32 %v7802_v30, %v4222_v49 }
 0xa84   : > { %4476 = vst.msk [vmem:[%s7817_s24 + $0xf8] sm:$0xff] %vm399_vm1, %v4444_v8  ;;  %v4382_v53 = vmax.f32 %v4228_v38, 0.0 }
 0xa85   : > { %4475 = vst.msk [vmem:[%s7817_s24 + $0xf0] sm:$0xff] %vm399_vm1, %v4443_v58  ;;  %v4381_v17 = vmax.f32 %v4223_v54, 0.0 }
 0xa86   : > { %v4414_v29 = vadd.f32 %v4382_v53, %v8268_v34 }
 0xa87   : > { %v4413_v62 = vadd.f32 %v4381_v17, %v8269_v25 }
 0xa88   : > { %4446 = vst.msk [vmem:[%s7817_s24 + $0x8] sm:$0xff] %vm399_vm1, %v4414_v29 }
 0xa89   : > { %4445 = vst.msk [vmem:[%s7817_s24] sm:$0xff] %vm399_vm1, %v4413_v62 }
 0xa8a PF: > { %s19_s30 = sadd.s32 1, %s5270_s30  }
 0xa8b   : > { %p16_p4 = scmp.ge.s32.totalorder %s19_s30, 4  }
 0xa8d   :  { %18 = sbr.rel (!%p16_p4) target bundleno = 1 (0x1), region = 89 }

</bundles_post_ra>
